<compile_context>
chip_gen: v5e
topology: v5e:2x2
jax: 0.10.0
libtpu: 0.0.40
codegen_flags: <defaults>
</compile_context>

<pallas_src>
import jax
import jax.numpy as jnp
from jax.experimental import pallas as pl
from jax.experimental.pallas import tpu as pltpu

# --- small synthetic config ---------------------------------------------------
NUM_NODES = 8                 # nodes per graph; +1 graph token -> Lt = 9
SEQ = NUM_NODES + 1
NODE_FEAT = 3
NODE_VOCAB = 64
EDGE_FEAT = 2
EDGE_VOCAB = 16
DEGREE_VOCAB = 16
NUM_SPATIAL = 16
HIDDEN = 32
N_HEADS = 4
HEAD_DIM = HIDDEN // N_HEADS
INTERMEDIATE = 64
N_LAYERS = 2
LN_EPS = 1e-5


# --- in-kernel math helpers ---------------------------------------------------
def _layer_norm(x, gamma, beta):
    mu = jnp.mean(x, axis=-1, keepdims=True)
    var = jnp.mean((x - mu) ** 2, axis=-1, keepdims=True)
    return (x - mu) * jax.lax.rsqrt(var + LN_EPS) * gamma + beta


def _erf(x):
    # Abramowitz & Stegun 7.1.26 rational approximation (|err| < ~1.5e-7); the divide is
    # replaced by an approx EUP reciprocal per the perf review (adds ~1e-3 relative error
    # to t only — acceptable for a feature extractor, documented here).
    p = 0.3275911
    a1, a2, a3, a4, a5 = 0.254829592, -0.284496736, 1.421413741, -1.453152027, 1.061405429
    a = jnp.abs(x)
    t = pl.reciprocal(1.0 + p * a, approx=True)
    poly = t * (a1 + t * (a2 + t * (a3 + t * (a4 + t * a5))))
    e = 1.0 - poly * jnp.exp(-a * a)
    return jnp.where(x < 0.0, -e, e)


def _gelu_erf(x):
    # Graphormer uses exact (erf) GELU.  (tanh-GELU would be cheaper if ~1e-3 tol is OK.)
    return 0.5 * x * (1.0 + _erf(x * (1.0 / jnp.sqrt(2.0).astype(jnp.float32))))


# --- fused encoder kernel (one grid step == one graph) -------------------------
def fused_encoder_kernel(emb_ref, bias_ref, embln_ref,
                         wqkv_ref, bqkv_ref, wo_ref, vec_ref,
                         w1_ref, b1_ref, w2_ref, out_ref):
    # emb_ref : (1, Lt, H)   pre-LayerNorm node embeddings (graph token at row 0)
    # bias_ref: (1, NH, Lt, Lt) additive attention bias (spatial + edge + padding)
    # embln_ref: (2, H)      [gamma; beta] of embedding LayerNorm
    # wqkv_ref: (L, H, 3H)   bf16, columns = [q_heads | k_heads | v_heads], head-major
    # bqkv_ref: (L, 1, 3H)   f32
    # wo_ref  : (L, H, H)    bf16, rows head-major
    # vec_ref : (L, 6, H)    f32 rows = [bo, ln1g, ln1b, b2, ln2g, ln2b]
    # w1_ref  : (L, H, I) bf16, b1_ref: (L, 1, I) f32, w2_ref: (L, I, H) bf16
    # out_ref : (1, 1, H)    graph-token row of this graph
    Lt, H = emb_ref.shape[1], emb_ref.shape[2]
    nh = bias_ref.shape[1]
    hd = H // nh
    n_layers = wqkv_ref.shape[0]
    scale = 1.0 / float(hd) ** 0.5

    h = _layer_norm(emb_ref[0].astype(jnp.float32), embln_ref[0:1, :], embln_ref[1:2, :])
    bias = bias_ref[0].astype(jnp.float32)                          # (NH, Lt, Lt)

    for l in range(n_layers):                                       # static unroll
        wqkv = wqkv_ref[l]                                          # (H, 3H) bf16
        bqkv = bqkv_ref[l]                                          # (1, 3H) f32
        wo = wo_ref[l]                                              # (H, H)  bf16
        vec = vec_ref[l]                                            # (6, H)  f32
        w1 = w1_ref[l]                                              # (H, I)  bf16
        b1 = b1_ref[l]                                              # (1, I)  f32
        w2 = w2_ref[l]                                              # (I, H)  bf16

        # --- fused QKV projection: ONE MXU pass, then a single head split -----
        qkv = jnp.dot(h.astype(jnp.bfloat16), wqkv,
                      preferred_element_type=jnp.float32) + bqkv    # (Lt, 3H) f32
        qkv = jnp.transpose(qkv.reshape(Lt, 3 * nh, hd), (1, 0, 2)) # (3NH, Lt, HD)
        q = qkv[0:nh] * scale
        k = qkv[nh:2 * nh]
        v = qkv[2 * nh:3 * nh]

        # --- per-head scores / softmax (head axis = leading batch dim) --------
        s = jnp.einsum('hqd,hkd->hqk',
                       q.astype(jnp.bfloat16), k.astype(jnp.bfloat16),
                       preferred_element_type=jnp.float32) + bias   # (NH, Lt, Lt)
        s = s - jnp.max(s, axis=-1, keepdims=True)
        p = jnp.exp(s)
        p = p * pl.reciprocal(jnp.sum(p, axis=-1, keepdims=True), approx=True)
        ctx = jnp.einsum('hqk,hkd->hqd',
                         p.astype(jnp.bfloat16), v.astype(jnp.bfloat16),
                         preferred_element_type=jnp.float32)        # (NH, Lt, HD)

        # --- output projection: ONE MXU pass ((Lt,H)@(H,H)) --------------------
        ctx2 = jnp.transpose(ctx, (1, 0, 2)).reshape(Lt, H)         # head-major concat
        attn = jnp.dot(ctx2.astype(jnp.bfloat16), wo,
                       preferred_element_type=jnp.float32) + vec[0:1, :]
        h1 = _layer_norm(h + attn, vec[1:2, :], vec[2:3, :])

        # --- feed-forward -------------------------------------------------------
        ff = jnp.dot(h1.astype(jnp.bfloat16), w1,
                     preferred_element_type=jnp.float32) + b1
        ff = _gelu_erf(ff)
        ff = jnp.dot(ff.astype(jnp.bfloat16), w2,
                     preferred_element_type=jnp.float32) + vec[3:4, :]
        h = _layer_norm(h1 + ff, vec[4:5, :], vec[5:6, :])

    # zero_index: graph-token row only — a single vector store per grid step.
    out_ref[0] = h[0:1, :].astype(out_ref.dtype)


# --- parameter init (deterministic, synthetic) --------------------------------
def init_params(key):
    keys = jax.random.split(key, 16 + 6 * N_LAYERS)
    it = iter(keys)

    def w(shape):
        return jax.random.normal(next(it), shape, jnp.float32) * 0.02

    params = {
        'atom_encoder': w((NODE_VOCAB, HIDDEN)),
        'in_degree_encoder': w((DEGREE_VOCAB, HIDDEN)),
        'out_degree_encoder': w((DEGREE_VOCAB, HIDDEN)),
        'graph_token': w((1, HIDDEN)),
        'spatial_pos_encoder': w((NUM_SPATIAL, N_HEADS)),
        'edge_encoder': w((EDGE_VOCAB, N_HEADS)),
        'graph_token_virtual_distance': w((1, N_HEADS)),
        'emb_ln_g': jnp.ones((HIDDEN,), jnp.float32),
        'emb_ln_b': jnp.zeros((HIDDEN,), jnp.float32),
        'layers': [],
    }
    for _ in range(N_LAYERS):
        lp = {
            'wq': w((HIDDEN, HIDDEN)), 'bq': jnp.zeros((HIDDEN,), jnp.float32),
            'wk': w((HIDDEN, HIDDEN)), 'bk': jnp.zeros((HIDDEN,), jnp.float32),
            'wv': w((HIDDEN, HIDDEN)), 'bv': jnp.zeros((HIDDEN,), jnp.float32),
            'wo': w((HIDDEN, HIDDEN)), 'bo': jnp.zeros((HIDDEN,), jnp.float32),
            'ln1g': jnp.ones((HIDDEN,), jnp.float32),
            'ln1b': jnp.zeros((HIDDEN,), jnp.float32),
            'w1': w((HIDDEN, INTERMEDIATE)), 'b1': jnp.zeros((INTERMEDIATE,), jnp.float32),
            'w2': w((INTERMEDIATE, HIDDEN)), 'b2': jnp.zeros((HIDDEN,), jnp.float32),
            'ln2g': jnp.ones((HIDDEN,), jnp.float32),
            'ln2b': jnp.zeros((HIDDEN,), jnp.float32),
        }
        params['layers'].append(lp)
    return params


# --- packing: per-layer params -> layer-stacked arrays, matmul weights in bf16 --
def pack_layer_params(layers):
    wqkv, bqkv, wo, vec, w1, b1, w2 = [], [], [], [], [], [], []
    for lp in layers:
        wqkv.append(jnp.concatenate([lp['wq'], lp['wk'], lp['wv']], axis=1))     # (H, 3H)
        bqkv.append(jnp.concatenate([lp['bq'], lp['bk'], lp['bv']]).reshape(1, 3 * HIDDEN))
        wo.append(lp['wo'])                                                       # (H, H)
        vec.append(jnp.stack([lp['bo'], lp['ln1g'], lp['ln1b'],
                              lp['b2'], lp['ln2g'], lp['ln2b']], axis=0))
        w1.append(lp['w1'])
        b1.append(lp['b1'].reshape(1, INTERMEDIATE))
        w2.append(lp['w2'])
    return (jnp.stack(wqkv).astype(jnp.bfloat16),
            jnp.stack(bqkv),
            jnp.stack(wo).astype(jnp.bfloat16),
            jnp.stack(vec),
            jnp.stack(w1).astype(jnp.bfloat16),
            jnp.stack(b1),
            jnp.stack(w2).astype(jnp.bfloat16))


# --- full forward (embedding gathers in plain JAX glue, encoder fused in Pallas) -
def graphormer_feature_extractor(params, input_nodes, input_edges, attn_bias,
                                 in_degree, out_degree, spatial_pos, attn_edge_type):
    B, N, _ = input_nodes.shape
    Lt = N + 1

    # node embeddings: atom features + degree encoders, graph token prepended
    x = params['atom_encoder'][input_nodes].sum(axis=2)                 # (B, N, H)
    x = x + params['in_degree_encoder'][in_degree]
    x = x + params['out_degree_encoder'][out_degree]
    graph_tok = jnp.broadcast_to(params['graph_token'][None], (B, 1, HIDDEN))
    emb = jnp.concatenate([graph_tok, x], axis=1).astype(jnp.float32)   # (B, Lt, H)

    # per-graph, per-head additive attention bias (padding mask comes in via attn_bias)
    bias = jnp.broadcast_to(attn_bias[:, None, :, :].astype(jnp.float32),
                            (B, N_HEADS, Lt, Lt))
    spatial = jnp.transpose(params['spatial_pos_encoder'][spatial_pos], (0, 3, 1, 2))
    edge = jnp.transpose(params['edge_encoder'][attn_edge_type].sum(axis=3), (0, 3, 1, 2))
    bias = bias.at[:, :, 1:, 1:].add(spatial + edge)
    t = params['graph_token_virtual_distance'].reshape(1, N_HEADS, 1)
    bias = bias.at[:, :, 1:, 0].add(t)
    bias = bias.at[:, :, 0, :].add(t)
    # TODO(synk): multi-hop shortest-path edge encoding from `input_edges` not implemented.

    emb_ln = jnp.stack([params['emb_ln_g'], params['emb_ln_b']], axis=0)  # (2, H)
    packed = pack_layer_params(params['layers'])

    flops = B * N_LAYERS * (
        2 * Lt * HIDDEN * (3 * HIDDEN)                 # fused QKV
        + 2 * N_HEADS * Lt * Lt * HEAD_DIM * 2         # scores + context
        + 2 * Lt * HIDDEN * HIDDEN                     # output projection
        + 2 * 2 * Lt * HIDDEN * INTERMEDIATE)          # FFN
    transcendentals = B * N_LAYERS * (N_HEADS * Lt * Lt + 2 * Lt * INTERMEDIATE)
    bytes_accessed = int(sum(a.size * a.dtype.itemsize
                             for a in (emb, bias, emb_ln, *packed)) + B * HIDDEN * 4)

    cls = pl.pallas_call(
        fused_encoder_kernel,
        out_shape=jax.ShapeDtypeStruct((B, 1, HIDDEN), jnp.float32),
        grid_spec=pltpu.PrefetchScalarGridSpec(
            num_scalar_prefetch=0,
            grid=(B,),
            in_specs=[
                pl.BlockSpec((1, Lt, HIDDEN), lambda b: (b, 0, 0)),
                pl.BlockSpec((1, N_HEADS, Lt, Lt), lambda b: (b, 0, 0, 0)),
                pl.BlockSpec((2, HIDDEN), lambda b: (0, 0)),
                # weight blocks: constant index_map -> fetched once, VMEM-resident
                pl.BlockSpec((N_LAYERS, HIDDEN, 3 * HIDDEN), lambda b: (0, 0, 0)),
                pl.BlockSpec((N_LAYERS, 1, 3 * HIDDEN), lambda b: (0, 0, 0)),
                pl.BlockSpec((N_LAYERS, HIDDEN, HIDDEN), lambda b: (0, 0, 0)),
                pl.BlockSpec((N_LAYERS, 6, HIDDEN), lambda b: (0, 0, 0)),
                pl.BlockSpec((N_LAYERS, HIDDEN, INTERMEDIATE), lambda b: (0, 0, 0)),
                pl.BlockSpec((N_LAYERS, 1, INTERMEDIATE), lambda b: (0, 0, 0)),
                pl.BlockSpec((N_LAYERS, INTERMEDIATE, HIDDEN), lambda b: (0, 0, 0)),
            ],
            out_specs=pl.BlockSpec((1, 1, HIDDEN), lambda b: (b, 0, 0)),
        ),
        compiler_params=pltpu.CompilerParams(
            dimension_semantics=("parallel",)),        # both v7x TCs; no-op on v5e/v6e
        cost_estimate=pl.CostEstimate(
            flops=flops, transcendentals=transcendentals, bytes_accessed=bytes_accessed),
    )(emb, bias, emb_ln, *packed)

    # zero_index already applied inside the kernel; flatten matches `x.flatten()`.
    return cls.reshape(-1)


if __name__ == "__main__":
    key = jax.random.PRNGKey(0)
    kn, ke, kd1, kd2, ksp, ket = jax.random.split(key, 6)
    B, N = 2, NUM_NODES

    input_nodes = jax.random.randint(kn, (B, N, NODE_FEAT), 1, NODE_VOCAB)
    input_edges = jax.random.randint(ke, (B, N, N, 1), 0, EDGE_VOCAB)     # see TODO above
    in_degree = jax.random.randint(kd1, (B, N), 0, 8)
    out_degree = jax.random.randint(kd2, (B, N), 0, 8)
    spatial_pos = jax.random.randint(ksp, (B, N, N), 0, NUM_SPATIAL)
    attn_edge_type = jax.random.randint(ket, (B, N, N, EDGE_FEAT), 0, EDGE_VOCAB)

    # attn_bias: 0 for valid keys, -1e9 for padded keys; pad the last 2 nodes of graph 1.
    attn_bias = jnp.zeros((B, N + 1, N + 1), jnp.float32)
    attn_bias = attn_bias.at[1, :, N - 1:].set(-1e9)

    params = init_params(jax.random.PRNGKey(42))

    fwd = jax.jit(graphormer_feature_extractor)
    out = fwd(params, input_nodes, input_edges, attn_bias,
              in_degree, out_degree, spatial_pos, attn_edge_type)
    out = jax.block_until_ready(out)
    assert out.shape == (B * HIDDEN,), out.shape
    print("KERNEL_OK")
</pallas_src>

<mosaic_0001>
module attributes {stable_mosaic.version = 11 : i64} {
  func.func @fused_encoder_kernel(%arg0: i32, %arg1: memref<1x9x32xf32, #tpu.memory_space<vmem>>, %arg2: memref<1x4x9x9xf32, #tpu.memory_space<vmem>>, %arg3: memref<2x32xf32, #tpu.memory_space<vmem>>, %arg4: memref<2x32x96xbf16, #tpu.memory_space<vmem>>, %arg5: memref<2x1x96xf32, #tpu.memory_space<vmem>>, %arg6: memref<2x32x32xbf16, #tpu.memory_space<vmem>>, %arg7: memref<2x6x32xf32, #tpu.memory_space<vmem>>, %arg8: memref<2x32x64xbf16, #tpu.memory_space<vmem>>, %arg9: memref<2x1x64xf32, #tpu.memory_space<vmem>>, %arg10: memref<2x64x32xbf16, #tpu.memory_space<vmem>>, %arg11: memref<1x1x32xf32, #tpu.memory_space<vmem>>) attributes {dimension_semantics = [#tpu.dimension_semantics<parallel>], iteration_bounds = array<i64: 2>, scalar_prefetch = 0 : i64, scratch_operands = 0 : i64, tpu.core_type = #tpu.core_type<tc>, window_params = [{transform_indices = @transform_0, window_bounds = array<i64: 1, 9, 32>}, {transform_indices = @transform_1, window_bounds = array<i64: 1, 4, 9, 9>}, {pipeline_mode = #tpu.pipeline_mode<synchronous>, transform_indices = @transform_2, window_bounds = array<i64: 2, 32>}, {pipeline_mode = #tpu.pipeline_mode<synchronous>, transform_indices = @transform_3, window_bounds = array<i64: 2, 32, 96>}, {pipeline_mode = #tpu.pipeline_mode<synchronous>, transform_indices = @transform_4, window_bounds = array<i64: 2, 1, 96>}, {pipeline_mode = #tpu.pipeline_mode<synchronous>, transform_indices = @transform_5, window_bounds = array<i64: 2, 32, 32>}, {pipeline_mode = #tpu.pipeline_mode<synchronous>, transform_indices = @transform_6, window_bounds = array<i64: 2, 6, 32>}, {pipeline_mode = #tpu.pipeline_mode<synchronous>, transform_indices = @transform_7, window_bounds = array<i64: 2, 32, 64>}, {pipeline_mode = #tpu.pipeline_mode<synchronous>, transform_indices = @transform_8, window_bounds = array<i64: 2, 1, 64>}, {pipeline_mode = #tpu.pipeline_mode<synchronous>, transform_indices = @transform_9, window_bounds = array<i64: 2, 64, 32>}, {transform_indices = @transform_10, window_bounds = array<i64: 1, 1, 32>}]} {
    %c0 = arith.constant 0 : index
    %c0_0 = arith.constant 0 : index
    %c0_1 = arith.constant 0 : index
    %0 = vector.load %arg1[%c0, %c0_0, %c0_1] : memref<1x9x32xf32, #tpu.memory_space<vmem>>, vector<1x9x32xf32>
    %1 = vector.shape_cast %0 : vector<1x9x32xf32> to vector<9x32xf32>
    %c0_2 = arith.constant 0 : index
    %c0_3 = arith.constant 0 : index
    %2 = vector.load %arg3[%c0_2, %c0_3] : memref<2x32xf32, #tpu.memory_space<vmem>>, vector<1x32xf32>
    %c1 = arith.constant 1 : index
    %c0_4 = arith.constant 0 : index
    %3 = vector.load %arg3[%c1, %c0_4] : memref<2x32xf32, #tpu.memory_space<vmem>>, vector<1x32xf32>
    %cst = arith.constant dense<0.000000e+00> : vector<9xf32>
    %4 = vector.multi_reduction <add>, %1, %cst [1] : vector<9x32xf32> to vector<9xf32>
    %5 = vector.shape_cast %4 : vector<9xf32> to vector<9x1xf32>
    %cst_5 = arith.constant 3.200000e+01 : f32
    %6 = vector.broadcast %cst_5 : f32 to vector<9x1xf32>
    %7 = arith.divf %5, %6 : vector<9x1xf32>
    %8 = vector.broadcast %7 : vector<9x1xf32> to vector<9x32xf32>
    %9 = arith.subf %1, %8 : vector<9x32xf32>
    %10 = arith.mulf %9, %9 : vector<9x32xf32>
    %cst_6 = arith.constant dense<0.000000e+00> : vector<9xf32>
    %11 = vector.multi_reduction <add>, %10, %cst_6 [1] : vector<9x32xf32> to vector<9xf32>
    %12 = vector.shape_cast %11 : vector<9xf32> to vector<9x1xf32>
    %cst_7 = arith.constant 3.200000e+01 : f32
    %13 = vector.broadcast %cst_7 : f32 to vector<9x1xf32>
    %14 = arith.divf %12, %13 : vector<9x1xf32>
    %15 = vector.broadcast %7 : vector<9x1xf32> to vector<9x32xf32>
    %16 = arith.subf %1, %15 : vector<9x32xf32>
    %cst_8 = arith.constant 9.99999974E-6 : f32
    %17 = vector.broadcast %cst_8 : f32 to vector<9x1xf32>
    %18 = arith.addf %14, %17 : vector<9x1xf32>
    %19 = math.rsqrt %18 : vector<9x1xf32>
    %20 = vector.broadcast %19 : vector<9x1xf32> to vector<9x32xf32>
    %21 = arith.mulf %16, %20 : vector<9x32xf32>
    %22 = vector.broadcast %2 : vector<1x32xf32> to vector<9x32xf32>
    %23 = arith.mulf %21, %22 : vector<9x32xf32>
    %24 = vector.broadcast %3 : vector<1x32xf32> to vector<9x32xf32>
    %25 = arith.addf %23, %24 : vector<9x32xf32>
    %c0_9 = arith.constant 0 : index
    %c0_10 = arith.constant 0 : index
    %c0_11 = arith.constant 0 : index
    %c0_12 = arith.constant 0 : index
    %26 = vector.load %arg2[%c0_9, %c0_10, %c0_11, %c0_12] : memref<1x4x9x9xf32, #tpu.memory_space<vmem>>, vector<1x4x9x9xf32>
    %27 = vector.shape_cast %26 : vector<1x4x9x9xf32> to vector<4x9x9xf32>
    %c0_13 = arith.constant 0 : index
    %c0_14 = arith.constant 0 : index
    %c0_15 = arith.constant 0 : index
    %28 = vector.load %arg4[%c0_13, %c0_14, %c0_15] : memref<2x32x96xbf16, #tpu.memory_space<vmem>>, vector<1x32x96xbf16>
    %29 = vector.shape_cast %28 : vector<1x32x96xbf16> to vector<32x96xbf16>
    %c0_16 = arith.constant 0 : index
    %c0_17 = arith.constant 0 : index
    %c0_18 = arith.constant 0 : index
    %30 = vector.load %arg5[%c0_16, %c0_17, %c0_18] : memref<2x1x96xf32, #tpu.memory_space<vmem>>, vector<1x1x96xf32>
    %31 = vector.shape_cast %30 : vector<1x1x96xf32> to vector<1x96xf32>
    %c0_19 = arith.constant 0 : index
    %c0_20 = arith.constant 0 : index
    %c0_21 = arith.constant 0 : index
    %32 = vector.load %arg6[%c0_19, %c0_20, %c0_21] : memref<2x32x32xbf16, #tpu.memory_space<vmem>>, vector<1x32x32xbf16>
    %33 = vector.shape_cast %32 : vector<1x32x32xbf16> to vector<32x32xbf16>
    %c0_22 = arith.constant 0 : index
    %c0_23 = arith.constant 0 : index
    %c0_24 = arith.constant 0 : index
    %34 = vector.load %arg7[%c0_22, %c0_23, %c0_24] : memref<2x6x32xf32, #tpu.memory_space<vmem>>, vector<1x6x32xf32>
    %35 = vector.shape_cast %34 : vector<1x6x32xf32> to vector<6x32xf32>
    %c0_25 = arith.constant 0 : index
    %c0_26 = arith.constant 0 : index
    %c0_27 = arith.constant 0 : index
    %36 = vector.load %arg8[%c0_25, %c0_26, %c0_27] : memref<2x32x64xbf16, #tpu.memory_space<vmem>>, vector<1x32x64xbf16>
    %37 = vector.shape_cast %36 : vector<1x32x64xbf16> to vector<32x64xbf16>
    %c0_28 = arith.constant 0 : index
    %c0_29 = arith.constant 0 : index
    %c0_30 = arith.constant 0 : index
    %38 = vector.load %arg9[%c0_28, %c0_29, %c0_30] : memref<2x1x64xf32, #tpu.memory_space<vmem>>, vector<1x1x64xf32>
    %39 = vector.shape_cast %38 : vector<1x1x64xf32> to vector<1x64xf32>
    %c0_31 = arith.constant 0 : index
    %c0_32 = arith.constant 0 : index
    %c0_33 = arith.constant 0 : index
    %40 = vector.load %arg10[%c0_31, %c0_32, %c0_33] : memref<2x64x32xbf16, #tpu.memory_space<vmem>>, vector<1x64x32xbf16>
    %41 = vector.shape_cast %40 : vector<1x64x32xbf16> to vector<64x32xbf16>
    %42 = arith.truncf %25 : vector<9x32xf32> to vector<9x32xbf16>
    %cst_34 = arith.constant dense<0.000000e+00> : vector<9x96xf32>
    %43 = tpu.matmul %42, %29, %cst_34 {dimension_numbers = #tpu.dot_dimension_numbers<[1], [0], [0], [1], [0, 0, 1, 1], [], []>} : vector<9x32xbf16>, vector<32x96xbf16>, vector<9x96xf32> -> vector<9x96xf32>
    %44 = vector.broadcast %31 : vector<1x96xf32> to vector<9x96xf32>
    %45 = arith.addf %43, %44 : vector<9x96xf32>
    %46 = vector.shape_cast %45 : vector<9x96xf32> to vector<9x12x8xf32>
    %47 = tpu.transpose %46, [1, 0, 2] : vector<9x12x8xf32> -> vector<12x9x8xf32>
    %48 = vector.extract_strided_slice %47 {offsets = [0, 0, 0], sizes = [4, 9, 8], strides = [1, 1, 1]} : vector<12x9x8xf32> to vector<4x9x8xf32>
    %cst_35 = arith.constant 0.353553385 : f32
    %49 = vector.broadcast %cst_35 : f32 to vector<4x9x8xf32>
    %50 = arith.mulf %48, %49 : vector<4x9x8xf32>
    %51 = vector.extract_strided_slice %47 {offsets = [4, 0, 0], sizes = [4, 9, 8], strides = [1, 1, 1]} : vector<12x9x8xf32> to vector<4x9x8xf32>
    %52 = vector.extract_strided_slice %47 {offsets = [8, 0, 0], sizes = [4, 9, 8], strides = [1, 1, 1]} : vector<12x9x8xf32> to vector<4x9x8xf32>
    %53 = arith.truncf %50 : vector<4x9x8xf32> to vector<4x9x8xbf16>
    %54 = arith.truncf %51 : vector<4x9x8xf32> to vector<4x9x8xbf16>
    "tpu.trace_start"() <{level = 10 : i32, message = "hqd,hkd->hqk"}> : () -> ()
    %cst_36 = arith.constant dense<0.000000e+00> : vector<4x9x9xf32>
    %55 = tpu.matmul %53, %54, %cst_36 {dimension_numbers = #tpu.dot_dimension_numbers<[2], [2], [1], [1], [0, 0, 0, 1, 1, 1], [0], [0]>} : vector<4x9x8xbf16>, vector<4x9x8xbf16>, vector<4x9x9xf32> -> vector<4x9x9xf32>
    "tpu.trace_stop"() : () -> ()
    %56 = arith.addf %55, %27 : vector<4x9x9xf32>
    %cst_37 = arith.constant dense<0xFF800000> : vector<4x9xf32>
    %57 = vector.multi_reduction <maximumf>, %56, %cst_37 [2] : vector<4x9x9xf32> to vector<4x9xf32>
    %58 = vector.shape_cast %57 : vector<4x9xf32> to vector<4x9x1xf32>
    %59 = vector.broadcast %58 : vector<4x9x1xf32> to vector<4x9x9xf32>
    %60 = arith.subf %56, %59 : vector<4x9x9xf32>
    %61 = math.exp %60 : vector<4x9x9xf32>
    %cst_38 = arith.constant dense<0.000000e+00> : vector<4x9xf32>
    %62 = vector.multi_reduction <add>, %61, %cst_38 [2] : vector<4x9x9xf32> to vector<4x9xf32>
    %63 = vector.shape_cast %62 : vector<4x9xf32> to vector<4x9x1xf32>
    %64 = tpu.reciprocal %63 {approx = true} : vector<4x9x1xf32> -> vector<4x9x1xf32>
    %65 = vector.broadcast %64 : vector<4x9x1xf32> to vector<4x9x9xf32>
    %66 = arith.mulf %61, %65 : vector<4x9x9xf32>
    %67 = arith.truncf %66 : vector<4x9x9xf32> to vector<4x9x9xbf16>
    %68 = arith.truncf %52 : vector<4x9x8xf32> to vector<4x9x8xbf16>
    "tpu.trace_start"() <{level = 10 : i32, message = "hqk,hkd->hqd"}> : () -> ()
    %cst_39 = arith.constant dense<0.000000e+00> : vector<4x9x8xf32>
    %69 = tpu.matmul %67, %68, %cst_39 {dimension_numbers = #tpu.dot_dimension_numbers<[2], [1], [1], [2], [0, 0, 0, 1, 1, 2], [0], [0]>} : vector<4x9x9xbf16>, vector<4x9x8xbf16>, vector<4x9x8xf32> -> vector<4x9x8xf32>
    "tpu.trace_stop"() : () -> ()
    %70 = tpu.transpose %69, [1, 0, 2] : vector<4x9x8xf32> -> vector<9x4x8xf32>
    %71 = vector.shape_cast %70 : vector<9x4x8xf32> to vector<9x32xf32>
    %72 = arith.truncf %71 : vector<9x32xf32> to vector<9x32xbf16>
    %cst_40 = arith.constant dense<0.000000e+00> : vector<9x32xf32>
    %73 = tpu.matmul %72, %33, %cst_40 {dimension_numbers = #tpu.dot_dimension_numbers<[1], [0], [0], [1], [0, 0, 1, 1], [], []>} : vector<9x32xbf16>, vector<32x32xbf16>, vector<9x32xf32> -> vector<9x32xf32>
    %74 = vector.extract_strided_slice %35 {offsets = [0, 0], sizes = [1, 32], strides = [1, 1]} : vector<6x32xf32> to vector<1x32xf32>
    %75 = vector.broadcast %74 : vector<1x32xf32> to vector<9x32xf32>
    %76 = arith.addf %73, %75 : vector<9x32xf32>
    %77 = arith.addf %25, %76 : vector<9x32xf32>
    %78 = vector.extract_strided_slice %35 {offsets = [1, 0], sizes = [1, 32], strides = [1, 1]} : vector<6x32xf32> to vector<1x32xf32>
    %79 = vector.extract_strided_slice %35 {offsets = [2, 0], sizes = [1, 32], strides = [1, 1]} : vector<6x32xf32> to vector<1x32xf32>
    %cst_41 = arith.constant dense<0.000000e+00> : vector<9xf32>
    %80 = vector.multi_reduction <add>, %77, %cst_41 [1] : vector<9x32xf32> to vector<9xf32>
    %81 = vector.shape_cast %80 : vector<9xf32> to vector<9x1xf32>
    %cst_42 = arith.constant 3.200000e+01 : f32
    %82 = vector.broadcast %cst_42 : f32 to vector<9x1xf32>
    %83 = arith.divf %81, %82 : vector<9x1xf32>
    %84 = vector.broadcast %83 : vector<9x1xf32> to vector<9x32xf32>
    %85 = arith.subf %77, %84 : vector<9x32xf32>
    %86 = arith.mulf %85, %85 : vector<9x32xf32>
    %cst_43 = arith.constant dense<0.000000e+00> : vector<9xf32>
    %87 = vector.multi_reduction <add>, %86, %cst_43 [1] : vector<9x32xf32> to vector<9xf32>
    %88 = vector.shape_cast %87 : vector<9xf32> to vector<9x1xf32>
    %cst_44 = arith.constant 3.200000e+01 : f32
    %89 = vector.broadcast %cst_44 : f32 to vector<9x1xf32>
    %90 = arith.divf %88, %89 : vector<9x1xf32>
    %91 = vector.broadcast %83 : vector<9x1xf32> to vector<9x32xf32>
    %92 = arith.subf %77, %91 : vector<9x32xf32>
    %cst_45 = arith.constant 9.99999974E-6 : f32
    %93 = vector.broadcast %cst_45 : f32 to vector<9x1xf32>
    %94 = arith.addf %90, %93 : vector<9x1xf32>
    %95 = math.rsqrt %94 : vector<9x1xf32>
    %96 = vector.broadcast %95 : vector<9x1xf32> to vector<9x32xf32>
    %97 = arith.mulf %92, %96 : vector<9x32xf32>
    %98 = vector.broadcast %78 : vector<1x32xf32> to vector<9x32xf32>
    %99 = arith.mulf %97, %98 : vector<9x32xf32>
    %100 = vector.broadcast %79 : vector<1x32xf32> to vector<9x32xf32>
    %101 = arith.addf %99, %100 : vector<9x32xf32>
    %102 = arith.truncf %101 : vector<9x32xf32> to vector<9x32xbf16>
    %cst_46 = arith.constant dense<0.000000e+00> : vector<9x64xf32>
    %103 = tpu.matmul %102, %37, %cst_46 {dimension_numbers = #tpu.dot_dimension_numbers<[1], [0], [0], [1], [0, 0, 1, 1], [], []>} : vector<9x32xbf16>, vector<32x64xbf16>, vector<9x64xf32> -> vector<9x64xf32>
    %104 = vector.broadcast %39 : vector<1x64xf32> to vector<9x64xf32>
    %105 = arith.addf %103, %104 : vector<9x64xf32>
    %cst_47 = arith.constant 5.000000e-01 : f32
    %106 = vector.broadcast %cst_47 : f32 to vector<9x64xf32>
    %107 = arith.mulf %106, %105 : vector<9x64xf32>
    %cst_48 = arith.constant 2.000000e+00 : f32
    %108 = math.sqrt %cst_48 : f32
    %cst_49 = arith.constant 1.000000e+00 : f32
    %109 = arith.divf %cst_49, %108 : f32
    %110 = vector.broadcast %109 : f32 to vector<9x64xf32>
    %111 = arith.mulf %105, %110 : vector<9x64xf32>
    %112 = math.absf %111 : vector<9x64xf32>
    %cst_50 = arith.constant 0.327591091 : f32
    %113 = vector.broadcast %cst_50 : f32 to vector<9x64xf32>
    %114 = arith.mulf %113, %112 : vector<9x64xf32>
    %cst_51 = arith.constant 1.000000e+00 : f32
    %115 = vector.broadcast %cst_51 : f32 to vector<9x64xf32>
    %116 = arith.addf %115, %114 : vector<9x64xf32>
    %117 = tpu.reciprocal %116 {approx = true} : vector<9x64xf32> -> vector<9x64xf32>
    %cst_52 = arith.constant 1.06140542 : f32
    %118 = vector.broadcast %cst_52 : f32 to vector<9x64xf32>
    %119 = arith.mulf %117, %118 : vector<9x64xf32>
    %cst_53 = arith.constant -1.45315206 : f32
    %120 = vector.broadcast %cst_53 : f32 to vector<9x64xf32>
    %121 = arith.addf %120, %119 : vector<9x64xf32>
    %122 = arith.mulf %117, %121 : vector<9x64xf32>
    %cst_54 = arith.constant 1.42141378 : f32
    %123 = vector.broadcast %cst_54 : f32 to vector<9x64xf32>
    %124 = arith.addf %123, %122 : vector<9x64xf32>
    %125 = arith.mulf %117, %124 : vector<9x64xf32>
    %cst_55 = arith.constant -0.284496725 : f32
    %126 = vector.broadcast %cst_55 : f32 to vector<9x64xf32>
    %127 = arith.addf %126, %125 : vector<9x64xf32>
    %128 = arith.mulf %117, %127 : vector<9x64xf32>
    %cst_56 = arith.constant 0.254829586 : f32
    %129 = vector.broadcast %cst_56 : f32 to vector<9x64xf32>
    %130 = arith.addf %129, %128 : vector<9x64xf32>
    %131 = arith.mulf %117, %130 : vector<9x64xf32>
    %cst_57 = arith.constant 0.000000e+00 : f32
    %132 = vector.broadcast %cst_57 : f32 to vector<9x64xf32>
    %133 = arith.subf %132, %112 : vector<9x64xf32>
    %134 = arith.mulf %133, %112 : vector<9x64xf32>
    %135 = math.exp %134 : vector<9x64xf32>
    %136 = arith.mulf %131, %135 : vector<9x64xf32>
    %cst_58 = arith.constant 1.000000e+00 : f32
    %137 = vector.broadcast %cst_58 : f32 to vector<9x64xf32>
    %138 = arith.subf %137, %136 : vector<9x64xf32>
    %cst_59 = arith.constant 0.000000e+00 : f32
    %139 = vector.broadcast %cst_59 : f32 to vector<9x64xf32>
    %140 = arith.cmpf olt, %111, %139 : vector<9x64xf32>
    %cst_60 = arith.constant 0.000000e+00 : f32
    %141 = vector.broadcast %cst_60 : f32 to vector<9x64xf32>
    %142 = arith.subf %141, %138 : vector<9x64xf32>
    %143 = arith.select %140, %142, %138 : vector<9x64xi1>, vector<9x64xf32>
    %cst_61 = arith.constant 1.000000e+00 : f32
    %144 = vector.broadcast %cst_61 : f32 to vector<9x64xf32>
    %145 = arith.addf %144, %143 : vector<9x64xf32>
    %146 = arith.mulf %107, %145 : vector<9x64xf32>
    %147 = arith.truncf %146 : vector<9x64xf32> to vector<9x64xbf16>
    %cst_62 = arith.constant dense<0.000000e+00> : vector<9x32xf32>
    %148 = tpu.matmul %147, %41, %cst_62 {dimension_numbers = #tpu.dot_dimension_numbers<[1], [0], [0], [1], [0, 0, 1, 1], [], []>} : vector<9x64xbf16>, vector<64x32xbf16>, vector<9x32xf32> -> vector<9x32xf32>
    %149 = vector.extract_strided_slice %35 {offsets = [3, 0], sizes = [1, 32], strides = [1, 1]} : vector<6x32xf32> to vector<1x32xf32>
    %150 = vector.broadcast %149 : vector<1x32xf32> to vector<9x32xf32>
    %151 = arith.addf %148, %150 : vector<9x32xf32>
    %152 = arith.addf %101, %151 : vector<9x32xf32>
    %153 = vector.extract_strided_slice %35 {offsets = [4, 0], sizes = [1, 32], strides = [1, 1]} : vector<6x32xf32> to vector<1x32xf32>
    %154 = vector.extract_strided_slice %35 {offsets = [5, 0], sizes = [1, 32], strides = [1, 1]} : vector<6x32xf32> to vector<1x32xf32>
    %cst_63 = arith.constant dense<0.000000e+00> : vector<9xf32>
    %155 = vector.multi_reduction <add>, %152, %cst_63 [1] : vector<9x32xf32> to vector<9xf32>
    %156 = vector.shape_cast %155 : vector<9xf32> to vector<9x1xf32>
    %cst_64 = arith.constant 3.200000e+01 : f32
    %157 = vector.broadcast %cst_64 : f32 to vector<9x1xf32>
    %158 = arith.divf %156, %157 : vector<9x1xf32>
    %159 = vector.broadcast %158 : vector<9x1xf32> to vector<9x32xf32>
    %160 = arith.subf %152, %159 : vector<9x32xf32>
    %161 = arith.mulf %160, %160 : vector<9x32xf32>
    %cst_65 = arith.constant dense<0.000000e+00> : vector<9xf32>
    %162 = vector.multi_reduction <add>, %161, %cst_65 [1] : vector<9x32xf32> to vector<9xf32>
    %163 = vector.shape_cast %162 : vector<9xf32> to vector<9x1xf32>
    %cst_66 = arith.constant 3.200000e+01 : f32
    %164 = vector.broadcast %cst_66 : f32 to vector<9x1xf32>
    %165 = arith.divf %163, %164 : vector<9x1xf32>
    %166 = vector.broadcast %158 : vector<9x1xf32> to vector<9x32xf32>
    %167 = arith.subf %152, %166 : vector<9x32xf32>
    %cst_67 = arith.constant 9.99999974E-6 : f32
    %168 = vector.broadcast %cst_67 : f32 to vector<9x1xf32>
    %169 = arith.addf %165, %168 : vector<9x1xf32>
    %170 = math.rsqrt %169 : vector<9x1xf32>
    %171 = vector.broadcast %170 : vector<9x1xf32> to vector<9x32xf32>
    %172 = arith.mulf %167, %171 : vector<9x32xf32>
    %173 = vector.broadcast %153 : vector<1x32xf32> to vector<9x32xf32>
    %174 = arith.mulf %172, %173 : vector<9x32xf32>
    %175 = vector.broadcast %154 : vector<1x32xf32> to vector<9x32xf32>
    %176 = arith.addf %174, %175 : vector<9x32xf32>
    %c1_68 = arith.constant 1 : index
    %c0_69 = arith.constant 0 : index
    %c0_70 = arith.constant 0 : index
    %177 = vector.load %arg4[%c1_68, %c0_69, %c0_70] : memref<2x32x96xbf16, #tpu.memory_space<vmem>>, vector<1x32x96xbf16>
    %178 = vector.shape_cast %177 : vector<1x32x96xbf16> to vector<32x96xbf16>
    %c1_71 = arith.constant 1 : index
    %c0_72 = arith.constant 0 : index
    %c0_73 = arith.constant 0 : index
    %179 = vector.load %arg5[%c1_71, %c0_72, %c0_73] : memref<2x1x96xf32, #tpu.memory_space<vmem>>, vector<1x1x96xf32>
    %180 = vector.shape_cast %179 : vector<1x1x96xf32> to vector<1x96xf32>
    %c1_74 = arith.constant 1 : index
    %c0_75 = arith.constant 0 : index
    %c0_76 = arith.constant 0 : index
    %181 = vector.load %arg6[%c1_74, %c0_75, %c0_76] : memref<2x32x32xbf16, #tpu.memory_space<vmem>>, vector<1x32x32xbf16>
    %182 = vector.shape_cast %181 : vector<1x32x32xbf16> to vector<32x32xbf16>
    %c1_77 = arith.constant 1 : index
    %c0_78 = arith.constant 0 : index
    %c0_79 = arith.constant 0 : index
    %183 = vector.load %arg7[%c1_77, %c0_78, %c0_79] : memref<2x6x32xf32, #tpu.memory_space<vmem>>, vector<1x6x32xf32>
    %184 = vector.shape_cast %183 : vector<1x6x32xf32> to vector<6x32xf32>
    %c1_80 = arith.constant 1 : index
    %c0_81 = arith.constant 0 : index
    %c0_82 = arith.constant 0 : index
    %185 = vector.load %arg8[%c1_80, %c0_81, %c0_82] : memref<2x32x64xbf16, #tpu.memory_space<vmem>>, vector<1x32x64xbf16>
    %186 = vector.shape_cast %185 : vector<1x32x64xbf16> to vector<32x64xbf16>
    %c1_83 = arith.constant 1 : index
    %c0_84 = arith.constant 0 : index
    %c0_85 = arith.constant 0 : index
    %187 = vector.load %arg9[%c1_83, %c0_84, %c0_85] : memref<2x1x64xf32, #tpu.memory_space<vmem>>, vector<1x1x64xf32>
    %188 = vector.shape_cast %187 : vector<1x1x64xf32> to vector<1x64xf32>
    %c1_86 = arith.constant 1 : index
    %c0_87 = arith.constant 0 : index
    %c0_88 = arith.constant 0 : index
    %189 = vector.load %arg10[%c1_86, %c0_87, %c0_88] : memref<2x64x32xbf16, #tpu.memory_space<vmem>>, vector<1x64x32xbf16>
    %190 = vector.shape_cast %189 : vector<1x64x32xbf16> to vector<64x32xbf16>
    %191 = arith.truncf %176 : vector<9x32xf32> to vector<9x32xbf16>
    %cst_89 = arith.constant dense<0.000000e+00> : vector<9x96xf32>
    %192 = tpu.matmul %191, %178, %cst_89 {dimension_numbers = #tpu.dot_dimension_numbers<[1], [0], [0], [1], [0, 0, 1, 1], [], []>} : vector<9x32xbf16>, vector<32x96xbf16>, vector<9x96xf32> -> vector<9x96xf32>
    %193 = vector.broadcast %180 : vector<1x96xf32> to vector<9x96xf32>
    %194 = arith.addf %192, %193 : vector<9x96xf32>
    %195 = vector.shape_cast %194 : vector<9x96xf32> to vector<9x12x8xf32>
    %196 = tpu.transpose %195, [1, 0, 2] : vector<9x12x8xf32> -> vector<12x9x8xf32>
    %197 = vector.extract_strided_slice %196 {offsets = [0, 0, 0], sizes = [4, 9, 8], strides = [1, 1, 1]} : vector<12x9x8xf32> to vector<4x9x8xf32>
    %cst_90 = arith.constant 0.353553385 : f32
    %198 = vector.broadcast %cst_90 : f32 to vector<4x9x8xf32>
    %199 = arith.mulf %197, %198 : vector<4x9x8xf32>
    %200 = vector.extract_strided_slice %196 {offsets = [4, 0, 0], sizes = [4, 9, 8], strides = [1, 1, 1]} : vector<12x9x8xf32> to vector<4x9x8xf32>
    %201 = vector.extract_strided_slice %196 {offsets = [8, 0, 0], sizes = [4, 9, 8], strides = [1, 1, 1]} : vector<12x9x8xf32> to vector<4x9x8xf32>
    %202 = arith.truncf %199 : vector<4x9x8xf32> to vector<4x9x8xbf16>
    %203 = arith.truncf %200 : vector<4x9x8xf32> to vector<4x9x8xbf16>
    "tpu.trace_start"() <{level = 10 : i32, message = "hqd,hkd->hqk"}> : () -> ()
    %cst_91 = arith.constant dense<0.000000e+00> : vector<4x9x9xf32>
    %204 = tpu.matmul %202, %203, %cst_91 {dimension_numbers = #tpu.dot_dimension_numbers<[2], [2], [1], [1], [0, 0, 0, 1, 1, 1], [0], [0]>} : vector<4x9x8xbf16>, vector<4x9x8xbf16>, vector<4x9x9xf32> -> vector<4x9x9xf32>
    "tpu.trace_stop"() : () -> ()
    %205 = arith.addf %204, %27 : vector<4x9x9xf32>
    %cst_92 = arith.constant dense<0xFF800000> : vector<4x9xf32>
    %206 = vector.multi_reduction <maximumf>, %205, %cst_92 [2] : vector<4x9x9xf32> to vector<4x9xf32>
    %207 = vector.shape_cast %206 : vector<4x9xf32> to vector<4x9x1xf32>
    %208 = vector.broadcast %207 : vector<4x9x1xf32> to vector<4x9x9xf32>
    %209 = arith.subf %205, %208 : vector<4x9x9xf32>
    %210 = math.exp %209 : vector<4x9x9xf32>
    %cst_93 = arith.constant dense<0.000000e+00> : vector<4x9xf32>
    %211 = vector.multi_reduction <add>, %210, %cst_93 [2] : vector<4x9x9xf32> to vector<4x9xf32>
    %212 = vector.shape_cast %211 : vector<4x9xf32> to vector<4x9x1xf32>
    %213 = tpu.reciprocal %212 {approx = true} : vector<4x9x1xf32> -> vector<4x9x1xf32>
    %214 = vector.broadcast %213 : vector<4x9x1xf32> to vector<4x9x9xf32>
    %215 = arith.mulf %210, %214 : vector<4x9x9xf32>
    %216 = arith.truncf %215 : vector<4x9x9xf32> to vector<4x9x9xbf16>
    %217 = arith.truncf %201 : vector<4x9x8xf32> to vector<4x9x8xbf16>
    "tpu.trace_start"() <{level = 10 : i32, message = "hqk,hkd->hqd"}> : () -> ()
    %cst_94 = arith.constant dense<0.000000e+00> : vector<4x9x8xf32>
    %218 = tpu.matmul %216, %217, %cst_94 {dimension_numbers = #tpu.dot_dimension_numbers<[2], [1], [1], [2], [0, 0, 0, 1, 1, 2], [0], [0]>} : vector<4x9x9xbf16>, vector<4x9x8xbf16>, vector<4x9x8xf32> -> vector<4x9x8xf32>
    "tpu.trace_stop"() : () -> ()
    %219 = tpu.transpose %218, [1, 0, 2] : vector<4x9x8xf32> -> vector<9x4x8xf32>
    %220 = vector.shape_cast %219 : vector<9x4x8xf32> to vector<9x32xf32>
    %221 = arith.truncf %220 : vector<9x32xf32> to vector<9x32xbf16>
    %cst_95 = arith.constant dense<0.000000e+00> : vector<9x32xf32>
    %222 = tpu.matmul %221, %182, %cst_95 {dimension_numbers = #tpu.dot_dimension_numbers<[1], [0], [0], [1], [0, 0, 1, 1], [], []>} : vector<9x32xbf16>, vector<32x32xbf16>, vector<9x32xf32> -> vector<9x32xf32>
    %223 = vector.extract_strided_slice %184 {offsets = [0, 0], sizes = [1, 32], strides = [1, 1]} : vector<6x32xf32> to vector<1x32xf32>
    %224 = vector.broadcast %223 : vector<1x32xf32> to vector<9x32xf32>
    %225 = arith.addf %222, %224 : vector<9x32xf32>
    %226 = arith.addf %176, %225 : vector<9x32xf32>
    %227 = vector.extract_strided_slice %184 {offsets = [1, 0], sizes = [1, 32], strides = [1, 1]} : vector<6x32xf32> to vector<1x32xf32>
    %228 = vector.extract_strided_slice %184 {offsets = [2, 0], sizes = [1, 32], strides = [1, 1]} : vector<6x32xf32> to vector<1x32xf32>
    %cst_96 = arith.constant dense<0.000000e+00> : vector<9xf32>
    %229 = vector.multi_reduction <add>, %226, %cst_96 [1] : vector<9x32xf32> to vector<9xf32>
    %230 = vector.shape_cast %229 : vector<9xf32> to vector<9x1xf32>
    %cst_97 = arith.constant 3.200000e+01 : f32
    %231 = vector.broadcast %cst_97 : f32 to vector<9x1xf32>
    %232 = arith.divf %230, %231 : vector<9x1xf32>
    %233 = vector.broadcast %232 : vector<9x1xf32> to vector<9x32xf32>
    %234 = arith.subf %226, %233 : vector<9x32xf32>
    %235 = arith.mulf %234, %234 : vector<9x32xf32>
    %cst_98 = arith.constant dense<0.000000e+00> : vector<9xf32>
    %236 = vector.multi_reduction <add>, %235, %cst_98 [1] : vector<9x32xf32> to vector<9xf32>
    %237 = vector.shape_cast %236 : vector<9xf32> to vector<9x1xf32>
    %cst_99 = arith.constant 3.200000e+01 : f32
    %238 = vector.broadcast %cst_99 : f32 to vector<9x1xf32>
    %239 = arith.divf %237, %238 : vector<9x1xf32>
    %240 = vector.broadcast %232 : vector<9x1xf32> to vector<9x32xf32>
    %241 = arith.subf %226, %240 : vector<9x32xf32>
    %cst_100 = arith.constant 9.99999974E-6 : f32
    %242 = vector.broadcast %cst_100 : f32 to vector<9x1xf32>
    %243 = arith.addf %239, %242 : vector<9x1xf32>
    %244 = math.rsqrt %243 : vector<9x1xf32>
    %245 = vector.broadcast %244 : vector<9x1xf32> to vector<9x32xf32>
    %246 = arith.mulf %241, %245 : vector<9x32xf32>
    %247 = vector.broadcast %227 : vector<1x32xf32> to vector<9x32xf32>
    %248 = arith.mulf %246, %247 : vector<9x32xf32>
    %249 = vector.broadcast %228 : vector<1x32xf32> to vector<9x32xf32>
    %250 = arith.addf %248, %249 : vector<9x32xf32>
    %251 = arith.truncf %250 : vector<9x32xf32> to vector<9x32xbf16>
    %cst_101 = arith.constant dense<0.000000e+00> : vector<9x64xf32>
    %252 = tpu.matmul %251, %186, %cst_101 {dimension_numbers = #tpu.dot_dimension_numbers<[1], [0], [0], [1], [0, 0, 1, 1], [], []>} : vector<9x32xbf16>, vector<32x64xbf16>, vector<9x64xf32> -> vector<9x64xf32>
    %253 = vector.broadcast %188 : vector<1x64xf32> to vector<9x64xf32>
    %254 = arith.addf %252, %253 : vector<9x64xf32>
    %cst_102 = arith.constant 5.000000e-01 : f32
    %255 = vector.broadcast %cst_102 : f32 to vector<9x64xf32>
    %256 = arith.mulf %255, %254 : vector<9x64xf32>
    %cst_103 = arith.constant 2.000000e+00 : f32
    %257 = math.sqrt %cst_103 : f32
    %cst_104 = arith.constant 1.000000e+00 : f32
    %258 = arith.divf %cst_104, %257 : f32
    %259 = vector.broadcast %258 : f32 to vector<9x64xf32>
    %260 = arith.mulf %254, %259 : vector<9x64xf32>
    %261 = math.absf %260 : vector<9x64xf32>
    %cst_105 = arith.constant 0.327591091 : f32
    %262 = vector.broadcast %cst_105 : f32 to vector<9x64xf32>
    %263 = arith.mulf %262, %261 : vector<9x64xf32>
    %cst_106 = arith.constant 1.000000e+00 : f32
    %264 = vector.broadcast %cst_106 : f32 to vector<9x64xf32>
    %265 = arith.addf %264, %263 : vector<9x64xf32>
    %266 = tpu.reciprocal %265 {approx = true} : vector<9x64xf32> -> vector<9x64xf32>
    %cst_107 = arith.constant 1.06140542 : f32
    %267 = vector.broadcast %cst_107 : f32 to vector<9x64xf32>
    %268 = arith.mulf %266, %267 : vector<9x64xf32>
    %cst_108 = arith.constant -1.45315206 : f32
    %269 = vector.broadcast %cst_108 : f32 to vector<9x64xf32>
    %270 = arith.addf %269, %268 : vector<9x64xf32>
    %271 = arith.mulf %266, %270 : vector<9x64xf32>
    %cst_109 = arith.constant 1.42141378 : f32
    %272 = vector.broadcast %cst_109 : f32 to vector<9x64xf32>
    %273 = arith.addf %272, %271 : vector<9x64xf32>
    %274 = arith.mulf %266, %273 : vector<9x64xf32>
    %cst_110 = arith.constant -0.284496725 : f32
    %275 = vector.broadcast %cst_110 : f32 to vector<9x64xf32>
    %276 = arith.addf %275, %274 : vector<9x64xf32>
    %277 = arith.mulf %266, %276 : vector<9x64xf32>
    %cst_111 = arith.constant 0.254829586 : f32
    %278 = vector.broadcast %cst_111 : f32 to vector<9x64xf32>
    %279 = arith.addf %278, %277 : vector<9x64xf32>
    %280 = arith.mulf %266, %279 : vector<9x64xf32>
    %cst_112 = arith.constant 0.000000e+00 : f32
    %281 = vector.broadcast %cst_112 : f32 to vector<9x64xf32>
    %282 = arith.subf %281, %261 : vector<9x64xf32>
    %283 = arith.mulf %282, %261 : vector<9x64xf32>
    %284 = math.exp %283 : vector<9x64xf32>
    %285 = arith.mulf %280, %284 : vector<9x64xf32>
    %cst_113 = arith.constant 1.000000e+00 : f32
    %286 = vector.broadcast %cst_113 : f32 to vector<9x64xf32>
    %287 = arith.subf %286, %285 : vector<9x64xf32>
    %cst_114 = arith.constant 0.000000e+00 : f32
    %288 = vector.broadcast %cst_114 : f32 to vector<9x64xf32>
    %289 = arith.cmpf olt, %260, %288 : vector<9x64xf32>
    %cst_115 = arith.constant 0.000000e+00 : f32
    %290 = vector.broadcast %cst_115 : f32 to vector<9x64xf32>
    %291 = arith.subf %290, %287 : vector<9x64xf32>
    %292 = arith.select %289, %291, %287 : vector<9x64xi1>, vector<9x64xf32>
    %cst_116 = arith.constant 1.000000e+00 : f32
    %293 = vector.broadcast %cst_116 : f32 to vector<9x64xf32>
    %294 = arith.addf %293, %292 : vector<9x64xf32>
    %295 = arith.mulf %256, %294 : vector<9x64xf32>
    %296 = arith.truncf %295 : vector<9x64xf32> to vector<9x64xbf16>
    %cst_117 = arith.constant dense<0.000000e+00> : vector<9x32xf32>
    %297 = tpu.matmul %296, %190, %cst_117 {dimension_numbers = #tpu.dot_dimension_numbers<[1], [0], [0], [1], [0, 0, 1, 1], [], []>} : vector<9x64xbf16>, vector<64x32xbf16>, vector<9x32xf32> -> vector<9x32xf32>
    %298 = vector.extract_strided_slice %184 {offsets = [3, 0], sizes = [1, 32], strides = [1, 1]} : vector<6x32xf32> to vector<1x32xf32>
    %299 = vector.broadcast %298 : vector<1x32xf32> to vector<9x32xf32>
    %300 = arith.addf %297, %299 : vector<9x32xf32>
    %301 = arith.addf %250, %300 : vector<9x32xf32>
    %302 = vector.extract_strided_slice %184 {offsets = [4, 0], sizes = [1, 32], strides = [1, 1]} : vector<6x32xf32> to vector<1x32xf32>
    %303 = vector.extract_strided_slice %184 {offsets = [5, 0], sizes = [1, 32], strides = [1, 1]} : vector<6x32xf32> to vector<1x32xf32>
    %cst_118 = arith.constant dense<0.000000e+00> : vector<9xf32>
    %304 = vector.multi_reduction <add>, %301, %cst_118 [1] : vector<9x32xf32> to vector<9xf32>
    %305 = vector.shape_cast %304 : vector<9xf32> to vector<9x1xf32>
    %cst_119 = arith.constant 3.200000e+01 : f32
    %306 = vector.broadcast %cst_119 : f32 to vector<9x1xf32>
    %307 = arith.divf %305, %306 : vector<9x1xf32>
    %308 = vector.broadcast %307 : vector<9x1xf32> to vector<9x32xf32>
    %309 = arith.subf %301, %308 : vector<9x32xf32>
    %310 = arith.mulf %309, %309 : vector<9x32xf32>
    %cst_120 = arith.constant dense<0.000000e+00> : vector<9xf32>
    %311 = vector.multi_reduction <add>, %310, %cst_120 [1] : vector<9x32xf32> to vector<9xf32>
    %312 = vector.shape_cast %311 : vector<9xf32> to vector<9x1xf32>
    %cst_121 = arith.constant 3.200000e+01 : f32
    %313 = vector.broadcast %cst_121 : f32 to vector<9x1xf32>
    %314 = arith.divf %312, %313 : vector<9x1xf32>
    %315 = vector.broadcast %307 : vector<9x1xf32> to vector<9x32xf32>
    %316 = arith.subf %301, %315 : vector<9x32xf32>
    %cst_122 = arith.constant 9.99999974E-6 : f32
    %317 = vector.broadcast %cst_122 : f32 to vector<9x1xf32>
    %318 = arith.addf %314, %317 : vector<9x1xf32>
    %319 = math.rsqrt %318 : vector<9x1xf32>
    %320 = vector.broadcast %319 : vector<9x1xf32> to vector<9x32xf32>
    %321 = arith.mulf %316, %320 : vector<9x32xf32>
    %322 = vector.broadcast %302 : vector<1x32xf32> to vector<9x32xf32>
    %323 = arith.mulf %321, %322 : vector<9x32xf32>
    %324 = vector.broadcast %303 : vector<1x32xf32> to vector<9x32xf32>
    %325 = arith.addf %323, %324 : vector<9x32xf32>
    %326 = vector.extract_strided_slice %325 {offsets = [0, 0], sizes = [1, 32], strides = [1, 1]} : vector<9x32xf32> to vector<1x32xf32>
    %c0_123 = arith.constant 0 : index
    %c0_124 = arith.constant 0 : index
    %c0_125 = arith.constant 0 : index
    %327 = vector.load %arg11[%c0_123, %c0_124, %c0_125] : memref<1x1x32xf32, #tpu.memory_space<vmem>>, vector<1x1x32xf32>
    %328 = vector.shape_cast %327 : vector<1x1x32xf32> to vector<1x32xf32>
    %329 = vector.shape_cast %326 : vector<1x32xf32> to vector<1x1x32xf32>
    tpu.vector_store %arg11[%c0_123, %c0_124, %c0_125], %329 {strides = array<i32>} : memref<1x1x32xf32, #tpu.memory_space<vmem>>, vector<1x1x32xf32>,
    return
  }
  func.func @transform_0(%arg0: i32) -> (i32, i32, i32) {
    %c0_i32 = arith.constant 0 : i32
    %c0_i32_0 = arith.constant 0 : i32
    %c0_i32_1 = arith.constant 0 : i32
    return %arg0, %c0_i32, %c0_i32_0 : i32, i32, i32
  }
  func.func @transform_1(%arg0: i32) -> (i32, i32, i32, i32) {
    %c0_i32 = arith.constant 0 : i32
    %c0_i32_0 = arith.constant 0 : i32
    %c0_i32_1 = arith.constant 0 : i32
    %c0_i32_2 = arith.constant 0 : i32
    return %arg0, %c0_i32, %c0_i32_0, %c0_i32_1 : i32, i32, i32, i32
  }
  func.func @transform_2(%arg0: i32) -> (i32, i32) {
    %c0_i32 = arith.constant 0 : i32
    %c0_i32_0 = arith.constant 0 : i32
    %c0_i32_1 = arith.constant 0 : i32
    return %c0_i32, %c0_i32_0 : i32, i32
  }
  func.func @transform_3(%arg0: i32) -> (i32, i32, i32) {
    %c0_i32 = arith.constant 0 : i32
    %c0_i32_0 = arith.constant 0 : i32
    %c0_i32_1 = arith.constant 0 : i32
    %c0_i32_2 = arith.constant 0 : i32
    return %c0_i32, %c0_i32_0, %c0_i32_1 : i32, i32, i32
  }
  func.func @transform_4(%arg0: i32) -> (i32, i32, i32) {
    %c0_i32 = arith.constant 0 : i32
    %c0_i32_0 = arith.constant 0 : i32
    %c0_i32_1 = arith.constant 0 : i32
    %c0_i32_2 = arith.constant 0 : i32
    return %c0_i32, %c0_i32_0, %c0_i32_1 : i32, i32, i32
  }
  func.func @transform_5(%arg0: i32) -> (i32, i32, i32) {
    %c0_i32 = arith.constant 0 : i32
    %c0_i32_0 = arith.constant 0 : i32
    %c0_i32_1 = arith.constant 0 : i32
    %c0_i32_2 = arith.constant 0 : i32
    return %c0_i32, %c0_i32_0, %c0_i32_1 : i32, i32, i32
  }
  func.func @transform_6(%arg0: i32) -> (i32, i32, i32) {
    %c0_i32 = arith.constant 0 : i32
    %c0_i32_0 = arith.constant 0 : i32
    %c0_i32_1 = arith.constant 0 : i32
    %c0_i32_2 = arith.constant 0 : i32
    return %c0_i32, %c0_i32_0, %c0_i32_1 : i32, i32, i32
  }
  func.func @transform_7(%arg0: i32) -> (i32, i32, i32) {
    %c0_i32 = arith.constant 0 : i32
    %c0_i32_0 = arith.constant 0 : i32
    %c0_i32_1 = arith.constant 0 : i32
    %c0_i32_2 = arith.constant 0 : i32
    return %c0_i32, %c0_i32_0, %c0_i32_1 : i32, i32, i32
  }
  func.func @transform_8(%arg0: i32) -> (i32, i32, i32) {
    %c0_i32 = arith.constant 0 : i32
    %c0_i32_0 = arith.constant 0 : i32
    %c0_i32_1 = arith.constant 0 : i32
    %c0_i32_2 = arith.constant 0 : i32
    return %c0_i32, %c0_i32_0, %c0_i32_1 : i32, i32, i32
  }
  func.func @transform_9(%arg0: i32) -> (i32, i32, i32) {
    %c0_i32 = arith.constant 0 : i32
    %c0_i32_0 = arith.constant 0 : i32
    %c0_i32_1 = arith.constant 0 : i32
    %c0_i32_2 = arith.constant 0 : i32
    return %c0_i32, %c0_i32_0, %c0_i32_1 : i32, i32, i32
  }
  func.func @transform_10(%arg0: i32) -> (i32, i32, i32) {
    %c0_i32 = arith.constant 0 : i32
    %c0_i32_0 = arith.constant 0 : i32
    %c0_i32_1 = arith.constant 0 : i32
    return %arg0, %c0_i32, %c0_i32_0 : i32, i32, i32
  }
}

</mosaic_0001>

<bundles_post_ra>
// kernel: graphormer_feature_extractor.1
= control target key start
LH: loop header
LB: loop body
LE: loop exit
PB: predicated region body
PF: predicated region fallthrough
CT: control target
= control target key end

     0   :  { %s3705_s13 = smov 0   ;;  %s4618_s0 = inlined_call_operand.vmem [shape: f32[2,9,32], index: 0, kind: input, shape index: {}]   ;;  %s4619_s1 = inlined_call_operand.vmem [shape: f32[2,4,9,9], index: 1, kind: input, shape index: {}]   ;;  %s4620_s2 = inlined_call_operand.vmem [shape: f32[2,32], index: 2, kind: input, shape index: {}]   ;;  %s4621_s3 = inlined_call_operand.vmem [shape: bf16[2,32,96], index: 3, kind: input, shape index: {}]   ;;  %s4622_s4 = inlined_call_operand.vmem [shape: f32[2,1,96], index: 4, kind: input, shape index: {}]   ;;  %s4623_s5 = inlined_call_operand.vmem [shape: bf16[2,32,32], index: 5, kind: input, shape index: {}]   ;;  %s4624_s6 = inlined_call_operand.vmem [shape: f32[2,6,32], index: 6, kind: input, shape index: {}]   ;;  %s4625_s7 = inlined_call_operand.vmem [shape: bf16[2,32,64], index: 7, kind: input, shape index: {}]   ;;  %s4626_s8 = inlined_call_operand.vmem [shape: f32[2,1,64], index: 8, kind: input, shape index: {}]   ;;  %s4627_s9 = inlined_call_operand.vmem [shape: bf16[2,64,32], index: 9, kind: input, shape index: {}]   ;;  %s4628_s10 = inlined_call_operand.vmem [shape: f32[2,1,32], index: 10, kind: output, shape index: {}]  }
   0x1 LB: > { %s3254_s14 = sadd.s32 4294967295, %s3630_s13   ;;  %p3258_p0 = scmp.ge.s32.totalorder %s3630_s13, 1  ;;  %s3630_s13 = sphi %s3705_s13, %s20_s13  }
   0x2   : > { %p322_p1 = scmp.lt.s32.totalorder %s3630_s13, 3 }
   0x4   : > { %p323_p2 = pnand %p3258_p0, %p322_p1 }
   0x5   : > { %p363_p3 = scmp.lt.s32.totalorder (!%p323_p2), %s3254_s14, 1  ;;  %s3633_s29 = smov (!%p323_p2), 96  }
   0x6   : > { %326 = sbr.rel (%p323_p2) target bundleno = 4304 (0x10d0), region = 60  ;;  %s3634_s30 = smov (!%p323_p2), 104  }
   0x7   : > { %s3635_s11 = smov (!%p323_p2), 88   ;;  %s3636_s12 = smov (!%p323_p2), 80  }
   0x8   : > { %s3638_s16 = smov (!%p323_p2), 112   ;;  %s3639_s17 = smov (!%p323_p2), 72  }
   0x9   : > { %s3643_s23 = smov (!%p323_p2), 40   ;;  %s3644_s24 = smov (!%p323_p2), 48  }
   0xa   : > { %s4629_s25 = smov (!%p323_p2), 56   ;;  %s3647_s26 = smov (!%p323_p2), 8  }
   0xb   : > { %s4636_s14 = smov (!%p363_p3, %s3254_s14), 1  ;;  %vm381_vm0 = vcmask 261120   ;;  %vm385_vm1 = vcmask 253952   ;;  %v3632_v4 = vmov 32.0   ;;  %v3395_v21 = vld [vmem:[%s4621_s3 + $0x8] sm:$0xff]  ;;  %v3394_v23 = vld [vmem:[%s4621_s3] sm:$0xff] }
   0xc   : > { %s3392_s15 = sshll.u32 %s4636_s14, 4  ;;  %3516 = vrcp.f32 %v3632_v4  ;;  %496 = vmatpush.bf16.msra.mxu0 %v3395_v21  ;;  %v3510_v42 = vld [vmem:[%s4620_s2] ss:$0 sm:$0xff]  ;;  %v3511_v47 = vld [vmem:[%s4620_s2 + $0x1] ss:$0 sm:$0xff]  ;;  %vm573_vm9 = vcmask 1047556  }
   0xd   : > { %s367_s18 = scalar_lea.vmem %s4618_s0, %s3392_s15  ;;  %v3512_v52 = vld [vmem:[%s4622_s4] ss:$0 sm:$0xff]  ;;  %s3637_s15 = smov 120   ;;  %v3641_v61 = vmov 1983009808   ;;  %vm1053_vm10 = vcmask 64512  }
   0xe   : > { %v377_v0 = vld [vmem:[%s367_s18] sm:$0xff]  ;;  %v378_v2 = vld [vmem:[%s367_s18 + $0x8] sm:$0x1]  ;;  %s3640_s18 = smov 64   ;;  %v578_v62 = vunpack.c.l.s4 %v3641_v61  ;;  %s3393_s19 = sshll.u32 %s4636_s14, 6  ;;  %vm1164_vm11 = vcmask 72704  }
   0xf   : > { %v382_v1 = vsel %vm381_vm0, %v377_v0, 0.0  ;;  %v386_v3 = vsel %vm385_vm1, %v378_v2, 0.0  ;;  %s3910_s22 = scalar_lea.vmem %s4619_s1, %s3393_s19  ;;  %vm1168_vm12 = vcmask 65536   ;;  %vm1283_vm13 = vcmask 1043456   ;;  %s4631_s27 = smov 16  }
  0x10   : > { %383 = vadd.xlane.f32.xlu0 %v382_v1  ;;  %497 = vmatpush.bf16.msra.mxu0 %v3394_v23  ;;  %vm1284_vm14 = vcmask 1044480   ;;  %s4630_s28 = smov 24   ;;  %vm1566_vm15 = vcmask 130048  }
  0x12   : > { %v3517_v5 = vpop.eup %3516 }
  0x13   : > { %v390_v6 = vmul.f32 32.0, %v3517_v5  ;;  %vm394_vm2 = vweird.f32 %v3517_v5 }
  0x15   : > { %v391_v7 = vsub.f32 1.0, %v390_v6 }
  0x17   : > { %v392_v8 = vmul.f32 %v3517_v5, %v391_v7 }
  0x18   : > { %387 = vadd.xlane.f32.xlu0 %v386_v3 }
  0x19   : > { %v393_v9 = vadd.f32 %v3517_v5, %v392_v8 }
  0x1b   : > { %v3721_v10 = vsel %vm394_vm2, %v3517_v5, %v393_v9  ;;  %vm1569_vm2 = vcmask 195584  }
  0x83   : > { %v384_v11 = vpop.xlane.xlu0 %383 }
  0x84   : > { %v396_v12 = vmul.f32 %v3721_v10, %v384_v11 }
  0x86   : > { %v398_v13 = vsub.f32 %v377_v0, %v396_v12  ;;  %v3642_v0 = vmov 1934713408  }
  0x87   : > { %v626_v1 = vunpack.c.l.s4 %v3642_v0 }
  0x88   : > { %v400_v14 = vmul.f32 %v398_v13, %v398_v13 }
  0x8a   : > { %v402_v15 = vsel %vm381_vm0, %v400_v14, 0.0 }
  0x8b   : > { %403 = vadd.xlane.f32.xlu1 %v402_v15  ;;  %v388_v16 = vpop.xlane.xlu0 %387 }
  0x8c   : > { %v397_v17 = vmul.f32 %v3721_v10, %v388_v16  ;;  %v3785_v16 = vunpack.c.0.s8 %v626_v1 }
  0x8e   : > { %v399_v18 = vsub.f32 %v378_v2, %v397_v17  ;;  %v3779_v2 = vunpack.c.0.s8 %v578_v62 }
  0x90   : > { %v401_v19 = vmul.f32 %v399_v18, %v399_v18 }
  0x92   : > { %v405_v20 = vsel %vm385_vm1, %v401_v19, 0.0 }
  0x93   : > { %406 = vadd.xlane.f32.xlu1 %v405_v20 }
  0xfe   : > { %v404_v22 = vpop.xlane.xlu1 %403 }
  0xff   : > { %v408_v24 = vmul.f32 %v404_v22, %v3721_v10 }
 0x101   : > { %v410_v25 = vadd.f32 1e-05, %v408_v24 }
 0x103   : > { %3518 = vrsqrt.f32 %v410_v25  ;;  %vm418_vm4 = vweird.f32 %v410_v25 }
 0x106   : > { %v407_v26 = vpop.xlane.xlu1 %406 }
 0x107   : > { %v409_v27 = vmul.f32 %v407_v26, %v3721_v10 }
 0x109   : > { %v3519_v28 = vpop.eup %3518  ;;  %v411_v29 = vadd.f32 1e-05, %v409_v27 }
 0x10a   : > { %v413_v30 = vmul.f32 %v3519_v28, %v410_v25  ;;  %vm419_vm3 = vweird.f32 %v3519_v28 }
 0x10b   : > { %3520 = vrsqrt.f32 %v411_v29  ;;  %vm420_vm5 = vmor %vm418_vm4, %vm419_vm3  ;;  %vm428_vm7 = vweird.f32 %v411_v29 }
 0x10c   : > { %v414_v31 = vmul.f32 %v3519_v28, %v413_v30 }
 0x10e   : > { %v415_v32 = vmul.f32 0.5, %v414_v31 }
 0x110   : > { %v416_v33 = vsub.f32 1.5, %v415_v32 }
 0x111   : > { %v3521_v34 = vpop.eup %3520 }
 0x112   : > { %v417_v35 = vmul.f32 %v3519_v28, %v416_v33  ;;  %v423_v36 = vmul.f32 %v3521_v34, %v411_v29  ;;  %vm429_vm6 = vweird.f32 %v3521_v34 }
 0x113   : > { %vm430_vm8 = vmor %vm428_vm7, %vm429_vm6 }
 0x114   : > { %v424_v37 = vmul.f32 %v3521_v34, %v423_v36  ;;  %v421_v38 = vsel %vm420_vm5, %v3519_v28, %v417_v35 }
 0x115   : > { %v432_v41 = vmul.f32 %v421_v38, %v398_v13 }
 0x116   : > { %v425_v39 = vmul.f32 0.5, %v424_v37 }
 0x117   : > { %v435_v46 = vmul.f32 %v3510_v42, %v432_v41 }
 0x118   : > { %v426_v40 = vsub.f32 1.5, %v425_v39 }
 0x119   : > { %v3741_v49 = vadd.f32 %v3511_v47, %v435_v46 }
 0x11a   : > { %v427_v43 = vmul.f32 %v3521_v34, %v426_v40 }
 0x11c   : > { %v431_v44 = vsel %vm430_vm8, %v3521_v34, %v427_v43 }
 0x11d   : > { %v433_v45 = vmul.f32 %v431_v44, %v399_v18 }
 0x11f   : > { %v436_v48 = vmul.f32 %v3510_v42, %v433_v45 }
 0x121   : > { %v3743_v50 = vadd.f32 %v3511_v47, %v436_v48 }
 0x123   : > { %v471_v51 = vpack.c.bf16 %v3743_v50, %v3741_v49 }
 0x125   : > { %3271 = vmatmul.msk.bf16.vlgmr.msra.gmra.mxu0 %vm381_vm0, %v471_v51 }
 0x1a2   : > { %v499_v53 = vpop.f32.mrf.mxu0 }
 0x1a3   : > { %v500_v54 = vadd.f32 %v3512_v52, %v499_v53 }
 0x1a5   : > { %524 = vrot.lane.b32.xlu1 %v500_v54, %s3633_s29  ;;  %518 = vrot.lane.b32.xlu0 %v500_v54, %s3634_s30  ;;  %v575_v5 = vrot.slane %v500_v54, 4 }
 0x1a6   : > { %530 = vrot.lane.b32.xlu2 %v500_v54, %s3635_s11 }
 0x1aa   : > { %v501_v55 = vpop.f32.mrf.mxu0 }
 0x1ab   : > { %v3754_v56 = vadd.f32 %v3512_v52, %v501_v55 }
 0x1ad   : > { %532 = vrot.lane.b32.xlu1 %v3754_v56, %s3635_s11  ;;  %536 = vrot.lane.b32.xlu0 %v500_v54, %s3636_s12  ;;  %v3769_v57 = vpack.i.bf16 %v3754_v56, %v500_v54 }
 0x1ae   : > { %506 = vrot.lane.b32.xlu2 %v500_v54, %s3637_s15 }
 0x1b5   : > { %514 = vrot.lane.b32.xlu1 %v3754_v56, %s3638_s16  ;;  %538 = vrot.lane.b32.xlu0 %v3754_v56, %s3636_s12 }
 0x1b6   : > { %542 = vrot.lane.b32.xlu2 %v500_v54, %s3639_s17 }
 0x1bd   : > { %526 = vrot.lane.b32.xlu0 %v3754_v56, %s3633_s29 }
 0x1be   : > { %512 = vrot.lane.b32.xlu2 %v500_v54, %s3638_s16 }
 0x1c5   : > { %3441 = vrot.lane.b32.xlu0 %v3769_v57, %s3640_s18 }
 0x1c6   : > { %544 = vrot.lane.b32.xlu2 %v3754_v56, %s3639_s17 }
 0x1ce   : > { %520 = vrot.lane.b32.xlu2 %v3754_v56, %s3634_s30 }
 0x1d6   : > { %508 = vrot.lane.b32.xlu2 %v3754_v56, %s3637_s15 }
 0x200   : > { %v531_v58 = vpop.permute.xlu2 %530 }
 0x201   : > { %v611_v11 = vrot.slane %v531_v58, 4 }
 0x208   : > { %v507_v59 = vpop.permute.xlu2 %506 }
 0x209   : > { %v587_v63 = vrot.slane %v507_v59, 4 }
 0x210   : > { %v543_v60 = vpop.permute.xlu2 %542 }
 0x211   : > { %v609_v6 = vrot.slane %v543_v60, 4  ;;  %v612_v18 = vsel %vm573_vm9, %v543_v60, %v611_v11 }
 0x212   : > { %v620_v27 = vperm.slane %v612_v18, %v3779_v2 }
 0x213   : > { %v610_v22 = vsel %vm573_vm9, %v609_v6, %v531_v58 }
 0x214   : > { %v616_v30 = vperm.slane %v610_v22, %v3779_v2  ;;  %v657_v43 = vrot.slane %v620_v27, 4 }
 0x216   : > { %v645_v47 = vrot.slane %v616_v30, 4 }
 0x217   : > { %v525_v3 = vpop.permute.xlu1 %524  ;;  %v519_v4 = vpop.permute.xlu0 %518 }
 0x218   : > { %v585_v7 = vrot.slane %v519_v4, 4  ;;  %v588_v8 = vsel %vm573_vm9, %v519_v4, %v587_v63  ;;  %v513_v9 = vpop.permute.xlu2 %512  ;;  %v599_v31 = vrot.slane %v525_v3, 4 }
 0x219   : > { %v596_v12 = vperm.slane %v588_v8, %v3779_v2  ;;  %v572_v13 = vrot.slane %v513_v9, 4  ;;  %v576_v14 = vsel %vm573_vm9, %v513_v9, %v575_v5 }
 0x21a   : > { %v586_v15 = vsel %vm573_vm9, %v585_v7, %v507_v59  ;;  %v584_v17 = vperm.slane %v576_v14, %v3779_v2 }
 0x21b   : > { %v592_v19 = vperm.slane %v586_v15, %v3779_v2  ;;  %v633_v20 = vrot.slane %v596_v12, 4  ;;  %v574_v21 = vsel %vm573_vm9, %v572_v13, %v500_v54 }
 0x21c   : > { %v580_v23 = vperm.slane %v574_v21, %v3779_v2  ;;  %v635_v24 = vrot.slane %v584_v17, 4 }
 0x21d   : > { %v621_v25 = vrot.slane %v592_v19, 4  ;;  %v634_v26 = vsel %vm573_vm9, %v633_v20, %v584_v17 }
 0x21e   : > { %v623_v28 = vrot.slane %v580_v23, 4  ;;  %v636_v29 = vsel %vm573_vm9, %v596_v12, %v635_v24  ;;  %v640_v33 = vperm.slane %v634_v26, %v3785_v16 }
 0x21f   : > { %v622_v32 = vsel %vm573_vm9, %v621_v25, %v580_v23  ;;  %v533_v34 = vpop.permute.xlu1 %532  ;;  %v537_v35 = vpop.permute.xlu0 %536  ;;  %v644_v37 = vperm.slane %v636_v29, %v3785_v16 }
 0x220   : > { %v624_v36 = vsel %vm573_vm9, %v592_v19, %v623_v28  ;;  %v597_v38 = vrot.slane %v537_v35, 4  ;;  %v545_v39 = vpop.permute.xlu2 %544  ;;  %v628_v40 = vperm.slane %v622_v32, %v3785_v16  ;;  %v600_v41 = vsel %vm573_vm9, %v537_v35, %v599_v31 }
 0x221   : > { %v759_v42 = vrot.slane %v545_v39, 4  ;;  %v632_v44 = vperm.slane %v624_v36, %v3785_v16  ;;  %v608_v46 = vperm.slane %v600_v41, %v3779_v2  ;;  %v679_v48 = vrot.slane %v640_v33, 4 }
 0x222   : > { %v598_v45 = vsel %vm573_vm9, %v597_v38, %v525_v3  ;;  %v683_v53 = vrot.slane %v644_v37, 4  ;;  %v671_v59 = vrot.slane %v628_v40, 4 }
 0x223   : > { %v604_v51 = vperm.slane %v598_v45, %v3779_v2  ;;  %v760_v52 = vsel %vm573_vm9, %v759_v42, %v533_v34  ;;  %v658_v54 = vsel %vm573_vm9, %v657_v43, %v608_v46  ;;  %v659_v55 = vrot.slane %v608_v46, 4 }
 0x224   : > { %v764_v58 = vperm.slane %v760_v52, %v3779_v2  ;;  %v664_v62 = vperm.slane %v658_v54, %v3785_v16  ;;  %v675_v63 = vrot.slane %v632_v44, 4 }
 0x225   : > { %v646_v60 = vsel %vm573_vm9, %v645_v47, %v604_v51  ;;  %v647_v61 = vrot.slane %v604_v51, 4  ;;  %v660_v1 = vsel %vm573_vm9, %v620_v27, %v659_v55 }
 0x226   : > { %v652_v0 = vperm.slane %v646_v60, %v3785_v16  ;;  %v771_v3 = vrot.slane %v764_v58, 4  ;;  %v668_v5 = vperm.slane %v660_v1, %v3785_v16  ;;  %v677_v6 = vrot.slane %v664_v62, 4 }
 0x227   : > { %v648_v4 = vsel %vm573_vm9, %v616_v30, %v647_v61  ;;  %v680_v7 = vsel %vm573_vm9, %v664_v62, %v679_v48  ;;  %v539_v8 = vpop.permute.xlu0 %538  ;;  %v515_v20 = vpop.permute.xlu1 %514 }
 0x228   : > { %v656_v9 = vperm.slane %v648_v4, %v3785_v16  ;;  %v669_v11 = vrot.slane %v652_v0, 4  ;;  %v672_v12 = vsel %vm573_vm9, %v652_v0, %v671_v59  ;;  %v831_v13 = vrot.slane %v680_v7, 4  ;;  %v521_v14 = vpop.permute.xlu2 %520 }
 0x229   : > { %v678_v15 = vsel %vm573_vm9, %v677_v6, %v640_v33  ;;  %v681_v17 = vrot.slane %v668_v5, 4  ;;  %v684_v18 = vsel %vm573_vm9, %v668_v5, %v683_v53  ;;  %v807_v19 = vrot.slane %v672_v12, 4 }
 0x22a   : > { %v670_v21 = vsel %vm573_vm9, %v669_v11, %v628_v40  ;;  %v673_v22 = vrot.slane %v656_v9, 4  ;;  %v676_v23 = vsel %vm573_vm9, %v656_v9, %v675_v63  ;;  %v819_v24 = vrot.slane %v678_v15, 4 }
 0x22b   : > { %v682_v25 = vsel %vm573_vm9, %v681_v17, %v644_v37  ;;  %v805_v26 = vrot.slane %v676_v23, 4  ;;  %v829_v27 = vrot.slane %v684_v18, 4  ;;  %v832_v28 = vsel %vm573_vm9, %v684_v18, %v831_v13 }
 0x22c   : > { %v817_v29 = vrot.slane %v682_v25, 4  ;;  %v840_v30 = vperm.slane %v832_v28, %v3779_v2  ;;  %v741_v31 = vrot.slane %v515_v20, 4  ;;  %v753_v32 = vrot.slane %v539_v8, 4 }
 0x22d   : > { %v806_v33 = vsel %vm573_vm9, %v805_v26, %v672_v12  ;;  %v830_v34 = vsel %vm573_vm9, %v829_v27, %v680_v7  ;;  %v747_v35 = vrot.slane %v521_v14, 4  ;;  %v674_v36 = vsel %vm573_vm9, %v673_v22, %v632_v44 }
 0x22e   : > { %v818_v38 = vsel %vm573_vm9, %v817_v29, %v678_v15  ;;  %v3831_v37 = vperm.slane %v830_v34, %v3779_v2  ;;  %v742_v39 = vsel %vm573_vm9, %v741_v31, %v3754_v56  ;;  %v793_v40 = vrot.slane %v674_v36, 4 }
 0x22f   : > { %v3836_v41 = vperm.slane %v818_v38, %v3779_v2  ;;  %v746_v42 = vperm.slane %v742_v39, %v3779_v2  ;;  %v527_v43 = vpop.permute.xlu0 %526  ;;  %v795_v45 = vrot.slane %v670_v21, 4  ;;  %v808_v46 = vsel %vm573_vm9, %v676_v23, %v807_v19 }
 0x230   : > { %v865_v44 = vrot.slane %v3831_v37, 4  ;;  %v754_v47 = vsel %vm573_vm9, %v753_v32, %v527_v43  ;;  %v509_v48 = vpop.permute.xlu2 %508  ;;  %v816_v51 = vperm.slane %v808_v46, %v3779_v2  ;;  %v820_v52 = vsel %vm573_vm9, %v682_v25, %v819_v24 }
 0x231   : > { %v758_v56 = vperm.slane %v754_v47, %v3779_v2  ;;  %v748_v53 = vsel %vm573_vm9, %v747_v35, %v509_v48  ;;  %v796_v54 = vsel %vm573_vm9, %v674_v36, %v795_v45  ;;  %v828_v55 = vperm.slane %v820_v52, %v3779_v2 }
 0x232   : > { %v752_v58 = vperm.slane %v748_v53, %v3779_v2  ;;  %v804_v59 = vperm.slane %v796_v54, %v3779_v2  ;;  %v853_v60 = vrot.slane %v816_v51, 4  ;;  %v877_v61 = vrot.slane %v840_v30, 4 }
 0x233   : > { %v772_v62 = vsel %vm573_vm9, %v771_v3, %v758_v56  ;;  %v879_v63 = vrot.slane %v828_v55, 4  ;;  %v794_v0 = vsel %vm573_vm9, %v793_v40, %v670_v21  ;;  %v812_v1 = vperm.slane %v806_v33, %v3779_v2 }
 0x234   : > { %v776_v4 = vperm.slane %v772_v62, %v3785_v16  ;;  %v765_v5 = vrot.slane %v752_v58, 4  ;;  %v854_v6 = vsel %vm573_vm9, %v853_v60, %v804_v59  ;;  %v878_v7 = vsel %vm573_vm9, %v877_v61, %v828_v55 }
 0x235   : > { %v860_v8 = vperm.slane %v854_v6, %v3785_v16  ;;  %v884_v9 = vperm.slane %v878_v7, %v3785_v16  ;;  %v855_v11 = vrot.slane %v804_v59, 4  ;;  %v880_v12 = vsel %vm573_vm9, %v840_v30, %v879_v63 }
 0x236   : > { %v777_v3 = vrot.slane %v776_v4, 4  ;;  %v766_v13 = vsel %vm573_vm9, %v765_v5, %v746_v42  ;;  %v888_v14 = vperm.slane %v880_v12, %v3785_v16  ;;  %v800_v15 = vperm.slane %v794_v0, %v3779_v2 }
 0x237   : > { %v770_v17 = vperm.slane %v766_v13, %v3785_v16  ;;  %v897_v18 = vrot.slane %v884_v9, 4  ;;  %v899_v19 = vrot.slane %v860_v8, 4  ;;  %v856_v20 = vsel %vm573_vm9, %v816_v51, %v855_v11 }
 0x238   : > { %v864_v21 = vperm.slane %v856_v20, %v3785_v16  ;;  %v901_v22 = vrot.slane %v888_v14, 4  ;;  %v841_v26 = vrot.slane %v812_v1, 4  ;;  %v866_v32 = vsel %vm573_vm9, %v865_v44, %v3836_v41 }
 0x239   : > { %v778_v23 = vsel %vm573_vm9, %v777_v3, %v770_v17  ;;  %v898_v24 = vsel %vm573_vm9, %v897_v18, %v860_v8  ;;  %v900_v25 = vsel %vm573_vm9, %v884_v9, %v899_v19  ;;  %v872_v40 = vperm.slane %v866_v32, %v3785_v16 }
 0x23a   : > { %v905_v27 = vrot.slane %v778_v23, 4  ;;  %v1035_v28 = vpack.c.bf16 %v898_v24, %v898_v24  ;;  %v902_v29 = vsel %vm573_vm9, %v901_v22, %v864_v21  ;;  %v903_v30 = vrot.slane %v864_v21, 4 }
 0x23b   : > { %v842_v31 = vsel %vm573_vm9, %v841_v26, %v800_v15  ;;  %v1037_v34 = vpack.c.bf16 %v900_v25, %v900_v25  ;;  %v1039_v35 = vpack.c.bf16 %v902_v29, %v902_v29  ;;  %v910_v43 = vperm.slane %v778_v23, %v3779_v2 }
 0x23c   : > { %v906_v33 = vsel %vm573_vm9, 0.0, %v905_v27  ;;  %v904_v38 = vsel %vm573_vm9, %v888_v14, %v903_v30  ;;  %v848_v39 = vperm.slane %v842_v31, %v3785_v16  ;;  %v1050_v42 = vunpack.c.l.b16 %v1035_v28 }
 0x23d   : > { %v914_v36 = vperm.slane %v906_v33, %v3779_v2  ;;  %v843_v45 = vrot.slane %v800_v15, 4  ;;  %v889_v47 = vrot.slane %v872_v40, 4  ;;  %v1081_v51 = vunpack.c.l.b16 %v1037_v34 }
 0x23e   : > { %v891_v48 = vrot.slane %v848_v39, 4  ;;  %v1111_v52 = vunpack.c.l.b16 %v1039_v35  ;;  %v1041_v56 = vpack.c.bf16 %v904_v38, %v904_v38  ;;  %v920_v53 = vperm.slane %v910_v43, %v3785_v16 }
 0x23f   : > { %v930_v46 = vperm.slane %v914_v36, %v3785_v16  ;;  %v925_v44 = vrot.slane %v914_v36, 4  ;;  %v890_v59 = vsel %vm573_vm9, %v889_v47, %v848_v39  ;;  %v844_v63 = vsel %vm573_vm9, %v812_v1, %v843_v45 }
 0x240   : > { %v1020_v61 = vmul.f32 0.35355338, %v920_v53  ;;  %v892_v62 = vsel %vm573_vm9, %v872_v40, %v891_v48  ;;  %v1019_v5 = vmul.f32 0.35355338, %v890_v59  ;;  %v935_v6 = vrot.slane %v920_v53, 4 }
 0x241   : > { %v1036_v54 = vpack.c.bf16 %v930_v46, %v930_v46  ;;  %v939_v55 = vrot.slane %v930_v46, 4  ;;  %v926_v58 = vsel %vm573_vm9, 0.0, %v925_v44  ;;  %v1021_v11 = vmul.f32 0.35355338, %v892_v62 }
 0x242   : > { %v934_v60 = vperm.slane %v926_v58, %v3785_v16  ;;  %v1028_v3 = vpack.c.bf16 %v1020_v61, %v1020_v61  ;;  %v936_v13 = vsel %vm573_vm9, 0.0, %v935_v6  ;;  %v867_v14 = vrot.slane %v3836_v41, 4  ;;  %v440_v6 = vld [vmem:[%s3910_s22] sm:$0xff] }
 0x243   : > { %v1051_v0 = vunpack.c.l.b16 %v1036_v54  ;;  %v940_v4 = vsel %vm573_vm9, 0.0, %v939_v55  ;;  %v1141_v1 = vunpack.c.l.b16 %v1041_v56  ;;  %v1027_v21 = vpack.c.bf16 %v1019_v5, %v1019_v5 }
 0x244   : > { %v1038_v7 = vpack.c.bf16 %v940_v4, %v940_v4  ;;  %v1040_v8 = vpack.c.bf16 %v934_v60, %v934_v60  ;;  %v941_v9 = vrot.slane %v934_v60, 4  ;;  %v1022_v22 = vmul.f32 0.35355338, %v936_v13 }
 0x245   : > { %v1052_v12 = vpack.c.b16 %v1051_v0, %v1050_v42  ;;  %v1029_v25 = vpack.c.bf16 %v1021_v11, %v1021_v11  ;;  %v852_v26 = vperm.slane %v844_v63, %v3785_v16  ;;  %v1046_v28 = vunpack.c.l.b16 %v1028_v3  ;;  %v442_v11 = vld [vmem:[%s3910_s22 + $0x10] sm:$0xff] }
 0x246   : > { %v1082_v15 = vunpack.c.l.b16 %v1038_v7  ;;  %v1112_v17 = vunpack.c.l.b16 %v1040_v8  ;;  %v942_v18 = vsel %vm573_vm9, 0.0, %v941_v9  ;;  %v1030_v29 = vpack.c.bf16 %v1022_v22, %v1022_v22  ;;  %v446_v3 = vld [vmem:[%s3910_s22 + $0x30] sm:$0xff] }
 0x247   : > { %v1058_v19 = vsel %vm1053_vm10, %v1052_v12, 0  ;;  %v1042_v20 = vpack.c.bf16 %v942_v18, %v942_v18  ;;  %v868_v41 = vsel %vm573_vm9, %v3831_v37, %v867_v14  ;;  %v895_v33 = vrot.slane %v852_v26, 4  ;;  %v444_v18 = vld [vmem:[%s3910_s22 + $0x20] sm:$0xff] }
 0x248   : > { %1067 = vmatpush.bf16.xpose.msra.mxu1 %v1058_v19  ;;  %v1083_v23 = vpack.c.b16 %v1082_v15, %v1081_v51  ;;  %v1113_v24 = vpack.c.b16 %v1112_v17, %v1111_v52  ;;  %v876_v32 = vperm.slane %v868_v41, %v3785_v16  ;;  %v1045_v35 = vunpack.c.l.b16 %v1027_v21 }
 0x249   : > { %v1142_v27 = vunpack.c.l.b16 %v1042_v20  ;;  %v915_v36 = vrot.slane %v910_v43, 4  ;;  %v1077_v38 = vunpack.c.l.b16 %v1030_v29  ;;  %v1076_v46 = vunpack.c.l.b16 %v1029_v25  ;;  %v441_v20 = vld [vmem:[%s3910_s22 + $0x8] sm:$0x1] }
 0x24a   : > { %v1088_v30 = vsel %vm1053_vm10, %v1083_v23, 0  ;;  %v1118_v31 = vsel %vm1053_vm10, %v1113_v24, 0  ;;  %v893_v39 = vrot.slane %v876_v32, 4  ;;  %v896_v40 = vsel %vm573_vm9, %v876_v32, %v895_v33  ;;  %v443_v23 = vld [vmem:[%s3910_s22 + $0x18] sm:$0x1] }
 0x24b   : > { %1097 = vmatpush.bf16.xpose.msra.mxu2 %v1088_v30  ;;  %1127 = vmatpush.bf16.xpose.msra.mxu3 %v1118_v31  ;;  %v1143_v34 = vpack.c.b16 %v1142_v27, %v1141_v1  ;;  %v1047_v45 = vpack.c.b16 %v1046_v28, %v1045_v35  ;;  %v916_v37 = vsel %vm573_vm9, 0.0, %v915_v36  ;;  %v1025_v51 = vmul.f32 0.35355338, %v896_v40  ;;  %v445_v32 = vld [vmem:[%s3910_s22 + $0x28] sm:$0x1] }
 0x24c   : > { %v894_v44 = vsel %vm573_vm9, %v893_v39, %v852_v26  ;;  %v924_v47 = vperm.slane %v916_v37, %v3785_v16  ;;  %v1078_v43 = vpack.c.b16 %v1077_v38, %v1076_v46  ;;  %v447_v26 = vld [vmem:[%s3910_s22 + $0x38] sm:$0x1]  ;;  %v3940_v38 = vpop.permute.xlu0 %3441 }
 0x24d   : > { %v1148_v42 = vsel %vm1053_vm10, %v1143_v34, 0  ;;  %v1023_v48 = vmul.f32 0.35355338, %v894_v44  ;;  %v1033_v59 = vpack.c.bf16 %v1025_v51, %v1025_v51 }
 0x24e   : > { %1157 = vmatpush.bf16.xpose.msrb.mxu0 %v1148_v42  ;;  %v937_v52 = vrot.slane %v924_v47, 4  ;;  %v1024_v56 = vmul.f32 0.35355338, %v924_v47 }
 0x24f   : > { %3272 = vmatmul.msk.bf16.vlgmr.msra.gmra.mxu1 %vm1053_vm10, %v1047_v45  ;;  %v1031_v53 = vpack.c.bf16 %v1023_v48, %v1023_v48  ;;  %v1136_v0 = vunpack.c.l.b16 %v1033_v59 }
 0x250   : > { %v1032_v54 = vpack.c.bf16 %v1024_v56, %v1024_v56  ;;  %v938_v55 = vsel %vm573_vm9, 0.0, %v937_v52 }
 0x251   : > { %v1026_v58 = vmul.f32 0.35355338, %v938_v55  ;;  %v1106_v60 = vunpack.c.l.b16 %v1031_v53 }
 0x252   : > { %3273 = vmatmul.msk.bf16.vlgmr.msra.gmra.mxu2 %vm1053_vm10, %v1078_v43  ;;  %v1107_v61 = vunpack.c.l.b16 %v1032_v54 }
 0x253   : > { %v1034_v62 = vpack.c.bf16 %v1026_v58, %v1026_v58 }
 0x254   : > { %v1108_v63 = vpack.c.b16 %v1107_v61, %v1106_v60 }
 0x255   : > { %v1137_v4 = vunpack.c.l.b16 %v1034_v62 }
 0x256   : > { %3274 = vmatmul.msk.bf16.vlgmr.msra.gmra.mxu3 %vm1053_vm10, %v1108_v63 }
 0x257   : > { %v1138_v5 = vpack.c.b16 %v1137_v4, %v1136_v0 }
 0x259   : > { %3275 = vmatmul.msk.bf16.vlgmr.msrb.gmra.mxu0 %vm1053_vm10, %v1138_v5 }
 0x2cc   : > { %v1069_v7 = vpop.f32.mrf.mxu1 }
 0x2cd   : > { %v3913_v8 = vadd.f32 %v1069_v7, %v440_v6 }
 0x2cf   : > { %v1165_v9 = vsel %vm1164_vm11, %v3913_v8, -inf }
 0x2d0   : > { %1166 = vmax.xlane.f32.xlu2 %v1165_v9 }
 0x2d4   : > { %v1071_v21 = vpop.f32.mrf.mxu1 }
 0x2d5   : > { %v1099_v12 = vpop.f32.mrf.mxu2  ;;  %v3926_v27 = vadd.f32 %v1071_v21, %v441_v20 }
 0x2d6   : > { %v1100_v13 = vadd.f32 %v1099_v12, %v442_v11  ;;  %v1159_v14 = vpop.f32.mrf.mxu0 }
 0x2d7   : > { %v1160_v17 = vadd.f32 %v1159_v14, %v446_v3  ;;  %v1169_v30 = vsel %vm1168_vm12, %v3926_v27, -inf }
 0x2d8   : > { %v1172_v15 = vsel %vm1164_vm11, %v1100_v13, -inf }
 0x2d9   : > { %1173 = vmax.xlane.f32.xlu0 %v1172_v15  ;;  %v1129_v1 = vpop.f32.mrf.mxu3  ;;  %v1184_v19 = vsel %vm1164_vm11, %v1160_v17, -inf }
 0x2da   : > { %v1130_v22 = vadd.f32 %v1129_v1, %v444_v18  ;;  %1185 = vmax.xlane.f32.xlu1 %v1184_v19  ;;  %v3443_v19 = vunpack.i.l.bf16 %v3940_v38 }
 0x2dc   : > { %v1178_v25 = vsel %vm1164_vm11, %v1130_v22, -inf }
 0x2dd   : > { %v1101_v24 = vpop.f32.mrf.mxu2  ;;  %1179 = vmax.xlane.f32.xlu2 %v1178_v25  ;;  %v687_v25 = vrot.slane %v3443_v19, 4 }
 0x2de   : > { %v1161_v28 = vpop.f32.mrf.mxu0  ;;  %v1102_v29 = vadd.f32 %v1101_v24, %v443_v23 }
 0x2df   : > { %v1162_v41 = vadd.f32 %v1161_v28, %v447_v26 }
 0x2e0   : > { %v1175_v34 = vsel %vm1168_vm12, %v1102_v29, -inf }
 0x2e1   : > { %v1187_v31 = vsel %vm1168_vm12, %v1162_v41, -inf  ;;  %v1131_v33 = vpop.f32.mrf.mxu3 }
 0x2e2   : > { %1170 = vmax.xlane.f32.xlu1 %v1169_v30  ;;  %1188 = vmax.xlane.f32.xlu0 %v1187_v31  ;;  %v1132_v35 = vadd.f32 %v1131_v33, %v445_v32  ;;  %v3444_v31 = vunpack.i.h.bf16 %v3940_v38 }
 0x2e4   : > { %v1181_v36 = vsel %vm1168_vm12, %v1132_v35, -inf }
 0x2e5   : > { %1176 = vmax.xlane.f32.xlu2 %v1175_v34 }
 0x2ea   : > { %1182 = vmax.xlane.f32.xlu1 %v1181_v36 }
 0x2f6   : > { %3456 = vrot.lane.b32.xlu0 %v3769_v57, %s3643_s23 }
 0x2fd   : > { %3446 = vrot.lane.b32.xlu2 %v3769_v57, %s3644_s24 }
 0x303   : > { %3451 = vrot.lane.b32.xlu1 %v3769_v57, %s4629_s25 }
 0x343   : > { %v1167_v39 = vpop.xlane.xlu2 %1166 }
 0x344   : > { %v1190_v62 = vsub.f32 %v3913_v8, %v1167_v39 }
 0x346   : > { %v1198_v6 = vmul.f32 1.442695, %v1190_v62 }
 0x34c   : > { %v1174_v40 = vpop.xlane.xlu0 %1173 }
 0x34d   : > { %v1192_v42 = vsub.f32 %v1100_v13, %v1174_v40  ;;  %v1186_v45 = vpop.xlane.xlu1 %1185 }
 0x34e   : > { %v1196_v46 = vsub.f32 %v1160_v17, %v1186_v45 }
 0x34f   : > { %v1202_v37 = vmul.f32 1.442695, %v1192_v42 }
 0x350   : > { %v1210_v44 = vmul.f32 1.442695, %v1196_v46  ;;  %v1180_v47 = vpop.xlane.xlu2 %1179 }
 0x351   : > { %3522 = vpow2.f32 %v1202_v37  ;;  %v1194_v48 = vsub.f32 %v1130_v22, %v1180_v47 }
 0x352   : > { %3524 = vpow2.f32 %v1210_v44 }
 0x353   : > { %v1206_v51 = vmul.f32 1.442695, %v1194_v48 }
 0x355   : > { %3526 = vpow2.f32 %v1206_v51  ;;  %v1171_v52 = vpop.xlane.xlu1 %1170  ;;  %v1189_v56 = vpop.xlane.xlu0 %1188 }
 0x356   : > { %v1197_v57 = vsub.f32 %v1162_v41, %v1189_v56  ;;  %v1191_v7 = vsub.f32 %v3926_v27, %v1171_v52 }
 0x357   : > { %v3942_v43 = vpop.eup %3522 }
 0x358   : > { %v1220_v53 = vsel %vm1164_vm11, %v3942_v43, 0.0  ;;  %v3946_v54 = vpop.eup %3524  ;;  %v1212_v55 = vmul.f32 1.442695, %v1197_v57  ;;  %v1177_v58 = vpop.xlane.xlu2 %1176  ;;  %v1200_v3 = vmul.f32 1.442695, %v1191_v7 }
 0x359   : > { %1221 = vadd.xlane.f32.xlu1 %v1220_v53  ;;  %v1193_v59 = vsub.f32 %v1102_v29, %v1177_v58  ;;  %v1232_v60 = vsel %vm1164_vm11, %v3946_v54, 0.0 }
 0x35a   : > { %1233 = vadd.xlane.f32.xlu0 %v1232_v60  ;;  %3528 = vpow2.f32 %v1212_v55 }
 0x35b   : > { %v3950_v61 = vpop.eup %3526  ;;  %v1204_v63 = vmul.f32 1.442695, %v1193_v59 }
 0x35c   : > { %v1226_v0 = vsel %vm1164_vm11, %v3950_v61, 0.0 }
 0x35d   : > { %3530 = vpow2.f32 %v1204_v63  ;;  %v1183_v4 = vpop.xlane.xlu1 %1182  ;;  %1227 = vadd.xlane.f32.xlu2 %v1226_v0 }
 0x35e   : > { %v1195_v5 = vsub.f32 %v1132_v35, %v1183_v4 }
 0x360   : > { %v1208_v9 = vmul.f32 1.442695, %v1195_v5  ;;  %v3956_v11 = vpop.eup %3528  ;;  %v3447_v14 = vpop.permute.xlu2 %3446 }
 0x361   : > { %v1235_v12 = vsel %vm1168_vm12, %v3956_v11, 0.0  ;;  %v3448_v1 = vunpack.i.l.bf16 %v3447_v14  ;;  %v3449_v23 = vunpack.i.h.bf16 %v3447_v14 }
 0x362   : > { %3532 = vpow2.f32 %v1208_v9  ;;  %1236 = vadd.xlane.f32.xlu1 %v1235_v12 }
 0x363   : > { %v3960_v8 = vpop.eup %3530  ;;  %3534 = vpow2.f32 %v1198_v6  ;;  %v685_v22 = vrot.slane %v3448_v1, 4  ;;  %v688_v28 = vsel %vm573_vm9, %v3448_v1, %v687_v25  ;;  %v779_v30 = vrot.slane %v3449_v23, 4 }
 0x364   : > { %v1223_v13 = vsel %vm1168_vm12, %v3960_v8, 0.0  ;;  %3536 = vpow2.f32 %v1200_v3  ;;  %v696_v33 = vperm.slane %v688_v28, %v3779_v2 }
 0x365   : > { %1224 = vadd.xlane.f32.xlu2 %v1223_v13  ;;  %v686_v27 = vsel %vm573_vm9, %v685_v22, %v3443_v19  ;;  %v780_v42 = vsel %vm573_vm9, %v779_v30, %v3444_v31 }
 0x366   : > { %v692_v32 = vperm.slane %v686_v27, %v3779_v2  ;;  %v784_v48 = vperm.slane %v780_v42, %v3779_v2  ;;  %v723_v51 = vrot.slane %v696_v33, 4 }
 0x368   : > { %v3964_v15 = vpop.eup %3532  ;;  %v3457_v24 = vpop.permute.xlu0 %3456  ;;  %v711_v44 = vrot.slane %v692_v32, 4 }
 0x369   : > { %v3966_v17 = vpop.eup %3534  ;;  %v1229_v18 = vsel %vm1168_vm12, %v3964_v15, 0.0  ;;  %v3459_v29 = vunpack.i.h.bf16 %v3457_v24  ;;  %v3458_v41 = vunpack.i.l.bf16 %v3457_v24 }
 0x36a   : > { %1230 = vadd.xlane.f32.xlu0 %v1229_v18  ;;  %v1214_v20 = vsel %vm1164_vm11, %v3966_v17, 0.0  ;;  %v3973_v21 = vpop.eup %3536 }
 0x36b   : > { %v1217_v26 = vsel %vm1168_vm12, %v3973_v21, 0.0  ;;  %v785_v35 = vrot.slane %v3459_v29, 4  ;;  %v697_v36 = vrot.slane %v3458_v41, 4 }
 0x36d   : > { %1215 = vadd.xlane.f32.xlu2 %v1214_v20 }
 0x372   : > { %1218 = vadd.xlane.f32.xlu0 %v1217_v26 }
 0x375   : > { %v3452_v34 = vpop.permute.xlu1 %3451 }
 0x376   : > { %v3454_v39 = vunpack.i.h.bf16 %v3452_v34  ;;  %v3453_v40 = vunpack.i.l.bf16 %v3452_v34 }
 0x378   : > { %v786_v45 = vsel %vm573_vm9, %v785_v35, %v3454_v39  ;;  %v698_v37 = vsel %vm573_vm9, %v697_v36, %v3453_v40  ;;  %v699_v46 = vrot.slane %v3453_v40, 4 }
 0x379   : > { %v790_v47 = vperm.slane %v786_v45, %v3779_v2  ;;  %v704_v38 = vperm.slane %v698_v37, %v3779_v2 }
 0x37a   : > { %v700_v52 = vsel %vm573_vm9, %v3458_v41, %v699_v46 }
 0x37b   : > { %v791_v56 = vrot.slane %v790_v47, 4  ;;  %v708_v57 = vperm.slane %v700_v52, %v3779_v2  ;;  %v709_v53 = vrot.slane %v704_v38, 4  ;;  %v712_v55 = vsel %vm573_vm9, %v704_v38, %v711_v44 }
 0x37c   : > { %v720_v58 = vperm.slane %v712_v55, %v3785_v16 }
 0x37d   : > { %v710_v59 = vsel %vm573_vm9, %v709_v53, %v692_v32  ;;  %v721_v60 = vrot.slane %v708_v57, 4  ;;  %v724_v62 = vsel %vm573_vm9, %v708_v57, %v723_v51  ;;  %v792_v63 = vsel %vm573_vm9, %v791_v56, %v784_v48 }
 0x37e   : > { %v716_v0 = vperm.slane %v710_v59, %v3785_v16  ;;  %v732_v4 = vperm.slane %v724_v62, %v3785_v16  ;;  %v735_v5 = vrot.slane %v720_v58, 4  ;;  %v1000_v6 = vperm.slane %v792_v63, %v3785_v16 }
 0x37f   : > { %v722_v7 = vsel %vm573_vm9, %v721_v60, %v696_v33  ;;  %v3646_v62 = vmov 65535  }
 0x380   : > { %v728_v9 = vperm.slane %v722_v7, %v3785_v16  ;;  %v733_v12 = vrot.slane %v716_v0, 4  ;;  %v736_v3 = vsel %vm573_vm9, 0.0, %v735_v5  ;;  %v739_v13 = vrot.slane %v732_v4, 4 }
 0x381   : > { %v943_v14 = vsel %vm573_vm9, %v735_v5, %v716_v0  ;;  %v948_v18 = vrot.slane %v736_v3, 4  ;;  %v1004_v1 = vperm.slane %v1000_v6, %v3779_v2  ;;  %v1285_v63 = vsel %vm1283_vm13, 4294967295, %v3646_v62 }
 0x382   : > { %v734_v19 = vsel %vm573_vm9, 0.0, %v733_v12  ;;  %v737_v20 = vrot.slane %v728_v9, 4  ;;  %v740_v22 = vsel %vm573_vm9, 0.0, %v739_v13  ;;  %v947_v23 = vperm.slane %v943_v14, %v3779_v2 }
 0x383   : > { %v949_v24 = vsel %vm573_vm9, %v948_v18, %v734_v19  ;;  %v954_v25 = vsel %vm573_vm9, %v739_v13, %v728_v9  ;;  %v959_v26 = vrot.slane %v740_v22, 4  ;;  %v1005_v27 = vrot.slane %v1004_v1, 4 }
 0x384   : > { %v738_v28 = vsel %vm573_vm9, 0.0, %v737_v20  ;;  %v953_v29 = vperm.slane %v949_v24, %v3779_v2  ;;  %v958_v41 = vperm.slane %v954_v25, %v3779_v2  ;;  %v967_v30 = vrot.slane %v947_v23, 4 }
 0x385   : > { %v960_v31 = vsel %vm573_vm9, %v959_v26, %v738_v28  ;;  %v1006_v32 = vsel %vm573_vm9, 0.0, %v1005_v27  ;;  %v1010_v33 = vperm.slane %v1004_v1, %v3785_v16  ;;  %v4031_v18 = vsel %vm1284_vm14, %v1285_v63, 0 }
 0x386   : > { %v964_v34 = vperm.slane %v960_v31, %v3779_v2  ;;  %v968_v35 = vsel %vm573_vm9, %v953_v29, %v967_v30  ;;  %v979_v36 = vrot.slane %v958_v41, 4  ;;  %v1014_v39 = vperm.slane %v1006_v32, %v3785_v16 }
 0x387   : > { %v976_v40 = vperm.slane %v968_v35, %v3785_v16  ;;  %v965_v42 = vrot.slane %v953_v29, 4  ;;  %v1015_v45 = vrot.slane %v1010_v33, 4  ;;  %v1263_v9 = vpack.c.bf16 %v1010_v33, %v1010_v33 }
 0x388   : > { %v980_v37 = vsel %vm573_vm9, %v964_v34, %v979_v36  ;;  %v1017_v46 = vrot.slane %v1014_v39, 4  ;;  %v977_v44 = vrot.slane %v964_v34, 4  ;;  %v1267_v4 = vpack.c.bf16 %v1014_v39, %v1014_v39 }
 0x389   : > { %v988_v47 = vperm.slane %v980_v37, %v3785_v16  ;;  %v995_v38 = vrot.slane %v976_v40, 4  ;;  %v966_v48 = vsel %vm573_vm9, %v965_v42, %v947_v23  ;;  %v1016_v57 = vsel %vm573_vm9, 0.0, %v1015_v45 }
 0x38a   : > { %v1018_v51 = vsel %vm573_vm9, 0.0, %v1017_v46  ;;  %v972_v52 = vperm.slane %v966_v48, %v3785_v16  ;;  %v978_v56 = vsel %vm573_vm9, %v977_v44, %v958_v41  ;;  %v1265_v5 = vpack.c.bf16 %v1016_v57, %v1016_v57 }
 0x38b   : > { %v996_v53 = vsel %vm573_vm9, %v988_v47, %v995_v38  ;;  %v1269_v55 = vpack.c.bf16 %v1018_v51, %v1018_v51  ;;  %v984_v58 = vperm.slane %v978_v56, %v3785_v16  ;;  %v993_v59 = vrot.slane %v988_v47, 4 }
 0x38c   : > { %v1268_v60 = vpack.c.bf16 %v996_v53, %v996_v53  ;;  %v991_v0 = vrot.slane %v972_v52, 4  ;;  %v1342_v23 = vunpack.c.l.b16 %v1267_v4  ;;  %v1312_v26 = vunpack.c.l.b16 %v1265_v5 }
 0x38d   : > { %v994_v6 = vsel %vm573_vm9, %v993_v59, %v976_v40  ;;  %v989_v7 = vrot.slane %v984_v58, 4  ;;  %v1372_v3 = vunpack.c.l.b16 %v1269_v55  ;;  %v1278_v41 = vunpack.c.l.b16 %v1263_v9 }
 0x38e   : > { %v1371_v12 = vunpack.c.l.b16 %v1268_v60  ;;  %v992_v13 = vsel %vm573_vm9, %v984_v58, %v991_v0  ;;  %v1266_v14 = vpack.c.bf16 %v994_v6, %v994_v6 }
 0x38f   : > { %v1264_v1 = vpack.c.bf16 %v992_v13, %v992_v13  ;;  %v990_v19 = vsel %vm573_vm9, %v989_v7, %v972_v52 }
 0x390   : > { %v1373_v20 = vpack.c.b16 %v1372_v3, %v1371_v12  ;;  %v1341_v22 = vunpack.c.l.b16 %v1266_v14  ;;  %v1262_v24 = vpack.c.bf16 %v990_v19, %v990_v19 }
 0x391   : > { %v1311_v25 = vunpack.c.l.b16 %v1264_v1 }
 0x392   : > { %v1378_v27 = vand.u32 %v1373_v20, %v4031_v18  ;;  %v1343_v28 = vpack.c.b16 %v1342_v23, %v1341_v22  ;;  %v1277_v29 = vunpack.c.l.b16 %v1262_v24 }
 0x393   : > { %v1313_v30 = vpack.c.b16 %v1312_v26, %v1311_v25 }
 0x394   : > { %1387 = vmatpush.bf16.msra.mxu0 %v1378_v27  ;;  %v1348_v31 = vand.u32 %v1343_v28, %v4031_v18  ;;  %v1279_v32 = vpack.c.b16 %v1278_v41, %v1277_v29 }
 0x395   : > { %v1318_v33 = vand.u32 %v1313_v30, %v4031_v18 }
 0x396   : > { %1357 = vmatpush.bf16.msrb.mxu3 %v1348_v31  ;;  %v1288_v34 = vand.u32 %v4031_v18, %v1279_v32 }
 0x397   : > { %1327 = vmatpush.bf16.msrb.mxu2 %v1318_v33 }
 0x398   : > { %1297 = vmatpush.bf16.msrb.mxu1 %v1288_v34 }
 0x3cc   : > { %v1222_v35 = vpop.xlane.xlu1 %1221 }
 0x3cd   : > { %v1234_v36 = vpop.xlane.xlu0 %1233 }
 0x3ce   : > { %3538 = vrcp.f32 %v1234_v36 }
 0x3cf   : > { %3540 = vrcp.f32 %v1222_v35 }
 0x3d0   : > { %v1228_v39 = vpop.xlane.xlu2 %1227 }
 0x3d4   : > { %v3539_v42 = vpop.eup %3538 }
 0x3d5   : > { %v1237_v40 = vpop.xlane.xlu1 %1236  ;;  %v3541_v37 = vpop.eup %3540  ;;  %v1252_v46 = vmul.f32 %v3539_v42, %v3946_v54 }
 0x3d6   : > { %3542 = vrcp.f32 %v1237_v40  ;;  %v1248_v44 = vmul.f32 %v3541_v37, %v3942_v43 }
 0x3d7   : > { %3544 = vrcp.f32 %v1228_v39  ;;  %v1260_v51 = vpack.c.bf16 %v1252_v46, %v1252_v46 }
 0x3d8   : > { %v1225_v45 = vpop.xlane.xlu2 %1224  ;;  %v1256_v57 = vpack.c.bf16 %v1248_v44, %v1248_v44 }
 0x3d9   : > { %3546 = vrcp.f32 %v1225_v45  ;;  %v1366_v60 = vunpack.c.l.b16 %v1260_v51 }
 0x3da   : > { %v1306_v63 = vunpack.c.l.b16 %v1256_v57 }
 0x3dc   : > { %v3543_v47 = vpop.eup %3542 }
 0x3dd   : > { %v1231_v38 = vpop.xlane.xlu0 %1230  ;;  %v3545_v48 = vpop.eup %3544  ;;  %v1253_v52 = vmul.f32 %v3543_v47, %v3956_v11 }
 0x3de   : > { %3548 = vrcp.f32 %v1231_v38  ;;  %v1250_v59 = vmul.f32 %v3545_v48, %v3950_v61 }
 0x3df   : > { %v3547_v56 = vpop.eup %3546  ;;  %v1261_v53 = vpack.c.bf16 %v1253_v52, %v1253_v52 }
 0x3e0   : > { %v1249_v55 = vmul.f32 %v3547_v56, %v3960_v8  ;;  %v1216_v58 = vpop.xlane.xlu2 %1215  ;;  %v1258_v5 = vpack.c.bf16 %v1250_v59, %v1250_v59 }
 0x3e1   : > { %3550 = vrcp.f32 %v1216_v58  ;;  %v1367_v54 = vunpack.c.l.b16 %v1261_v53 }
 0x3e2   : > { %v1257_v62 = vpack.c.bf16 %v1249_v55, %v1249_v55  ;;  %v1336_v61 = vunpack.c.l.b16 %v1258_v5 }
 0x3e3   : > { %v1368_v0 = vpack.c.b16 %v1367_v54, %v1366_v60 }
 0x3e4   : > { %v3549_v43 = vpop.eup %3548  ;;  %v1307_v4 = vunpack.c.l.b16 %v1257_v62 }
 0x3e5   : > { %v1251_v11 = vmul.f32 %v3549_v43, %v3964_v15  ;;  %v1219_v6 = vpop.xlane.xlu0 %1218  ;;  %3279 = vmatmul.msk.bf16.vlgmr.msra.gmra.mxu0 %vm1164_vm11, %v1368_v0 }
 0x3e6   : > { %3552 = vrcp.f32 %v1219_v6  ;;  %v1308_v7 = vpack.c.b16 %v1307_v4, %v1306_v63 }
 0x3e7   : > { %v3551_v8 = vpop.eup %3550  ;;  %v1259_v9 = vpack.c.bf16 %v1251_v11, %v1251_v11 }
 0x3e8   : > { %3277 = vmatmul.msk.bf16.vlgmr.msrb.gmra.mxu2 %vm1164_vm11, %v1308_v7  ;;  %v1246_v3 = vmul.f32 %v3551_v8, %v3966_v17 }
 0x3e9   : > { %v1337_v12 = vunpack.c.l.b16 %v1259_v9 }
 0x3ea   : > { %v1254_v1 = vpack.c.bf16 %v1246_v3, %v1246_v3 }
 0x3eb   : > { %v1338_v13 = vpack.c.b16 %v1337_v12, %v1336_v61 }
 0x3ec   : > { %v3553_v14 = vpop.eup %3552  ;;  %v1272_v20 = vunpack.c.l.b16 %v1254_v1 }
 0x3ed   : > { %v1247_v19 = vmul.f32 %v3553_v14, %v3973_v21  ;;  %3278 = vmatmul.msk.bf16.vlgmr.msrb.gmra.mxu3 %vm1164_vm11, %v1338_v13 }
 0x3ef   : > { %v1255_v15 = vpack.c.bf16 %v1247_v19, %v1247_v19 }
 0x3f1   : > { %v1273_v22 = vunpack.c.l.b16 %v1255_v15 }
 0x3f3   : > { %v1274_v23 = vpack.c.b16 %v1273_v22, %v1272_v20 }
 0x3f5   : > { %3276 = vmatmul.msk.bf16.vlgmr.msrb.gmra.mxu1 %vm1164_vm11, %v1274_v23 }
 0x462   : > { %v1389_v24 = vpop.f32.mrf.mxu0 }
 0x463   : > { %v1406_v25 = vrot.slane %v1389_v24, 4 }
 0x46a   : > { %v1391_v31 = vpop.f32.mrf.mxu0 }
 0x46b   : > { %v1329_v26 = vpop.f32.mrf.mxu2  ;;  %v1456_v40 = vrot.slane %v1391_v31, 4 }
 0x46c   : > { %v1408_v27 = vrot.slane %v1329_v26, 4  ;;  %v1407_v28 = vsel %vm573_vm9, %v1406_v25, %v1329_v26 }
 0x46d   : > { %v1413_v29 = vperm.slane %v1407_v28, %v3779_v2 }
 0x46e   : > { %v1409_v17 = vsel %vm573_vm9, %v1389_v24, %v1408_v27 }
 0x46f   : > { %v1417_v30 = vperm.slane %v1409_v17, %v3779_v2  ;;  %v1418_v35 = vrot.slane %v1413_v29, 4 }
 0x470   : > { %v1359_v41 = vpop.f32.mrf.mxu3 }
 0x471   : > { %v1394_v21 = vrot.slane %v1359_v41, 4  ;;  %v1430_v45 = vrot.slane %v1417_v30, 4 }
 0x472   : > { %v1299_v32 = vpop.f32.mrf.mxu1 }
 0x473   : > { %v1395_v33 = vsel %vm573_vm9, %v1394_v21, %v1299_v32  ;;  %v1396_v34 = vrot.slane %v1299_v32, 4  ;;  %v1331_v39 = vpop.f32.mrf.mxu2 }
 0x474   : > { %v1401_v36 = vperm.slane %v1395_v33, %v3779_v2  ;;  %v1457_v38 = vsel %vm573_vm9, %v1456_v40, %v1331_v39 }
 0x475   : > { %v1397_v42 = vsel %vm573_vm9, %v1359_v41, %v1396_v34  ;;  %v1461_v59 = vperm.slane %v1457_v38, %v3779_v2 }
 0x476   : > { %v1405_v37 = vperm.slane %v1397_v42, %v3779_v2  ;;  %v1419_v46 = vsel %vm573_vm9, %v1418_v35, %v1401_v36  ;;  %v1420_v44 = vrot.slane %v1401_v36, 4 }
 0x477   : > { %v1425_v47 = vperm.slane %v1419_v46, %v3785_v16  ;;  %v1462_v8 = vrot.slane %v1461_v59, 4  ;;  %v3397_v59 = vld [vmem:[%s4623_s5 + $0x8] sm:$0xff] }
 0x478   : > { %v1421_v48 = vsel %vm573_vm9, %v1413_v29, %v1420_v44  ;;  %v1431_v51 = vsel %vm573_vm9, %v1430_v45, %v1405_v37  ;;  %v1432_v52 = vrot.slane %v1405_v37, 4  ;;  %v1361_v56 = vpop.f32.mrf.mxu3  ;;  %1595 = vmatpush.bf16.msra.mxu1 %v3397_v59 }
 0x479   : > { %v1429_v57 = vperm.slane %v1421_v48, %v3785_v16  ;;  %v1437_v53 = vperm.slane %v1431_v51, %v3785_v16  ;;  %v1450_v55 = vrot.slane %v1361_v56, 4  ;;  %v1442_v62 = vrot.slane %v1425_v47, 4 }
 0x47a   : > { %v1433_v58 = vsel %vm573_vm9, %v1417_v30, %v1432_v52  ;;  %v1301_v60 = vpop.f32.mrf.mxu1 }
 0x47b   : > { %v1441_v54 = vperm.slane %v1433_v58, %v3785_v16  ;;  %v1444_v43 = vrot.slane %v1429_v57, 4  ;;  %v1451_v63 = vsel %vm573_vm9, %v1450_v55, %v1301_v60  ;;  %v1446_v4 = vrot.slane %v1437_v53, 4  ;;  %v3396_v60 = vld [vmem:[%s4623_s5] sm:$0xff] }
 0x47c   : > { %v1455_v9 = vperm.slane %v1451_v63, %v3779_v2  ;;  %v1443_v61 = vsel %vm573_vm9, 0.0, %v1442_v62  ;;  %1596 = vmatpush.bf16.msra.mxu1 %v3396_v60 }
 0x47d   : > { %v1445_v0 = vsel %vm573_vm9, 0.0, %v1444_v43  ;;  %v1448_v5 = vrot.slane %v1441_v54, 4  ;;  %v1464_v11 = vsel %vm573_vm9, %v1444_v43, %v1425_v47  ;;  %v1447_v15 = vsel %vm573_vm9, 0.0, %v1446_v4 }
 0x47e   : > { %v1468_v6 = vperm.slane %v1464_v11, %v3779_v2  ;;  %v1469_v7 = vrot.slane %v1445_v0, 4  ;;  %v1463_v1 = vsel %vm573_vm9, %v1462_v8, %v1455_v9 }
 0x47f   : > { %v1449_v12 = vsel %vm573_vm9, 0.0, %v1448_v5  ;;  %v1475_v3 = vsel %vm573_vm9, %v1448_v5, %v1437_v53  ;;  %v1521_v22 = vperm.slane %v1463_v1, %v3785_v16 }
 0x480   : > { %v1470_v13 = vsel %vm573_vm9, %v1469_v7, %v1443_v61  ;;  %v1480_v14 = vrot.slane %v1449_v12, 4  ;;  %v1479_v19 = vperm.slane %v1475_v3, %v3779_v2  ;;  %v1488_v23 = vrot.slane %v1468_v6, 4 }
 0x481   : > { %v1474_v20 = vperm.slane %v1470_v13, %v3779_v2  ;;  %v1525_v26 = vperm.slane %v1521_v22, %v3779_v2 }
 0x482   : > { %v1481_v24 = vsel %vm573_vm9, %v1480_v14, %v1447_v15  ;;  %v1500_v25 = vrot.slane %v1479_v19, 4  ;;  %v4121_v14 = vld [vmem:[%s4624_s6] sm:$0x3f] }
 0x483   : > { %v1485_v27 = vperm.slane %v1481_v24, %v3779_v2  ;;  %v1486_v28 = vrot.slane %v1474_v20, 4  ;;  %v1489_v17 = vsel %vm573_vm9, %v1474_v20, %v1488_v23  ;;  %v1531_v30 = vperm.slane %v1525_v26, %v3785_v16 }
 0x484   : > { %v1497_v29 = vperm.slane %v1489_v17, %v3785_v16  ;;  %v1526_v34 = vrot.slane %v1525_v26, 4  ;;  %v1573_v1 = vperm.slane %v4121_v14, 0 }
 0x485   : > { %v1487_v41 = vsel %vm573_vm9, %v1486_v28, %v1468_v6  ;;  %v1498_v21 = vrot.slane %v1485_v27, 4  ;;  %v1501_v31 = vsel %vm573_vm9, %v1485_v27, %v1500_v25  ;;  %v1536_v36 = vrot.slane %v1531_v30, 4 }
 0x486   : > { %v1493_v32 = vperm.slane %v1487_v41, %v3785_v16  ;;  %v1509_v33 = vperm.slane %v1501_v31, %v3785_v16  ;;  %v1527_v45 = vsel %vm573_vm9, 0.0, %v1526_v34  ;;  %v1516_v46 = vrot.slane %v1497_v29, 4 }
 0x487   : > { %v1499_v35 = vsel %vm573_vm9, %v1498_v21, %v1479_v19  ;;  %v1535_v37 = vperm.slane %v1527_v45, %v3785_v16  ;;  %v1537_v38 = vsel %vm573_vm9, 0.0, %v1536_v36  ;;  %v3398_v36 = vld [vmem:[%s4625_s7] sm:$0xff] }
 0x488   : > { %v1505_v39 = vperm.slane %v1499_v35, %v3785_v16  ;;  %v1512_v40 = vrot.slane %v1493_v32, 4  ;;  %v1514_v42 = vrot.slane %v1509_v33, 4  ;;  %v1517_v53 = vsel %vm573_vm9, %v1509_v33, %v1516_v46  ;;  %v3399_v35 = vld [vmem:[%s4625_s7 + $0x8] sm:$0xff] }
 0x489   : > { %v1538_v56 = vrot.slane %v1535_v37, 4  ;;  %1680 = vmatpush.bf16.msra.mxu2 %v3399_v35 }
 0x48a   : > { %v1510_v44 = vrot.slane %v1505_v39, 4  ;;  %v1513_v47 = vsel %vm573_vm9, %v1505_v39, %v1512_v40  ;;  %v1515_v48 = vsel %vm573_vm9, %v1514_v42, %v1497_v29 }
 0x48b   : > { %v3460_v51 = vpack.i.bf16 %v1537_v38, %v1513_v47  ;;  %v3465_v52 = vpack.i.bf16 %v1535_v37, %v1515_v48  ;;  %v1539_v55 = vsel %vm573_vm9, 0.0, %v1538_v56 }
 0x48c   : > { %v1511_v57 = vsel %vm573_vm9, %v1510_v44, %v1493_v32  ;;  %v3470_v58 = vpack.i.bf16 %v1539_v55, %v1517_v53  ;;  %v1649_v55 = vperm.slane %v4121_v14, 1 }
 0x48d   : > { %3461 = vrot.lane.b32.xlu1 %v3460_v51, %s3647_s26  ;;  %3466 = vrot.lane.b32.xlu2 %v3465_v52, %s4631_s27 }
 0x48e   : > { %3471 = vrot.lane.b32.xlu0 %v3470_v58, %s4630_s28  ;;  %1681 = vmatpush.bf16.msra.mxu2 %v3398_v36 }
 0x4e7   : > { %v3467_v54 = vpop.permute.xlu2 %3466 }
 0x4e8   : > { %v3469_v0 = vunpack.i.h.bf16 %v3467_v54  ;;  %v3468_v4 = vunpack.i.l.bf16 %v3467_v54  ;;  %v1652_v54 = vperm.slane %v4121_v14, 2 }
 0x4ff   : > { %v3462_v62 = vpop.permute.xlu1 %3461 }
 0x500   : > { %v3464_v43 = vunpack.i.h.bf16 %v3462_v62  ;;  %v3463_v63 = vunpack.i.l.bf16 %v3462_v62  ;;  %v3472_v6 = vpop.permute.xlu0 %3471 }
 0x501   : > { %v3474_v9 = vunpack.i.h.bf16 %v3472_v6  ;;  %v3473_v61 = vunpack.i.l.bf16 %v3472_v6 }
 0x502   : > { %v1565_v5 = vsel %vm1053_vm10, %v1531_v30, %v3464_v43  ;;  %v1564_v11 = vsel %vm1053_vm10, %v1511_v57, %v3463_v63 }
 0x503   : > { %v1567_v7 = vsel %vm1566_vm15, %v1564_v11, %v3468_v4  ;;  %v1568_v8 = vsel %vm1566_vm15, %v1565_v5, %v3469_v0  ;;  %v3513_v11 = vld [vmem:[%s4626_s8] ss:$0 sm:$0xff] }
 0x504   : > { %v1571_v12 = vsel %vm1569_vm2, %v1568_v8, %v3474_v9  ;;  %v1570_v3 = vsel %vm1569_vm2, %v1567_v7, %v3473_v61 }
 0x505   : > { %v1572_v13 = vpack.c.bf16 %v1571_v12, %v1570_v3 }
 0x507   : > { %3288 = vmatmul.msk.bf16.vlgmr.msra.gmra.mxu1 %vm381_vm0, %v1572_v13 }
 0x584   : > { %v1598_v19 = vpop.f32.mrf.mxu1 }
 0x585   : > { %v1599_v15 = vadd.f32 %v1598_v19, %v1573_v1 }
 0x587   : > { %v1603_v20 = vadd.f32 %v1599_v15, %v3741_v49 }
 0x589   : > { %v1605_v22 = vsel %vm381_vm0, %v1603_v20, 0.0 }
 0x58a   : > { %1606 = vadd.xlane.f32.xlu1 %v1605_v22 }
 0x58c   : > { %v1600_v23 = vpop.f32.mrf.mxu1 }
 0x58d   : > { %v1601_v24 = vadd.f32 %v1600_v23, %v1573_v1 }
 0x58f   : > { %v1604_v25 = vadd.f32 %v1601_v24, %v3743_v50 }
 0x591   : > { %v1608_v26 = vsel %vm385_vm1, %v1604_v25, 0.0 }
 0x592   : > { %1609 = vadd.xlane.f32.xlu0 %v1608_v26 }
 0x5fd   : > { %v1607_v27 = vpop.xlane.xlu1 %1606 }
 0x5fe   : > { %v1611_v28 = vmul.f32 %v1607_v27, %v3721_v10 }
 0x600   : > { %v1613_v17 = vsub.f32 %v1603_v20, %v1611_v28  ;;  %v3403_v28 = vld [vmem:[%s4627_s9 + $0x18] sm:$0xff] }
 0x601   : > { %1774 = vmatpush.bf16.msra.mxu3 %v3403_v28 }
 0x602   : > { %v1615_v29 = vmul.f32 %v1613_v17, %v1613_v17 }
 0x604   : > { %v1617_v41 = vsel %vm381_vm0, %v1615_v29, 0.0 }
 0x605   : > { %v1610_v21 = vpop.xlane.xlu0 %1609  ;;  %1618 = vadd.xlane.f32.xlu2 %v1617_v41 }
 0x606   : > { %v1612_v49 = vmul.f32 %v1610_v21, %v3721_v10 }
 0x608   : > { %v1614_v30 = vsub.f32 %v1604_v25, %v1612_v49  ;;  %v3402_v49 = vld [vmem:[%s4627_s9 + $0x10] sm:$0xff] }
 0x609   : > { %1775 = vmatpush.bf16.msra.mxu3 %v3402_v49  ;;  %v3404_v49 = vld [vmem:[%s4621_s3 + $0x10] sm:$0xff] }
 0x60a   : > { %v1616_v31 = vmul.f32 %v1614_v30, %v1614_v30 }
 0x60c   : > { %v1620_v32 = vsel %vm385_vm1, %v1616_v31, 0.0 }
 0x60d   : > { %1621 = vadd.xlane.f32.xlu1 %v1620_v32 }
 0x678   : > { %v1619_v50 = vpop.xlane.xlu2 %1618 }
 0x679   : > { %v1623_v33 = vmul.f32 %v1619_v50, %v3721_v10 }
 0x67b   : > { %v1625_v34 = vadd.f32 1e-05, %v1623_v33 }
 0x67d   : > { %3554 = vrsqrt.f32 %v1625_v34  ;;  %vm1633_vm4 = vweird.f32 %v1625_v34 }
 0x680   : > { %v1622_v39 = vpop.xlane.xlu1 %1621 }
 0x681   : > { %v1624_v40 = vmul.f32 %v1622_v39, %v3721_v10 }
 0x683   : > { %v3555_v42 = vpop.eup %3554  ;;  %v1626_v45 = vadd.f32 1e-05, %v1624_v40 }
 0x684   : > { %v1628_v37 = vmul.f32 %v3555_v42, %v1625_v34  ;;  %vm1634_vm3 = vweird.f32 %v3555_v42  ;;  %v3401_v34 = vld [vmem:[%s4627_s9 + $0x8] sm:$0xff] }
 0x685   : > { %3556 = vrsqrt.f32 %v1626_v45  ;;  %vm1635_vm5 = vmor %vm1633_vm4, %vm1634_vm3  ;;  %vm1643_vm7 = vweird.f32 %v1626_v45  ;;  %1776 = vmatpush.bf16.msra.mxu3 %v3401_v34  ;;  %vm1766_vm3 = vcmask 523264  }
 0x686   : > { %v1629_v46 = vmul.f32 %v3555_v42, %v1628_v37 }
 0x688   : > { %v1630_v44 = vmul.f32 0.5, %v1629_v46 }
 0x68a   : > { %v1631_v47 = vsub.f32 1.5, %v1630_v44 }
 0x68b   : > { %v3557_v38 = vpop.eup %3556 }
 0x68c   : > { %v1632_v48 = vmul.f32 %v3555_v42, %v1631_v47  ;;  %v1638_v51 = vmul.f32 %v3557_v38, %v1626_v45  ;;  %vm1644_vm6 = vweird.f32 %v3557_v38  ;;  %v3400_v45 = vld [vmem:[%s4627_s9] sm:$0xff] }
 0x68d   : > { %vm1645_vm8 = vmor %vm1643_vm7, %vm1644_vm6  ;;  %1777 = vmatpush.bf16.msra.mxu3 %v3400_v45 }
 0x68e   : > { %v1639_v52 = vmul.f32 %v3557_v38, %v1638_v51  ;;  %v1636_v56 = vsel %vm1635_vm5, %v3555_v42, %v1632_v48 }
 0x68f   : > { %v1647_v58 = vmul.f32 %v1636_v56, %v1613_v17 }
 0x690   : > { %v1640_v57 = vmul.f32 0.5, %v1639_v52 }
 0x691   : > { %v1650_v62 = vmul.f32 %v1649_v55, %v1647_v58 }
 0x692   : > { %v1641_v53 = vsub.f32 1.5, %v1640_v57 }
 0x693   : > { %v4142_v0 = vadd.f32 %v1652_v54, %v1650_v62 }
 0x694   : > { %v1642_v59 = vmul.f32 %v3557_v38, %v1641_v53 }
 0x696   : > { %v1646_v60 = vsel %vm1645_vm8, %v3557_v38, %v1642_v59 }
 0x697   : > { %v1648_v43 = vmul.f32 %v1646_v60, %v1614_v30 }
 0x699   : > { %v1651_v63 = vmul.f32 %v1649_v55, %v1648_v43 }
 0x69b   : > { %v4144_v4 = vadd.f32 %v1652_v54, %v1651_v63 }
 0x69d   : > { %v1655_v5 = vpack.c.bf16 %v4144_v4, %v4142_v0 }
 0x69f   : > { %3297 = vmatmul.msk.bf16.vlgmr.msra.gmra.mxu2 %vm381_vm0, %v1655_v5 }
 0x722   : > { %v1683_v6 = vpop.f32.mrf.mxu2 }
 0x723   : > { %v4152_v7 = vadd.f32 %v3513_v11, %v1683_v6 }
 0x725   : > { %v1690_v8 = vmul.f32 0.70710677, %v4152_v7  ;;  %v1688_v43 = vmul.f32 0.5, %v4152_v7 }
 0x727   : > { %v1692_v9 = vand.u32 2147483647, %v1690_v8  ;;  %vm1730_vm13 = vcmp.lt.f32.partialorder %v1690_v8, 0.0 }
 0x729   : > { %v1694_v61 = vmul.f32 0.3275911, %v1692_v9  ;;  %v1718_v22 = vsub.f32 0.0, %v1692_v9 }
 0x72a   : > { %v1685_v12 = vpop.f32.mrf.mxu2 }
 0x72b   : > { %v1696_v3 = vadd.f32 1.0, %v1694_v61  ;;  %v1686_v13 = vadd.f32 %v3513_v11, %v1685_v12  ;;  %v1720_v26 = vmul.f32 %v1718_v22, %v1692_v9  ;;  %v1741_v61 = vperm.slane %v4121_v14, 3 }
 0x72d   : > { %3558 = vrcp.f32 %v1696_v3  ;;  %v1691_v1 = vmul.f32 0.70710677, %v1686_v13  ;;  %v1722_v41 = vmul.f32 1.442695, %v1720_v26  ;;  %v1689_v63 = vmul.f32 0.5, %v1686_v13 }
 0x72f   : > { %v1693_v19 = vand.u32 2147483647, %v1691_v1  ;;  %vm1731_vm14 = vcmp.lt.f32.partialorder %v1691_v1, 0.0 }
 0x731   : > { %v1695_v15 = vmul.f32 0.3275911, %v1693_v19  ;;  %v1719_v21 = vsub.f32 0.0, %v1693_v19 }
 0x733   : > { %v3559_v20 = vpop.eup %3558  ;;  %v1697_v23 = vadd.f32 1.0, %v1695_v15  ;;  %v1721_v33 = vmul.f32 %v1719_v21, %v1693_v19  ;;  %v3405_v21 = vld [vmem:[%s4621_s3 + $0x18] sm:$0xff] }
 0x734   : > { %v1700_v24 = vmul.f32 1.0614054, %v3559_v20  ;;  %1891 = vmatpush.bf16.msrb.mxu0 %v3405_v21 }
 0x735   : > { %3560 = vrcp.f32 %v1697_v23  ;;  %v1724_v42 = vmul.f32 1.442695, %v1721_v33 }
 0x736   : > { %v1702_v25 = vadd.f32 -1.4531521, %v1700_v24  ;;  %3562 = vpow2.f32 %v1722_v41 }
 0x737   : > { %3564 = vpow2.f32 %v1724_v42 }
 0x738   : > { %v1704_v27 = vmul.f32 %v3559_v20, %v1702_v25  ;;  %1892 = vmatpush.bf16.msrb.mxu0 %v3404_v49 }
 0x73a   : > { %v1706_v17 = vadd.f32 1.4214138, %v1704_v27 }
 0x73b   : > { %v3561_v29 = vpop.eup %3560 }
 0x73c   : > { %v1708_v30 = vmul.f32 %v3559_v20, %v1706_v17  ;;  %v1701_v31 = vmul.f32 1.0614054, %v3561_v29  ;;  %v3563_v44 = vpop.eup %3562 }
 0x73d   : > { %v3565_v53 = vpop.eup %3564 }
 0x73e   : > { %v1710_v32 = vadd.f32 -0.28449672, %v1708_v30  ;;  %v1703_v50 = vadd.f32 -1.4531521, %v1701_v31 }
 0x740   : > { %v1712_v35 = vmul.f32 %v3559_v20, %v1710_v32  ;;  %v1705_v36 = vmul.f32 %v3561_v29, %v1703_v50 }
 0x742   : > { %v1714_v39 = vadd.f32 0.2548296, %v1712_v35  ;;  %v1707_v40 = vadd.f32 1.4214138, %v1705_v36 }
 0x744   : > { %v1716_v37 = vmul.f32 %v3559_v20, %v1714_v39  ;;  %v1709_v46 = vmul.f32 %v3561_v29, %v1707_v40 }
 0x746   : > { %v1726_v47 = vmul.f32 %v3563_v44, %v1716_v37  ;;  %v1711_v38 = vadd.f32 -0.28449672, %v1709_v46 }
 0x748   : > { %v1728_v48 = vsub.f32 1.0, %v1726_v47  ;;  %v1713_v51 = vmul.f32 %v3561_v29, %v1711_v38  ;;  %v1830_v47 = vperm.slane %v4121_v14, 4 }
 0x74a   : > { %v1715_v52 = vadd.f32 0.2548296, %v1713_v51  ;;  %v1732_v56 = vsub.f32 0.0, %v1728_v48 }
 0x74c   : > { %v1717_v57 = vmul.f32 %v3561_v29, %v1715_v52  ;;  %v1734_v58 = vsel %vm1730_vm13, %v1732_v56, %v1728_v48  ;;  %v1833_v52 = vperm.slane %v4121_v14, 5 }
 0x74d   : > { %v1736_v54 = vadd.f32 1.0, %v1734_v58 }
 0x74e   : > { %v1727_v55 = vmul.f32 %v3565_v53, %v1717_v57 }
 0x74f   : > { %v1738_v11 = vmul.f32 %v1736_v54, %v1688_v43 }
 0x750   : > { %v1729_v59 = vsub.f32 1.0, %v1727_v55 }
 0x752   : > { %v1733_v60 = vsub.f32 0.0, %v1729_v59 }
 0x754   : > { %v1735_v62 = vsel %vm1731_vm14, %v1733_v60, %v1729_v59  ;;  %v3514_v60 = vld [vmem:[%s4622_s4 + $0x1] ss:$0 sm:$0xff] }
 0x755   : > { %v1737_v5 = vadd.f32 1.0, %v1735_v62 }
 0x757   : > { %v1739_v6 = vmul.f32 %v1737_v5, %v1689_v63 }
 0x759   : > { %v1740_v9 = vpack.c.bf16 %v1739_v6, %v1738_v11 }
 0x75b   : > { %3314 = vmatmul.msk.bf16.vlgmr.msra.gmra.mxu3 %vm1766_vm3, %v1740_v9 }
 0x7de   : > { %v1779_v12 = vpop.f32.mrf.mxu3 }
 0x7df   : > { %v1780_v8 = vadd.f32 %v1779_v12, %v1741_v61 }
 0x7e1   : > { %v1784_v3 = vadd.f32 %v1780_v8, %v4142_v0 }
 0x7e3   : > { %v1786_v19 = vsel %vm381_vm0, %v1784_v3, 0.0 }
 0x7e4   : > { %1787 = vadd.xlane.f32.xlu0 %v1786_v19 }
 0x7e6   : > { %v1781_v1 = vpop.f32.mrf.mxu3 }
 0x7e7   : > { %v1782_v15 = vadd.f32 %v1781_v1, %v1741_v61 }
 0x7e9   : > { %v1785_v7 = vadd.f32 %v1782_v15, %v4144_v4 }
 0x7eb   : > { %v1789_v13 = vsel %vm385_vm1, %v1785_v7, 0.0 }
 0x7ec   : > { %1790 = vadd.xlane.f32.xlu2 %v1789_v13 }
 0x857   : > { %v1788_v20 = vpop.xlane.xlu0 %1787 }
 0x858   : > { %v1792_v22 = vmul.f32 %v1788_v20, %v3721_v10 }
 0x85a   : > { %v1794_v23 = vsub.f32 %v1784_v3, %v1792_v22 }
 0x85c   : > { %v1796_v24 = vmul.f32 %v1794_v23, %v1794_v23 }
 0x85e   : > { %v1798_v25 = vsel %vm381_vm0, %v1796_v24, 0.0 }
 0x85f   : > { %v1791_v26 = vpop.xlane.xlu2 %1790  ;;  %1799 = vadd.xlane.f32.xlu1 %v1798_v25 }
 0x860   : > { %v1793_v0 = vmul.f32 %v1791_v26, %v3721_v10 }
 0x862   : > { %v1795_v27 = vsub.f32 %v1785_v7, %v1793_v0 }
 0x864   : > { %v1797_v28 = vmul.f32 %v1795_v27, %v1795_v27 }
 0x866   : > { %v1801_v17 = vsel %vm385_vm1, %v1797_v28, 0.0 }
 0x867   : > { %1802 = vadd.xlane.f32.xlu0 %v1801_v17 }
 0x8d2   : > { %v1800_v4 = vpop.xlane.xlu1 %1799 }
 0x8d3   : > { %v1804_v29 = vmul.f32 %v1800_v4, %v3721_v10 }
 0x8d5   : > { %v1806_v41 = vadd.f32 1e-05, %v1804_v29 }
 0x8d7   : > { %3566 = vrsqrt.f32 %v1806_v41  ;;  %vm1814_vm5 = vweird.f32 %v1806_v41 }
 0x8da   : > { %v1803_v30 = vpop.xlane.xlu0 %1802 }
 0x8db   : > { %v1805_v31 = vmul.f32 %v1803_v30, %v3721_v10 }
 0x8dd   : > { %v3567_v32 = vpop.eup %3566  ;;  %v1807_v50 = vadd.f32 1e-05, %v1805_v31 }
 0x8de   : > { %v1809_v33 = vmul.f32 %v3567_v32, %v1806_v41  ;;  %vm1815_vm4 = vweird.f32 %v3567_v32 }
 0x8df   : > { %3568 = vrsqrt.f32 %v1807_v50  ;;  %vm1816_vm6 = vmor %vm1814_vm5, %vm1815_vm4  ;;  %vm1824_vm8 = vweird.f32 %v1807_v50 }
 0x8e0   : > { %v1810_v34 = vmul.f32 %v3567_v32, %v1809_v33 }
 0x8e2   : > { %v1811_v35 = vmul.f32 0.5, %v1810_v34 }
 0x8e4   : > { %v1812_v36 = vsub.f32 1.5, %v1811_v35 }
 0x8e5   : > { %v3569_v39 = vpop.eup %3568 }
 0x8e6   : > { %v1813_v40 = vmul.f32 %v3567_v32, %v1812_v36  ;;  %v1819_v42 = vmul.f32 %v3569_v39, %v1807_v50  ;;  %vm1825_vm7 = vweird.f32 %v3569_v39 }
 0x8e7   : > { %vm1826_vm13 = vmor %vm1824_vm8, %vm1825_vm7 }
 0x8e8   : > { %v1820_v45 = vmul.f32 %v3569_v39, %v1819_v42  ;;  %v1817_v37 = vsel %vm1816_vm6, %v3567_v32, %v1813_v40 }
 0x8e9   : > { %v1828_v38 = vmul.f32 %v1817_v37, %v1794_v23 }
 0x8ea   : > { %v1821_v46 = vmul.f32 0.5, %v1820_v45 }
 0x8eb   : > { %v1831_v56 = vmul.f32 %v1830_v47, %v1828_v38 }
 0x8ec   : > { %v1822_v44 = vsub.f32 1.5, %v1821_v46 }
 0x8ed   : > { %v4188_v55 = vadd.f32 %v1833_v52, %v1831_v56 }
 0x8ee   : > { %v1823_v48 = vmul.f32 %v3569_v39, %v1822_v44 }
 0x8f0   : > { %v1827_v51 = vsel %vm1826_vm13, %v3569_v39, %v1823_v48 }
 0x8f1   : > { %v1829_v57 = vmul.f32 %v1827_v51, %v1795_v27 }
 0x8f3   : > { %v1832_v53 = vmul.f32 %v1830_v47, %v1829_v57 }
 0x8f5   : > { %v4190_v58 = vadd.f32 %v1833_v52, %v1832_v53 }
 0x8f7   : > { %v1866_v59 = vpack.c.bf16 %v4190_v58, %v4188_v55 }
 0x8f9   : > { %3346 = vmatmul.msk.bf16.vlgmr.msrb.gmra.mxu0 %vm381_vm0, %v1866_v59 }
 0x976   : > { %v1894_v54 = vpop.f32.mrf.mxu0 }
 0x977   : > { %v1895_v62 = vadd.f32 %v3514_v60, %v1894_v54 }
 0x979   : > { %1913 = vrot.lane.b32.xlu0 %v1895_v62, %s3634_s30  ;;  %1901 = vrot.lane.b32.xlu1 %v1895_v62, %s3637_s15  ;;  %v1969_v8 = vrot.slane %v1895_v62, 4 }
 0x97a   : > { %1925 = vrot.lane.b32.xlu2 %v1895_v62, %s3635_s11 }
 0x97e   : > { %v1896_v14 = vpop.f32.mrf.mxu0 }
 0x97f   : > { %v4201_v43 = vadd.f32 %v3514_v60, %v1896_v14 }
 0x981   : > { %1937 = vrot.lane.b32.xlu0 %v1895_v62, %s3639_s17  ;;  %1939 = vrot.lane.b32.xlu1 %v4201_v43, %s3639_s17  ;;  %v4222_v63 = vpack.i.bf16 %v4201_v43, %v1895_v62 }
 0x982   : > { %1919 = vrot.lane.b32.xlu2 %v1895_v62, %s3633_s29 }
 0x989   : > { %1931 = vrot.lane.b32.xlu0 %v1895_v62, %s3636_s12  ;;  %1915 = vrot.lane.b32.xlu1 %v4201_v43, %s3634_s30  ;;  %s4633_s30 = smov 16  }
 0x98a   : > { %1907 = vrot.lane.b32.xlu2 %v1895_v62, %s3638_s16 }
 0x991   : > { %1933 = vrot.lane.b32.xlu0 %v4201_v43, %s3636_s12  ;;  %1903 = vrot.lane.b32.xlu1 %v4201_v43, %s3637_s15 }
 0x992   : > { %1927 = vrot.lane.b32.xlu2 %v4201_v43, %s3635_s11  ;;  %s4634_s11 = smov 24  }
 0x999   : > { %1921 = vrot.lane.b32.xlu0 %v4201_v43, %s3633_s29  ;;  %s4632_s29 = smov 56  }
 0x99a   : > { %1909 = vrot.lane.b32.xlu2 %v4201_v43, %s3638_s16 }
 0x9a1   : > { %3476 = vrot.lane.b32.xlu0 %v4222_v63, %s3640_s18  ;;  %s375_s18 = scalar_lea.vmem %s4628_s10, %s4636_s14 }
 0x9d4   : > { %v1926_v5 = vpop.permute.xlu2 %1925 }
 0x9d5   : > { %v2005_v0 = vrot.slane %v1926_v5, 4 }
 0x9dc   : > { %v1920_v11 = vpop.permute.xlu2 %1919 }
 0x9dd   : > { %v1993_v34 = vrot.slane %v1920_v11, 4 }
 0x9e4   : > { %v1908_v6 = vpop.permute.xlu2 %1907 }
 0x9e5   : > { %v1967_v9 = vrot.slane %v1908_v6, 4  ;;  %v1970_v15 = vsel %vm573_vm9, %v1908_v6, %v1969_v8 }
 0x9e6   : > { %v1978_v24 = vperm.slane %v1970_v15, %v3779_v2 }
 0x9e7   : > { %v1968_v1 = vsel %vm573_vm9, %v1967_v9, %v1895_v62 }
 0x9e8   : > { %v1974_v23 = vperm.slane %v1968_v1, %v3779_v2  ;;  %v2029_v4 = vrot.slane %v1978_v24, 4 }
 0x9ea   : > { %v2017_v17 = vrot.slane %v1974_v23, 4 }
 0x9eb   : > { %v1914_v61 = vpop.permute.xlu0 %1913  ;;  %v1902_v12 = vpop.permute.xlu1 %1901 }
 0x9ec   : > { %v1979_v3 = vrot.slane %v1914_v61, 4  ;;  %v1981_v19 = vrot.slane %v1902_v12, 4  ;;  %v1928_v22 = vpop.permute.xlu2 %1927 }
 0x9ee   : > { %v1980_v7 = vsel %vm573_vm9, %v1979_v3, %v1902_v12  ;;  %v1982_v13 = vsel %vm573_vm9, %v1914_v61, %v1981_v19 }
 0x9ef   : > { %v1986_v20 = vperm.slane %v1980_v7, %v3779_v2  ;;  %v1990_v25 = vperm.slane %v1982_v13, %v3779_v2 }
 0x9f1   : > { %v2015_v27 = vrot.slane %v1986_v20, 4  ;;  %v2027_v29 = vrot.slane %v1990_v25, 4  ;;  %v2018_v49 = vsel %vm573_vm9, %v1986_v20, %v2017_v17  ;;  %v2030_v30 = vsel %vm573_vm9, %v1990_v25, %v2029_v4 }
 0x9f2   : > { %v2026_v35 = vperm.slane %v2018_v49, %v3785_v16  ;;  %v2038_v36 = vperm.slane %v2030_v30, %v3785_v16 }
 0x9f3   : > { %v1938_v26 = vpop.permute.xlu0 %1937  ;;  %v1940_v28 = vpop.permute.xlu1 %1939  ;;  %v2016_v31 = vsel %vm573_vm9, %v2015_v27, %v1974_v23  ;;  %v2028_v50 = vsel %vm573_vm9, %v2027_v29, %v1978_v24 }
 0x9f4   : > { %v2003_v41 = vrot.slane %v1938_v26, 4  ;;  %v2006_v21 = vsel %vm573_vm9, %v1938_v26, %v2005_v0  ;;  %v1910_v39 = vpop.permute.xlu2 %1909  ;;  %v2022_v40 = vperm.slane %v2016_v31, %v3785_v16  ;;  %v2034_v37 = vperm.slane %v2028_v50, %v3785_v16 }
 0x9f5   : > { %v2014_v33 = vperm.slane %v2006_v21, %v3779_v2  ;;  %v2153_v46 = vrot.slane %v1940_v28, 4  ;;  %v2135_v48 = vrot.slane %v1910_v39, 4  ;;  %v2069_v52 = vrot.slane %v2026_v35, 4 }
 0x9f6   : > { %v2004_v32 = vsel %vm573_vm9, %v2003_v41, %v1926_v5  ;;  %v2077_v56 = vrot.slane %v2038_v36, 4  ;;  %v2065_v14 = vrot.slane %v2022_v40, 4  ;;  %v2073_v5 = vrot.slane %v2034_v37, 4 }
 0x9f7   : > { %v2010_v42 = vperm.slane %v2004_v32, %v3779_v2  ;;  %v2051_v38 = vrot.slane %v2014_v33, 4  ;;  %v2154_v6 = vsel %vm573_vm9, %v2153_v46, %v1928_v22  ;;  %v4255_v61 = vsel %vm573_vm9, %v2135_v48, %v4201_v43 }
 0x9f8   : > { %v2158_v7 = vperm.slane %v2154_v6, %v3779_v2 }
 0x9f9   : > { %v2039_v59 = vrot.slane %v2010_v42, 4 }
 0x9fb   : > { %v1932_v45 = vpop.permute.xlu0 %1931  ;;  %v1916_v53 = vpop.permute.xlu1 %1915 }
 0x9fc   : > { %v1991_v44 = vrot.slane %v1932_v45, 4  ;;  %v1994_v47 = vsel %vm573_vm9, %v1932_v45, %v1993_v34  ;;  %v2141_v22 = vrot.slane %v1916_v53, 4 }
 0x9fd   : > { %v2002_v51 = vperm.slane %v1994_v47, %v3779_v2 }
 0x9fe   : > { %v1992_v57 = vsel %vm573_vm9, %v1991_v44, %v1920_v11 }
 0x9ff   : > { %v1998_v60 = vperm.slane %v1992_v57, %v3779_v2  ;;  %v2052_v54 = vsel %vm573_vm9, %v2051_v38, %v2002_v51  ;;  %v2053_v62 = vrot.slane %v2002_v51, 4  ;;  %v2140_v57 = vperm.slane %v4255_v61, %v3779_v2 }
 0xa00   : > { %v2058_v9 = vperm.slane %v2052_v54, %v3785_v16 }
 0xa01   : > { %v2040_v12 = vsel %vm573_vm9, %v2039_v59, %v1998_v60  ;;  %v2041_v11 = vrot.slane %v1998_v60, 4  ;;  %v2054_v8 = vsel %vm573_vm9, %v2014_v33, %v2053_v62  ;;  %v2165_v60 = vrot.slane %v2158_v7, 4 }
 0xa02   : > { %v2046_v3 = vperm.slane %v2040_v12, %v3785_v16  ;;  %v2062_v19 = vperm.slane %v2054_v8, %v3785_v16  ;;  %v2071_v1 = vrot.slane %v2058_v9, 4  ;;  %v2074_v15 = vsel %vm573_vm9, %v2058_v9, %v2073_v5 }
 0xa03   : > { %v2042_v13 = vsel %vm573_vm9, %v2010_v42, %v2041_v11  ;;  %v2225_v20 = vrot.slane %v2074_v15, 4  ;;  %v1934_v43 = vpop.permute.xlu0 %1933  ;;  %v1904_v42 = vpop.permute.xlu1 %1903 }
 0xa04   : > { %v2050_v23 = vperm.slane %v2042_v13, %v3785_v16  ;;  %v2063_v24 = vrot.slane %v2046_v3, 4  ;;  %v2066_v25 = vsel %vm573_vm9, %v2046_v3, %v2065_v14  ;;  %v2072_v26 = vsel %vm573_vm9, %v2071_v1, %v2034_v37 }
 0xa05   : > { %v2075_v0 = vrot.slane %v2062_v19, 4  ;;  %v2078_v27 = vsel %vm573_vm9, %v2062_v19, %v2077_v56  ;;  %v2201_v28 = vrot.slane %v2066_v25, 4  ;;  %v2213_v17 = vrot.slane %v2072_v26, 4 }
 0xa06   : > { %v2064_v4 = vsel %vm573_vm9, %v2063_v24, %v2022_v40  ;;  %v2067_v29 = vrot.slane %v2050_v23, 4  ;;  %v2070_v41 = vsel %vm573_vm9, %v2050_v23, %v2069_v52  ;;  %v2223_v21 = vrot.slane %v2078_v27, 4 }
 0xa07   : > { %v2076_v49 = vsel %vm573_vm9, %v2075_v0, %v2038_v36  ;;  %v2189_v30 = vrot.slane %v2064_v4, 4  ;;  %v2199_v31 = vrot.slane %v2070_v41, 4  ;;  %v2226_v32 = vsel %vm573_vm9, %v2078_v27, %v2225_v20 }
 0xa08   : > { %v2068_v50 = vsel %vm573_vm9, %v2067_v29, %v2026_v35  ;;  %v2211_v33 = vrot.slane %v2076_v49, 4  ;;  %v2214_v34 = vsel %vm573_vm9, %v2076_v49, %v2213_v17  ;;  %v2224_v39 = vsel %vm573_vm9, %v2223_v21, %v2074_v15 }
 0xa09   : > { %v2187_v45 = vrot.slane %v2068_v50, 4  ;;  %v2200_v40 = vsel %vm573_vm9, %v2199_v31, %v2066_v25  ;;  %v2222_v37 = vperm.slane %v2214_v34, %v3779_v2  ;;  %v2230_v46 = vperm.slane %v2224_v39, %v3779_v2 }
 0xa0a   : > { %v4279_v36 = vperm.slane %v2200_v40, %v3779_v2  ;;  %v2212_v44 = vsel %vm573_vm9, %v2211_v33, %v2072_v26  ;;  %v2234_v35 = vperm.slane %v2226_v32, %v3779_v2  ;;  %v2147_v47 = vrot.slane %v1934_v43, 4 }
 0xa0b   : > { %v2188_v38 = vsel %vm573_vm9, %v2187_v45, %v2064_v4  ;;  %v2218_v48 = vperm.slane %v2212_v44, %v3779_v2  ;;  %v2259_v51 = vrot.slane %v2230_v46, 4  ;;  %v2142_v52 = vsel %vm573_vm9, %v2141_v22, %v1904_v42  ;;  %v1922_v56 = vpop.permute.xlu0 %1921 }
 0xa0c   : > { %v2271_v53 = vrot.slane %v2234_v35, 4  ;;  %v2146_v59 = vperm.slane %v2142_v52, %v3779_v2  ;;  %v4290_v54 = vperm.slane %v2188_v38, %v3779_v2  ;;  %v2148_v62 = vsel %vm573_vm9, %v2147_v47, %v1922_v56 }
 0xa0d   : > { %v2190_v14 = vsel %vm573_vm9, %v2068_v50, %v2189_v30  ;;  %v2235_v5 = vrot.slane %v4279_v36, 4  ;;  %v2152_v9 = vperm.slane %v2148_v62, %v3779_v2  ;;  %v2260_v61 = vsel %vm573_vm9, %v2259_v51, %v2218_v48 }
 0xa0e   : > { %v2159_v6 = vrot.slane %v2146_v59, 4  ;;  %v2198_v12 = vperm.slane %v2190_v14, %v3779_v2  ;;  %v2202_v11 = vsel %vm573_vm9, %v2070_v41, %v2201_v28  ;;  %v2272_v8 = vsel %vm573_vm9, %v2271_v53, %v2222_v37 }
 0xa0f   : > { %v2273_v3 = vrot.slane %v2222_v37, 4  ;;  %v2261_v19 = vrot.slane %v2218_v48, 4  ;;  %v2166_v15 = vsel %vm573_vm9, %v2165_v60, %v2152_v9  ;;  %v2210_v7 = vperm.slane %v2202_v11, %v3779_v2 }
 0xa10   : > { %v2160_v1 = vsel %vm573_vm9, %v2159_v6, %v2140_v57  ;;  %v2170_v20 = vperm.slane %v2166_v15, %v3785_v16  ;;  %v2278_v22 = vperm.slane %v2272_v8, %v3785_v16  ;;  %v2249_v43 = vrot.slane %v2198_v12, 4 }
 0xa11   : > { %v2164_v13 = vperm.slane %v2160_v1, %v3785_v16  ;;  %v2247_v23 = vrot.slane %v2210_v7, 4  ;;  %v2274_v24 = vsel %vm573_vm9, %v2234_v35, %v2273_v3  ;;  %v2236_v25 = vsel %vm573_vm9, %v2235_v5, %v4290_v54 }
 0xa12   : > { %v2266_v26 = vperm.slane %v2260_v61, %v3785_v16  ;;  %v2171_v0 = vrot.slane %v2170_v20, 4  ;;  %v2291_v27 = vrot.slane %v2278_v22, 4  ;;  %v2250_v28 = vsel %vm573_vm9, %v2210_v7, %v2249_v43 }
 0xa13   : > { %v2282_v17 = vperm.slane %v2274_v24, %v3785_v16  ;;  %v2248_v4 = vsel %vm573_vm9, %v2247_v23, %v2198_v12  ;;  %v2258_v29 = vperm.slane %v2250_v28, %v3785_v16  ;;  %v2262_v41 = vsel %vm573_vm9, %v2230_v46, %v2261_v19 }
 0xa14   : > { %v2172_v21 = vsel %vm573_vm9, %v2171_v0, %v2164_v13  ;;  %v2254_v49 = vperm.slane %v2248_v4, %v3785_v16  ;;  %v2242_v33 = vperm.slane %v2236_v25, %v3785_v16  ;;  %v2283_v45 = vrot.slane %v2266_v26, 4 }
 0xa15   : > { %v2295_v30 = vrot.slane %v2282_v17, 4  ;;  %v2299_v31 = vrot.slane %v2172_v21, 4  ;;  %v2304_v32 = vperm.slane %v2172_v21, %v3779_v2  ;;  %v2297_v50 = vrot.slane %v2258_v29, 4 }
 0xa16   : > { %v2292_v34 = vsel %vm573_vm9, %v2291_v27, %v2254_v49  ;;  %v2293_v39 = vrot.slane %v2254_v49, 4  ;;  %v2237_v48 = vrot.slane %v4290_v54, 4  ;;  %v4328_v51 = vperm.slane %v2262_v41, %v3785_v16 }
 0xa17   : > { %v2296_v42 = vsel %vm573_vm9, %v2295_v30, %v2258_v29  ;;  %v2314_v40 = vperm.slane %v2304_v32, %v3785_v16  ;;  %v2300_v37 = vsel %vm573_vm9, 0.0, %v2299_v31  ;;  %v2429_v46 = vpack.c.bf16 %v2292_v34, %v2292_v34 }
 0xa18   : > { %v2308_v44 = vperm.slane %v2300_v37, %v3779_v2  ;;  %v2294_v35 = vsel %vm573_vm9, %v2278_v22, %v2293_v39  ;;  %v2433_v47 = vpack.c.bf16 %v2296_v42, %v2296_v42  ;;  %v2298_v38 = vsel %vm573_vm9, %v2282_v17, %v2297_v50 }
 0xa19   : > { %v2309_v52 = vrot.slane %v2304_v32, 4  ;;  %v2431_v57 = vpack.c.bf16 %v2294_v35, %v2294_v35  ;;  %v2284_v59 = vsel %vm573_vm9, %v2283_v45, %v2242_v33  ;;  %v2444_v60 = vunpack.c.l.b16 %v2429_v46 }
 0xa1a   : > { %v2324_v56 = vperm.slane %v2308_v44, %v3785_v16  ;;  %v2319_v53 = vrot.slane %v2308_v44, 4  ;;  %v2435_v62 = vpack.c.bf16 %v2298_v38, %v2298_v38  ;;  %v2414_v14 = vmul.f32 0.35355338, %v2314_v40 }
 0xa1b   : > { %v2285_v5 = vrot.slane %v2242_v33, 4  ;;  %v2504_v61 = vunpack.c.l.b16 %v2433_v47  ;;  %v2413_v11 = vmul.f32 0.35355338, %v2284_v59  ;;  %v2329_v3 = vrot.slane %v2314_v40, 4 }
 0xa1c   : > { %v2430_v6 = vpack.c.bf16 %v2324_v56, %v2324_v56  ;;  %v2333_v9 = vrot.slane %v2324_v56, 4  ;;  %v2320_v12 = vsel %vm573_vm9, 0.0, %v2319_v53  ;;  %v2474_v15 = vunpack.c.l.b16 %v2431_v57 }
 0xa1d   : > { %v2328_v54 = vperm.slane %v2320_v12, %v3785_v16  ;;  %v2286_v8 = vsel %vm573_vm9, %v2266_v26, %v2285_v5  ;;  %v2422_v7 = vpack.c.bf16 %v2414_v14, %v2414_v14  ;;  %v2534_v43 = vunpack.c.l.b16 %v2435_v62 }
 0xa1e   : > { %v2445_v19 = vunpack.c.l.b16 %v2430_v6  ;;  %v2334_v1 = vsel %vm573_vm9, 0.0, %v2333_v9  ;;  %v2330_v24 = vsel %vm573_vm9, 0.0, %v2329_v3  ;;  %v2415_v25 = vmul.f32 0.35355338, %v2286_v8 }
 0xa1f   : > { %v2432_v13 = vpack.c.bf16 %v2334_v1, %v2334_v1  ;;  %v2434_v20 = vpack.c.bf16 %v2328_v54, %v2328_v54  ;;  %v2335_v22 = vrot.slane %v2328_v54, 4  ;;  %v2238_v0 = vsel %vm573_vm9, %v4279_v36, %v2237_v48  ;;  %v3616_v1 = vld [vmem:[%s3910_s22] sm:$0xff] }
 0xa20   : > { %v2446_v23 = vpack.c.b16 %v2445_v19, %v2444_v60  ;;  %v2421_v17 = vpack.c.bf16 %v2413_v11, %v2413_v11  ;;  %v2440_v41 = vunpack.c.l.b16 %v2422_v7  ;;  %v2416_v21 = vmul.f32 0.35355338, %v2330_v24 }
 0xa21   : > { %v2475_v27 = vunpack.c.l.b16 %v2432_v13  ;;  %v2505_v28 = vunpack.c.l.b16 %v2434_v20  ;;  %v2336_v26 = vsel %vm573_vm9, 0.0, %v2335_v22  ;;  %v2246_v31 = vperm.slane %v2238_v0, %v3785_v16  ;;  %v3617_v20 = vld [vmem:[%s3910_s22 + $0x30] sm:$0xff] }
 0xa22   : > { %v2451_v4 = vsel %vm1053_vm10, %v2446_v23, 0  ;;  %v2436_v29 = vpack.c.bf16 %v2336_v26, %v2336_v26  ;;  %v2287_v32 = vrot.slane %v4328_v51, 4  ;;  %v2423_v33 = vpack.c.bf16 %v2415_v25, %v2415_v25  ;;  %v3618_v23 = vld [vmem:[%s3910_s22 + $0x10] sm:$0xff] }
 0xa23   : > { %2460 = vmatpush.bf16.xpose.msrb.mxu1 %v2451_v4  ;;  %v2476_v49 = vpack.c.b16 %v2475_v27, %v2474_v15  ;;  %v2506_v30 = vpack.c.b16 %v2505_v28, %v2504_v61  ;;  %v2424_v36 = vpack.c.bf16 %v2416_v21, %v2416_v21  ;;  %v2310_v34 = vsel %vm573_vm9, 0.0, %v2309_v52  ;;  %v3619_v28 = vld [vmem:[%s3910_s22 + $0x20] sm:$0xff] }
 0xa24   : > { %v2535_v50 = vunpack.c.l.b16 %v2436_v29  ;;  %v2288_v45 = vsel %vm573_vm9, %v2287_v32, %v2246_v31  ;;  %v2318_v40 = vperm.slane %v2310_v34, %v3785_v16  ;;  %v2439_v46 = vunpack.c.l.b16 %v2421_v17  ;;  %v3620_v29 = vld [vmem:[%s3910_s22 + $0x8] sm:$0x1]  ;;  %v3622_v32 = vld [vmem:[%s3910_s22 + $0x18] sm:$0x1] }
 0xa25   : > { %v2481_v39 = vsel %vm1053_vm10, %v2476_v49, 0  ;;  %v2511_v42 = vsel %vm1053_vm10, %v2506_v30, 0  ;;  %v2417_v44 = vmul.f32 0.35355338, %v2288_v45  ;;  %v2289_v35 = vrot.slane %v2246_v31, 4 }
 0xa26   : > { %2490 = vmatpush.bf16.xpose.msrb.mxu2 %v2481_v39  ;;  %2520 = vmatpush.bf16.xpose.msrb.mxu3 %v2511_v42  ;;  %v2536_v37 = vpack.c.b16 %v2535_v50, %v2534_v43  ;;  %v2470_v47 = vunpack.c.l.b16 %v2424_v36  ;;  %v2418_v38 = vmul.f32 0.35355338, %v2318_v40  ;;  %v2331_v48 = vrot.slane %v2318_v40, 4  ;;  %v3621_v49 = vld [vmem:[%s3910_s22 + $0x38] sm:$0x1] }
 0xa27   : > { %v2441_v52 = vpack.c.b16 %v2440_v41, %v2439_v46  ;;  %v2425_v57 = vpack.c.bf16 %v2417_v44, %v2417_v44  ;;  %v2290_v53 = vsel %vm573_vm9, %v4328_v51, %v2289_v35  ;;  %v2469_v59 = vunpack.c.l.b16 %v2423_v33  ;;  %v3623_v42 = vld [vmem:[%s3910_s22 + $0x28] sm:$0x1] }
 0xa28   : > { %v2541_v56 = vsel %vm1053_vm10, %v2536_v37, 0  ;;  %v2426_v60 = vpack.c.bf16 %v2418_v38, %v2418_v38  ;;  %v2332_v62 = vsel %vm573_vm9, 0.0, %v2331_v48  ;;  %v2419_v14 = vmul.f32 0.35355338, %v2290_v53  ;;  %v4381_v37 = vpop.permute.xlu0 %3476 }
 0xa29   : > { %2550 = vmatpush.bf16.xpose.msra.mxu0 %v2541_v56  ;;  %v2420_v5 = vmul.f32 0.35355338, %v2332_v62  ;;  %v2471_v6 = vpack.c.b16 %v2470_v47, %v2469_v59  ;;  %v2499_v9 = vunpack.c.l.b16 %v2425_v57 }
 0xa2a   : > { %3347 = vmatmul.msk.bf16.vlgmr.msrb.gmra.mxu1 %vm1053_vm10, %v2441_v52  ;;  %v2500_v12 = vunpack.c.l.b16 %v2426_v60  ;;  %v2427_v61 = vpack.c.bf16 %v2419_v14, %v2419_v14 }
 0xa2b   : > { %v2428_v54 = vpack.c.bf16 %v2420_v5, %v2420_v5 }
 0xa2c   : > { %v2501_v51 = vpack.c.b16 %v2500_v12, %v2499_v9  ;;  %v2529_v11 = vunpack.c.l.b16 %v2427_v61 }
 0xa2d   : > { %3348 = vmatmul.msk.bf16.vlgmr.msrb.gmra.mxu2 %vm1053_vm10, %v2471_v6  ;;  %v2530_v8 = vunpack.c.l.b16 %v2428_v54 }
 0xa2e   : > { %3349 = vmatmul.msk.bf16.vlgmr.msrb.gmra.mxu3 %vm1053_vm10, %v2501_v51 }
 0xa2f   : > { %v2531_v3 = vpack.c.b16 %v2530_v8, %v2529_v11 }
 0xa31   : > { %3350 = vmatmul.msk.bf16.vlgmr.msra.gmra.mxu0 %vm1053_vm10, %v2531_v3 }
 0xaa7   : > { %v2462_v19 = vpop.f32.mrf.mxu1 }
 0xaa8   : > { %v4357_v15 = vadd.f32 %v3616_v1, %v2462_v19 }
 0xaaa   : > { %v2557_v7 = vsel %vm1164_vm11, %v4357_v15, -inf }
 0xaab   : > { %2558 = vmax.xlane.f32.xlu1 %v2557_v7 }
 0xaae   : > { %v2552_v13 = vpop.f32.mrf.mxu0 }
 0xaaf   : > { %v2553_v22 = vadd.f32 %v3617_v20, %v2552_v13  ;;  %v2464_v27 = vpop.f32.mrf.mxu1 }
 0xab0   : > { %v2492_v43 = vpop.f32.mrf.mxu2  ;;  %v2465_v41 = vadd.f32 %v3620_v29, %v2464_v27 }
 0xab1   : > { %v2493_v24 = vadd.f32 %v3618_v23, %v2492_v43  ;;  %v2522_v25 = vpop.f32.mrf.mxu3  ;;  %v2575_v0 = vsel %vm1164_vm11, %v2553_v22, -inf }
 0xab2   : > { %v2523_v26 = vadd.f32 %v3619_v28, %v2522_v25  ;;  %2576 = vmax.xlane.f32.xlu2 %v2575_v0  ;;  %v2560_v33 = vsel %vm1168_vm12, %v2465_v41, -inf }
 0xab3   : > { %v2563_v17 = vsel %vm1164_vm11, %v2493_v24, -inf }
 0xab4   : > { %2564 = vmax.xlane.f32.xlu0 %v2563_v17  ;;  %v2569_v4 = vsel %vm1164_vm11, %v2523_v26, -inf }
 0xab5   : > { %2570 = vmax.xlane.f32.xlu1 %v2569_v4  ;;  %v3478_v4 = vunpack.i.l.bf16 %v4381_v37 }
 0xab6   : > { %v2554_v21 = vpop.f32.mrf.mxu0 }
 0xab7   : > { %v2555_v30 = vadd.f32 %v3621_v49, %v2554_v21 }
 0xab8   : > { %v2494_v31 = vpop.f32.mrf.mxu2 }
 0xab9   : > { %v2495_v50 = vadd.f32 %v3622_v32, %v2494_v31  ;;  %v2524_v36 = vpop.f32.mrf.mxu3  ;;  %v2578_v34 = vsel %vm1168_vm12, %v2555_v30, -inf }
 0xaba   : > { %2561 = vmax.xlane.f32.xlu2 %v2560_v33  ;;  %v2525_v45 = vadd.f32 %v3623_v42, %v2524_v36  ;;  %v2081_v33 = vrot.slane %v3478_v4, 4 }
 0xabb   : > { %v2566_v39 = vsel %vm1168_vm12, %v2495_v50, -inf }
 0xabc   : > { %2579 = vmax.xlane.f32.xlu0 %v2578_v34  ;;  %v2572_v40 = vsel %vm1168_vm12, %v2525_v45, -inf }
 0xabd   : > { %2567 = vmax.xlane.f32.xlu1 %v2566_v39 }
 0xac2   : > { %2573 = vmax.xlane.f32.xlu2 %v2572_v40 }
 0xad0   : > { %3491 = vrot.lane.b32.xlu0 %v4222_v63, %s3643_s23 }
 0xad6   : > { %3481 = vrot.lane.b32.xlu1 %v4222_v63, %s3644_s24 }
 0xada   : > { %3486 = vrot.lane.b32.xlu2 %v4222_v63, %s4632_s29 }
 0xb1e   : > { %v2559_v46 = vpop.xlane.xlu1 %2558 }
 0xb1f   : > { %v2581_v25 = vsub.f32 %v4357_v15, %v2559_v46 }
 0xb25   : > { %v2577_v44 = vpop.xlane.xlu2 %2576 }
 0xb26   : > { %v2587_v35 = vsub.f32 %v2553_v22, %v2577_v44  ;;  %v3479_v44 = vunpack.i.h.bf16 %v4381_v37 }
 0xb27   : > { %v2565_v47 = vpop.xlane.xlu0 %2564 }
 0xb28   : > { %v2583_v38 = vsub.f32 %v2493_v24, %v2565_v47  ;;  %v2601_v48 = vmul.f32 1.442695, %v2587_v35  ;;  %v2571_v56 = vpop.xlane.xlu1 %2570 }
 0xb29   : > { %v2585_v57 = vsub.f32 %v2523_v26, %v2571_v56 }
 0xb2a   : > { %v2593_v52 = vmul.f32 1.442695, %v2583_v38  ;;  %3570 = vpow2.f32 %v2601_v48 }
 0xb2b   : > { %v2597_v53 = vmul.f32 1.442695, %v2585_v57 }
 0xb2c   : > { %3572 = vpow2.f32 %v2593_v52 }
 0xb2d   : > { %v2562_v59 = vpop.xlane.xlu2 %2561  ;;  %3574 = vpow2.f32 %v2597_v53 }
 0xb2e   : > { %v2582_v63 = vsub.f32 %v2465_v41, %v2562_v59  ;;  %v2589_v41 = vmul.f32 1.442695, %v2581_v25 }
 0xb2f   : > { %v2580_v60 = vpop.xlane.xlu0 %2579 }
 0xb30   : > { %v2588_v62 = vsub.f32 %v2555_v30, %v2580_v60  ;;  %v4383_v14 = vpop.eup %3570  ;;  %v2591_v61 = vmul.f32 1.442695, %v2582_v63  ;;  %v2568_v54 = vpop.xlane.xlu1 %2567 }
 0xb31   : > { %v2623_v9 = vsel %vm1164_vm11, %v4383_v14, 0.0  ;;  %v2584_v3 = vsub.f32 %v2495_v50, %v2568_v54 }
 0xb32   : > { %v4385_v5 = vpop.eup %3572  ;;  %v2603_v6 = vmul.f32 1.442695, %v2588_v62  ;;  %2624 = vadd.xlane.f32.xlu0 %v2623_v9 }
 0xb33   : > { %v2611_v12 = vsel %vm1164_vm11, %v4385_v5, 0.0  ;;  %v4391_v11 = vpop.eup %3574  ;;  %v2595_v20 = vmul.f32 1.442695, %v2584_v3 }
 0xb34   : > { %3576 = vpow2.f32 %v2603_v6  ;;  %2612 = vadd.xlane.f32.xlu1 %v2611_v12  ;;  %v2617_v7 = vsel %vm1164_vm11, %v4391_v11, 0.0 }
 0xb35   : > { %v2574_v51 = vpop.xlane.xlu2 %2573  ;;  %3578 = vpow2.f32 %v2591_v61 }
 0xb36   : > { %v2586_v8 = vsub.f32 %v2525_v45, %v2574_v51 }
 0xb38   : > { %v2599_v19 = vmul.f32 1.442695, %v2586_v8 }
 0xb3a   : > { %v4393_v1 = vpop.eup %3576  ;;  %3580 = vpow2.f32 %v2599_v19  ;;  %2618 = vadd.xlane.f32.xlu0 %v2617_v7 }
 0xb3b   : > { %v2626_v13 = vsel %vm1168_vm12, %v4393_v1, 0.0  ;;  %v4399_v43 = vpop.eup %3578  ;;  %3582 = vpow2.f32 %v2595_v20 }
 0xb3c   : > { %2627 = vadd.xlane.f32.xlu1 %v2626_v13  ;;  %v2608_v27 = vsel %vm1168_vm12, %v4399_v43, 0.0  ;;  %3584 = vpow2.f32 %v2589_v41 }
 0xb3d   : > { %v3487_v22 = vpop.permute.xlu2 %3486 }
 0xb3e   : > { %v3488_v23 = vunpack.i.l.bf16 %v3487_v22  ;;  %v3489_v21 = vunpack.i.h.bf16 %v3487_v22 }
 0xb40   : > { %v4401_v24 = vpop.eup %3580  ;;  %v2093_v29 = vrot.slane %v3488_v23, 4 }
 0xb41   : > { %v2620_v0 = vsel %vm1168_vm12, %v4401_v24, 0.0  ;;  %v4409_v31 = vpop.eup %3582 }
 0xb42   : > { %v3492_v28 = vpop.permute.xlu0 %3491  ;;  %2621 = vadd.xlane.f32.xlu2 %v2620_v0  ;;  %2609 = vadd.xlane.f32.xlu0 %v2608_v27  ;;  %v2614_v39 = vsel %vm1168_vm12, %v4409_v31, 0.0  ;;  %v4424_v60 = vpop.eup %3584 }
 0xb43   : > { %v3494_v26 = vunpack.i.h.bf16 %v3492_v28  ;;  %v3493_v17 = vunpack.i.l.bf16 %v3492_v28  ;;  %v2605_v7 = vsel %vm1164_vm11, %v4424_v60, 0.0 }
 0xb45   : > { %v2179_v49 = vrot.slane %v3494_v26, 4  ;;  %v2091_v30 = vrot.slane %v3493_v17, 4  ;;  %v2094_v15 = vsel %vm573_vm9, %v3493_v17, %v2093_v29 }
 0xb46   : > { %v2102_v36 = vperm.slane %v2094_v15, %v3779_v2 }
 0xb47   : > { %v2092_v32 = vsel %vm573_vm9, %v2091_v30, %v3488_v23  ;;  %v2180_v50 = vsel %vm573_vm9, %v2179_v49, %v3489_v21 }
 0xb48   : > { %v3482_v34 = vpop.permute.xlu1 %3481  ;;  %v2098_v42 = vperm.slane %v2092_v32, %v3779_v2  ;;  %v2184_v45 = vperm.slane %v2180_v50, %v3779_v2  ;;  %v2115_v48 = vrot.slane %v2102_v36, 4 }
 0xb49   : > { %v3484_v40 = vunpack.i.h.bf16 %v3482_v34  ;;  %v3483_v46 = vunpack.i.l.bf16 %v3482_v34 }
 0xb4a   : > { %2615 = vadd.xlane.f32.xlu2 %v2614_v39  ;;  %v2103_v52 = vrot.slane %v2098_v42, 4  ;;  %v2185_v57 = vrot.slane %v2184_v45, 4 }
 0xb4b   : > { %v2173_v35 = vrot.slane %v3484_v40, 4  ;;  %v2079_v47 = vrot.slane %v3483_v46, 4  ;;  %v2082_v38 = vsel %vm573_vm9, %v3483_v46, %v2081_v33 }
 0xb4c   : > { %v2090_v56 = vperm.slane %v2082_v38, %v3779_v2 }
 0xb4d   : > { %v2174_v53 = vsel %vm573_vm9, %v2173_v35, %v3479_v44  ;;  %v2080_v59 = vsel %vm573_vm9, %v2079_v47, %v3478_v4 }
 0xb4e   : > { %v2178_v62 = vperm.slane %v2174_v53, %v3779_v2  ;;  %v2086_v63 = vperm.slane %v2080_v59, %v3779_v2  ;;  %v2116_v37 = vsel %vm573_vm9, %v2115_v48, %v2090_v56  ;;  %v2117_v6 = vrot.slane %v2090_v56, 4 }
 0xb4f   : > { %v2122_v9 = vperm.slane %v2116_v37, %v3785_v16 }
 0xb50   : > { %v2186_v12 = vsel %vm573_vm9, %v2185_v57, %v2178_v62  ;;  %v2104_v61 = vsel %vm573_vm9, %v2103_v52, %v2086_v63  ;;  %v2105_v54 = vrot.slane %v2086_v63, 4  ;;  %v2118_v51 = vsel %vm573_vm9, %v2102_v36, %v2117_v6 }
 0xb51   : > { %v2394_v8 = vperm.slane %v2186_v12, %v3785_v16  ;;  %v2110_v3 = vperm.slane %v2104_v61, %v3785_v16  ;;  %v2126_v19 = vperm.slane %v2118_v51, %v3785_v16  ;;  %v2131_v20 = vrot.slane %v2122_v9, 4 }
 0xb52   : > { %v2106_v13 = vsel %vm573_vm9, %v2098_v42, %v2105_v54  ;;  %2606 = vadd.xlane.f32.xlu2 %v2605_v7 }
 0xb53   : > { %v2398_v22 = vperm.slane %v2394_v8, %v3779_v2  ;;  %v2114_v23 = vperm.slane %v2106_v13, %v3785_v16  ;;  %v2133_v25 = vrot.slane %v2126_v19, 4  ;;  %v2127_v0 = vrot.slane %v2110_v3, 4 }
 0xb54   : > { %v2132_v26 = vsel %vm573_vm9, 0.0, %v2131_v20 }
 0xb55   : > { %v2129_v27 = vrot.slane %v2114_v23, 4  ;;  %v2399_v28 = vrot.slane %v2398_v22, 4  ;;  %v2134_v17 = vsel %vm573_vm9, 0.0, %v2133_v25  ;;  %v2348_v4 = vsel %vm573_vm9, %v2133_v25, %v2122_v9 }
 0xb56   : > { %v2352_v21 = vperm.slane %v2348_v4, %v3779_v2  ;;  %v2353_v49 = vrot.slane %v2134_v17, 4  ;;  %v2404_v50 = vperm.slane %v2398_v22, %v3785_v16  ;;  %v2128_v33 = vsel %vm573_vm9, 0.0, %v2127_v0 }
 0xb57   : > { %v2130_v29 = vsel %vm573_vm9, 0.0, %v2129_v27  ;;  %v2337_v41 = vsel %vm573_vm9, %v2129_v27, %v2110_v3  ;;  %v2400_v32 = vsel %vm573_vm9, 0.0, %v2399_v28 }
 0xb58   : > { %v2341_v30 = vperm.slane %v2337_v41, %v3779_v2  ;;  %v2342_v15 = vrot.slane %v2130_v29, 4  ;;  %v2354_v36 = vsel %vm573_vm9, %v2353_v49, %v2132_v26  ;;  %v2373_v34 = vrot.slane %v2352_v21, 4 }
 0xb59   : > { %v2408_v39 = vperm.slane %v2400_v32, %v3785_v16  ;;  %v2358_v45 = vperm.slane %v2354_v36, %v3779_v2  ;;  %v2409_v38 = vrot.slane %v2404_v50, 4  ;;  %v2654_v19 = vpack.c.bf16 %v2404_v50, %v2404_v50 }
 0xb5a   : > { %v2343_v42 = vsel %vm573_vm9, %v2342_v15, %v2128_v33  ;;  %v2361_v40 = vrot.slane %v2341_v30, 4 }
 0xb5b   : > { %v2347_v46 = vperm.slane %v2343_v42, %v3779_v2  ;;  %v2411_v44 = vrot.slane %v2408_v39, 4  ;;  %v2371_v35 = vrot.slane %v2358_v45, 4  ;;  %v2374_v47 = vsel %vm573_vm9, %v2358_v45, %v2373_v34 }
 0xb5c   : > { %v2382_v56 = vperm.slane %v2374_v47, %v3785_v16  ;;  %v2658_v6 = vpack.c.bf16 %v2408_v39, %v2408_v39  ;;  %v2410_v61 = vsel %vm573_vm9, 0.0, %v2409_v38 }
 0xb5d   : > { %v2362_v48 = vsel %vm573_vm9, %v2347_v46, %v2361_v40  ;;  %v2359_v52 = vrot.slane %v2347_v46, 4  ;;  %v2372_v53 = vsel %vm573_vm9, %v2371_v35, %v2352_v21  ;;  %v2412_v59 = vsel %vm573_vm9, 0.0, %v2411_v44 }
 0xb5e   : > { %v2370_v57 = vperm.slane %v2362_v48, %v3785_v16  ;;  %v2387_v62 = vrot.slane %v2382_v56, 4  ;;  %v2378_v37 = vperm.slane %v2372_v53, %v3785_v16  ;;  %v2660_v8 = vpack.c.bf16 %v2412_v59, %v2412_v59 }
 0xb5f   : > { %v2360_v63 = vsel %vm573_vm9, %v2359_v52, %v2341_v30  ;;  %v2656_v23 = vpack.c.bf16 %v2410_v61, %v2410_v61  ;;  %v2729_v0 = vunpack.c.l.b16 %v2658_v6  ;;  %v2669_v21 = vunpack.c.l.b16 %v2654_v19 }
 0xb60   : > { %v2366_v9 = vperm.slane %v2360_v63, %v3785_v16  ;;  %v2389_v12 = vrot.slane %v2370_v57, 4  ;;  %v2388_v54 = vsel %vm573_vm9, %v2387_v62, %v2370_v57  ;;  %v2383_v51 = vrot.slane %v2378_v37, 4 }
 0xb61   : > { %v2657_v3 = vpack.c.bf16 %v2388_v54, %v2388_v54  ;;  %v2759_v17 = vunpack.c.l.b16 %v2660_v8  ;;  %v2699_v15 = vunpack.c.l.b16 %v2656_v23 }
 0xb62   : > { %v2390_v7 = vsel %vm573_vm9, %v2382_v56, %v2389_v12  ;;  %v2385_v13 = vrot.slane %v2366_v9, 4  ;;  %v2384_v20 = vsel %vm573_vm9, %v2383_v51, %v2366_v9 }
 0xb63   : > { %v2659_v22 = vpack.c.bf16 %v2390_v7, %v2390_v7  ;;  %v2728_v25 = vunpack.c.l.b16 %v2657_v3  ;;  %v2653_v27 = vpack.c.bf16 %v2384_v20, %v2384_v20 }
 0xb64   : > { %v2386_v28 = vsel %vm573_vm9, %v2378_v37, %v2385_v13 }
 0xb65   : > { %v2758_v26 = vunpack.c.l.b16 %v2659_v22  ;;  %v2655_v4 = vpack.c.bf16 %v2386_v28, %v2386_v28  ;;  %v2730_v29 = vpack.c.b16 %v2729_v0, %v2728_v25  ;;  %v2668_v41 = vunpack.c.l.b16 %v2653_v27 }
 0xb67   : > { %v2760_v49 = vpack.c.b16 %v2759_v17, %v2758_v26  ;;  %v2698_v30 = vunpack.c.l.b16 %v2655_v4  ;;  %v2735_v32 = vand.u32 %v2730_v29, %v4031_v18  ;;  %v2670_v50 = vpack.c.b16 %v2669_v21, %v2668_v41 }
 0xb69   : > { %v2765_v33 = vand.u32 %v2760_v49, %v4031_v18  ;;  %v2700_v36 = vpack.c.b16 %v2699_v15, %v2698_v30  ;;  %2744 = vmatpush.bf16.msra.mxu3 %v2735_v32  ;;  %v2675_v34 = vand.u32 %v2670_v50, %v4031_v18 }
 0xb6b   : > { %2774 = vmatpush.bf16.msrb.mxu0 %v2765_v33  ;;  %v2705_v39 = vand.u32 %v2700_v36, %v4031_v18  ;;  %2684 = vmatpush.bf16.msra.mxu1 %v2675_v34 }
 0xb6d   : > { %2714 = vmatpush.bf16.msra.mxu2 %v2705_v39 }
 0xba5   : > { %v2625_v42 = vpop.xlane.xlu0 %2624 }
 0xba6   : > { %3586 = vrcp.f32 %v2625_v42 }
 0xba7   : > { %v2613_v45 = vpop.xlane.xlu1 %2612 }
 0xbac   : > { %v3587_v44 = vpop.eup %3586 }
 0xbad   : > { %v2619_v40 = vpop.xlane.xlu0 %2618  ;;  %v2643_v35 = vmul.f32 %v3587_v44, %v4383_v14 }
 0xbaf   : > { %v2628_v46 = vpop.xlane.xlu1 %2627  ;;  %v2651_v56 = vpack.c.bf16 %v2643_v35, %v2643_v35 }
 0xbb0   : > { %3588 = vrcp.f32 %v2628_v46 }
 0xbb1   : > { %3590 = vrcp.f32 %v2619_v40  ;;  %v2753_v53 = vunpack.c.l.b16 %v2651_v56 }
 0xbb5   : > { %v2622_v38 = vpop.xlane.xlu2 %2621  ;;  %v2610_v9 = vpop.xlane.xlu0 %2609 }
 0xbb6   : > { %v3589_v47 = vpop.eup %3588  ;;  %3592 = vrcp.f32 %v2622_v38 }
 0xbb7   : > { %v3591_v48 = vpop.eup %3590  ;;  %v2644_v52 = vmul.f32 %v3589_v47, %v4393_v1  ;;  %3594 = vrcp.f32 %v2613_v45 }
 0xbb8   : > { %v2641_v57 = vmul.f32 %v3591_v48, %v4391_v11 }
 0xbb9   : > { %v2652_v18 = vpack.c.bf16 %v2644_v52, %v2644_v52 }
 0xbba   : > { %v2649_v37 = vpack.c.bf16 %v2641_v57, %v2641_v57 }
 0xbbb   : > { %v2754_v59 = vunpack.c.l.b16 %v2652_v18 }
 0xbbc   : > { %v3593_v62 = vpop.eup %3592  ;;  %v2723_v54 = vunpack.c.l.b16 %v2649_v37 }
 0xbbd   : > { %v2755_v63 = vpack.c.b16 %v2754_v59, %v2753_v53  ;;  %v2642_v6 = vmul.f32 %v3593_v62, %v4401_v24  ;;  %v2616_v14 = vpop.xlane.xlu2 %2615  ;;  %v3595_v12 = vpop.eup %3594 }
 0xbbe   : > { %3596 = vrcp.f32 %v2616_v14  ;;  %v2639_v1 = vmul.f32 %v3595_v12, %v4385_v5 }
 0xbbf   : > { %3354 = vmatmul.msk.bf16.vlgmr.msrb.gmra.mxu0 %vm1164_vm11, %v2755_v63  ;;  %v2650_v61 = vpack.c.bf16 %v2642_v6, %v2642_v6  ;;  %3598 = vrcp.f32 %v2610_v9 }
 0xbc0   : > { %v2647_v3 = vpack.c.bf16 %v2639_v1, %v2639_v1 }
 0xbc1   : > { %v2724_v51 = vunpack.c.l.b16 %v2650_v61 }
 0xbc2   : > { %v2693_v20 = vunpack.c.l.b16 %v2647_v3 }
 0xbc3   : > { %v2725_v11 = vpack.c.b16 %v2724_v51, %v2723_v54 }
 0xbc4   : > { %v3597_v8 = vpop.eup %3596 }
 0xbc5   : > { %v2640_v19 = vmul.f32 %v3597_v8, %v4409_v31  ;;  %v2607_v7 = vpop.xlane.xlu2 %2606  ;;  %3353 = vmatmul.msk.bf16.vlgmr.msra.gmra.mxu3 %vm1164_vm11, %v2725_v11  ;;  %v3599_v24 = vpop.eup %3598 }
 0xbc6   : > { %3600 = vrcp.f32 %v2607_v7  ;;  %v2638_v22 = vmul.f32 %v3599_v24, %v4399_v43 }
 0xbc7   : > { %v2648_v13 = vpack.c.bf16 %v2640_v19, %v2640_v19 }
 0xbc8   : > { %v2646_v5 = vpack.c.bf16 %v2638_v22, %v2638_v22 }
 0xbc9   : > { %v2694_v23 = vunpack.c.l.b16 %v2648_v13 }
 0xbca   : > { %v2664_v26 = vunpack.c.l.b16 %v2646_v5 }
 0xbcb   : > { %v2695_v25 = vpack.c.b16 %v2694_v23, %v2693_v20 }
 0xbcc   : > { %v3601_v0 = vpop.eup %3600 }
 0xbcd   : > { %v2637_v27 = vmul.f32 %v3601_v0, %v4424_v60  ;;  %3352 = vmatmul.msk.bf16.vlgmr.msra.gmra.mxu2 %vm1164_vm11, %v2695_v25 }
 0xbcf   : > { %v2645_v28 = vpack.c.bf16 %v2637_v27, %v2637_v27 }
 0xbd1   : > { %v2663_v31 = vunpack.c.l.b16 %v2645_v28 }
 0xbd3   : > { %v2665_v17 = vpack.c.b16 %v2664_v26, %v2663_v31 }
 0xbd5   : > { %3351 = vmatmul.msk.bf16.vlgmr.msra.gmra.mxu1 %vm1164_vm11, %v2665_v17 }
 0xc3c   : > { %v2776_v4 = vpop.f32.mrf.mxu0 }
 0xc3d   : > { %v2793_v41 = vrot.slane %v2776_v4, 4 }
 0xc44   : > { %v2778_v36 = vpop.f32.mrf.mxu0 }
 0xc45   : > { %v2843_v47 = vrot.slane %v2778_v36, 4 }
 0xc48   : > { %v2746_v29 = vpop.f32.mrf.mxu3 }
 0xc49   : > { %v2781_v49 = vrot.slane %v2746_v29, 4 }
 0xc50   : > { %v2716_v21 = vpop.f32.mrf.mxu2  ;;  %v2748_v38 = vpop.f32.mrf.mxu3 }
 0xc51   : > { %v2794_v43 = vsel %vm573_vm9, %v2793_v41, %v2716_v21  ;;  %v2795_v30 = vrot.slane %v2716_v21, 4  ;;  %v2837_v63 = vrot.slane %v2748_v38, 4 }
 0xc52   : > { %v2800_v15 = vperm.slane %v2794_v43, %v3779_v2  ;;  %v2686_v32 = vpop.f32.mrf.mxu1 }
 0xc53   : > { %v2796_v60 = vsel %vm573_vm9, %v2776_v4, %v2795_v30  ;;  %v2782_v50 = vsel %vm573_vm9, %v2781_v49, %v2686_v32  ;;  %v2783_v33 = vrot.slane %v2686_v32, 4 }
 0xc54   : > { %v2804_v34 = vperm.slane %v2796_v60, %v3779_v2  ;;  %v2805_v39 = vrot.slane %v2800_v15, 4  ;;  %v2788_v42 = vperm.slane %v2782_v50, %v3779_v2 }
 0xc55   : > { %v2784_v45 = vsel %vm573_vm9, %v2746_v29, %v2783_v33 }
 0xc56   : > { %v2817_v40 = vrot.slane %v2804_v34, 4  ;;  %v2792_v46 = vperm.slane %v2784_v45, %v3779_v2  ;;  %v2806_v44 = vsel %vm573_vm9, %v2805_v39, %v2788_v42  ;;  %v2807_v35 = vrot.slane %v2788_v42, 4 }
 0xc57   : > { %v2812_v48 = vperm.slane %v2806_v44, %v3785_v16 }
 0xc58   : > { %v2808_v56 = vsel %vm573_vm9, %v2800_v15, %v2807_v35  ;;  %v2818_v52 = vsel %vm573_vm9, %v2817_v40, %v2792_v46  ;;  %v2819_v18 = vrot.slane %v2792_v46, 4  ;;  %v2718_v57 = vpop.f32.mrf.mxu2 }
 0xc59   : > { %v2816_v53 = vperm.slane %v2808_v56, %v3785_v16  ;;  %v2824_v59 = vperm.slane %v2818_v52, %v3785_v16  ;;  %v2844_v62 = vsel %vm573_vm9, %v2843_v47, %v2718_v57  ;;  %v2829_v12 = vrot.slane %v2812_v48, 4 }
 0xc5a   : > { %v2820_v37 = vsel %vm573_vm9, %v2804_v34, %v2819_v18  ;;  %v2848_v6 = vperm.slane %v2844_v62, %v3779_v2  ;;  %v2688_v9 = vpop.f32.mrf.mxu1  ;;  %v3407_v62 = vld [vmem:[%s4623_s5 + $0x18] sm:$0xff] }
 0xc5b   : > { %v2828_v14 = vperm.slane %v2820_v37, %v3785_v16  ;;  %v2831_v61 = vrot.slane %v2816_v53, 4  ;;  %v2838_v54 = vsel %vm573_vm9, %v2837_v63, %v2688_v9  ;;  %v2833_v11 = vrot.slane %v2824_v59, 4  ;;  %2980 = vmatpush.bf16.msrb.mxu1 %v3407_v62  ;;  %v3406_v63 = vld [vmem:[%s4623_s5 + $0x10] sm:$0xff] }
 0xc5c   : > { %v2849_v1 = vrot.slane %v2848_v6, 4  ;;  %v2842_v24 = vperm.slane %v2838_v54, %v3779_v2  ;;  %v2830_v13 = vsel %vm573_vm9, 0.0, %v2829_v12 }
 0xc5d   : > { %v2832_v51 = vsel %vm573_vm9, 0.0, %v2831_v61  ;;  %v2835_v8 = vrot.slane %v2828_v14, 4  ;;  %v2851_v3 = vsel %vm573_vm9, %v2831_v61, %v2812_v48  ;;  %v2834_v27 = vsel %vm573_vm9, 0.0, %v2833_v11 }
 0xc5e   : > { %v2855_v19 = vperm.slane %v2851_v3, %v3779_v2  ;;  %v2856_v7 = vrot.slane %v2832_v51, 4  ;;  %v2850_v0 = vsel %vm573_vm9, %v2849_v1, %v2842_v24 }
 0xc5f   : > { %v2836_v20 = vsel %vm573_vm9, 0.0, %v2835_v8  ;;  %v2862_v22 = vsel %vm573_vm9, %v2835_v8, %v2824_v59  ;;  %v2908_v26 = vperm.slane %v2850_v0, %v3785_v16  ;;  %2981 = vmatpush.bf16.msrb.mxu1 %v3406_v63 }
 0xc60   : > { %v2857_v23 = vsel %vm573_vm9, %v2856_v7, %v2830_v13  ;;  %v2867_v25 = vrot.slane %v2836_v20, 4  ;;  %v2866_v5 = vperm.slane %v2862_v22, %v3779_v2  ;;  %v2875_v31 = vrot.slane %v2855_v19, 4  ;;  %v4557_v20 = vld [vmem:[%s4624_s6 + $0x8] sm:$0x3f] }
 0xc61   : > { %v2861_v28 = vperm.slane %v2857_v23, %v3779_v2  ;;  %v2912_v29 = vperm.slane %v2908_v26, %v3779_v2  ;;  %v2958_v22 = vperm.slane %v4557_v20, 0 }
 0xc62   : > { %v2868_v17 = vsel %vm573_vm9, %v2867_v25, %v2834_v27  ;;  %v2887_v4 = vrot.slane %v2866_v5, 4 }
 0xc63   : > { %v2872_v41 = vperm.slane %v2868_v17, %v3779_v2  ;;  %v2873_v21 = vrot.slane %v2861_v28, 4  ;;  %v2876_v49 = vsel %vm573_vm9, %v2861_v28, %v2875_v31  ;;  %v2918_v32 = vperm.slane %v2912_v29, %v3785_v16 }
 0xc64   : > { %v2884_v43 = vperm.slane %v2876_v49, %v3785_v16  ;;  %v2913_v36 = vrot.slane %v2912_v29, 4 }
 0xc65   : > { %v2874_v30 = vsel %vm573_vm9, %v2873_v21, %v2855_v19  ;;  %v2885_v15 = vrot.slane %v2872_v41, 4  ;;  %v2888_v60 = vsel %vm573_vm9, %v2872_v41, %v2887_v4  ;;  %v2923_v2 = vrot.slane %v2918_v32, 4 }
 0xc66   : > { %v2880_v50 = vperm.slane %v2874_v30, %v3785_v16  ;;  %v2896_v33 = vperm.slane %v2888_v60, %v3785_v16  ;;  %v2914_v40 = vsel %vm573_vm9, 0.0, %v2913_v36  ;;  %v2903_v44 = vrot.slane %v2884_v43, 4 }
 0xc67   : > { %v2886_v34 = vsel %vm573_vm9, %v2885_v15, %v2866_v5  ;;  %v2922_v46 = vperm.slane %v2914_v40, %v3785_v16  ;;  %v2924_v38 = vsel %vm573_vm9, 0.0, %v2923_v2 }
 0xc68   : > { %v2892_v39 = vperm.slane %v2886_v34, %v3785_v16  ;;  %v2899_v42 = vrot.slane %v2880_v50, 4  ;;  %v2901_v45 = vrot.slane %v2896_v33, 4  ;;  %v2904_v53 = vsel %vm573_vm9, %v2896_v33, %v2903_v44  ;;  %v3408_v33 = vld [vmem:[%s4625_s7 + $0x10] sm:$0xff] }
 0xc69   : > { %v2925_v18 = vrot.slane %v2922_v46, 4 }
 0xc6a   : > { %v2897_v35 = vrot.slane %v2892_v39, 4  ;;  %v2900_v47 = vsel %vm573_vm9, %v2892_v39, %v2899_v42  ;;  %v2902_v48 = vsel %vm573_vm9, %v2901_v45, %v2884_v43 }
 0xc6b   : > { %v3495_v56 = vpack.i.bf16 %v2924_v38, %v2900_v47  ;;  %v3500_v52 = vpack.i.bf16 %v2922_v46, %v2902_v48  ;;  %v2926_v16 = vsel %vm573_vm9, 0.0, %v2925_v18  ;;  %v3034_v18 = vperm.slane %v4557_v20, 1 }
 0xc6c   : > { %v2898_v57 = vsel %vm573_vm9, %v2897_v35, %v2880_v50  ;;  %v3505_v59 = vpack.i.bf16 %v2926_v16, %v2904_v53  ;;  %v3409_v50 = vld [vmem:[%s4625_s7 + $0x18] sm:$0xff] }
 0xc6d   : > { %3496 = vrot.lane.b32.xlu1 %v3495_v56, %s3647_s26  ;;  %3501 = vrot.lane.b32.xlu2 %v3500_v52, %s4633_s30 }
 0xc6e   : > { %3506 = vrot.lane.b32.xlu0 %v3505_v59, %s4634_s11  ;;  %3065 = vmatpush.bf16.msrb.mxu2 %v3409_v50  ;;  %v3037_v59 = vperm.slane %v4557_v20, 2 }
 0xc72   : > { %3066 = vmatpush.bf16.msrb.mxu2 %v3408_v33 }
 0xcc7   : > { %v3502_v37 = vpop.permute.xlu2 %3501 }
 0xcc8   : > { %v3504_v12 = vunpack.i.h.bf16 %v3502_v37  ;;  %v3503_v61 = vunpack.i.l.bf16 %v3502_v37 }
 0xcdf   : > { %v3497_v6 = vpop.permute.xlu1 %3496 }
 0xce0   : > { %v3499_v9 = vunpack.i.h.bf16 %v3497_v6  ;;  %v3498_v14 = vunpack.i.l.bf16 %v3497_v6  ;;  %v3507_v51 = vpop.permute.xlu0 %3506 }
 0xce1   : > { %v3509_v3 = vunpack.i.h.bf16 %v3507_v51  ;;  %v3508_v19 = vunpack.i.l.bf16 %v3507_v51 }
 0xce2   : > { %v2952_v1 = vsel %vm1053_vm10, %v2918_v32, %v3499_v9  ;;  %v2951_v54 = vsel %vm1053_vm10, %v2898_v57, %v3498_v14 }
 0xce3   : > { %v2953_v11 = vsel %vm1566_vm15, %v2951_v54, %v3503_v61  ;;  %v2954_v8 = vsel %vm1566_vm15, %v2952_v1, %v3504_v12  ;;  %v3515_v12 = vld [vmem:[%s4626_s8 + $0x1] ss:$0 sm:$0xff] }
 0xce4   : > { %v2956_v7 = vsel %vm1569_vm2, %v2954_v8, %v3509_v3  ;;  %v2955_v24 = vsel %vm1569_vm2, %v2953_v11, %v3508_v19 }
 0xce5   : > { %v2957_v13 = vpack.c.bf16 %v2956_v7, %v2955_v24 }
 0xce7   : > { %3363 = vmatmul.msk.bf16.vlgmr.msrb.gmra.mxu1 %vm381_vm0, %v2957_v13 }
 0xd64   : > { %v2983_v23 = vpop.f32.mrf.mxu1 }
 0xd65   : > { %v2984_v25 = vadd.f32 %v2983_v23, %v2958_v22 }
 0xd67   : > { %v2988_v0 = vadd.f32 %v2984_v25, %v4188_v55 }
 0xd69   : > { %v2990_v5 = vsel %vm381_vm0, %v2988_v0, 0.0 }
 0xd6a   : > { %2991 = vadd.xlane.f32.xlu1 %v2990_v5 }
 0xd6c   : > { %v2985_v27 = vpop.f32.mrf.mxu1 }
 0xd6d   : > { %v2986_v28 = vadd.f32 %v2985_v27, %v2958_v22 }
 0xd6f   : > { %v2989_v26 = vadd.f32 %v2986_v28, %v4190_v58 }
 0xd71   : > { %v2993_v31 = vsel %vm385_vm1, %v2989_v26, 0.0 }
 0xd72   : > { %2994 = vadd.xlane.f32.xlu0 %v2993_v31 }
 0xddd   : > { %v2992_v17 = vpop.xlane.xlu1 %2991 }
 0xdde   : > { %v2996_v4 = vmul.f32 %v2992_v17, %v3721_v10 }
 0xde0   : > { %v2998_v29 = vsub.f32 %v2988_v0, %v2996_v4 }
 0xde2   : > { %v3000_v41 = vmul.f32 %v2998_v29, %v2998_v29 }
 0xde4   : > { %v3002_v21 = vsel %vm381_vm0, %v3000_v41, 0.0  ;;  %v3412_v41 = vld [vmem:[%s4627_s9 + $0x30] sm:$0xff] }
 0xde5   : > { %v2995_v49 = vpop.xlane.xlu0 %2994  ;;  %3003 = vadd.xlane.f32.xlu2 %v3002_v21 }
 0xde6   : > { %v2997_v55 = vmul.f32 %v2995_v49, %v3721_v10 }
 0xde8   : > { %v2999_v43 = vsub.f32 %v2989_v26, %v2997_v55  ;;  %v3413_v26 = vld [vmem:[%s4627_s9 + $0x38] sm:$0xff] }
 0xde9   : > { %3158 = vmatpush.bf16.msrb.mxu3 %v3413_v26 }
 0xdea   : > { %v3001_v30 = vmul.f32 %v2999_v43, %v2999_v43 }
 0xdec   : > { %v3005_v15 = vsel %vm385_vm1, %v3001_v30, 0.0 }
 0xded   : > { %3006 = vadd.xlane.f32.xlu1 %v3005_v15  ;;  %3159 = vmatpush.bf16.msrb.mxu3 %v3412_v41  ;;  %v3411_v15 = vld [vmem:[%s4627_s9 + $0x28] sm:$0xff] }
 0xdf1   : > { %3160 = vmatpush.bf16.msrb.mxu3 %v3411_v15 }
 0xe58   : > { %v3004_v58 = vpop.xlane.xlu2 %3003 }
 0xe59   : > { %v3008_v32 = vmul.f32 %v3004_v58, %v3721_v10 }
 0xe5b   : > { %v3010_v60 = vadd.f32 1e-05, %v3008_v32 }
 0xe5d   : > { %3602 = vrsqrt.f32 %v3010_v60  ;;  %vm3018_vm10 = vweird.f32 %v3010_v60 }
 0xe60   : > { %v3007_v36 = vpop.xlane.xlu1 %3006 }
 0xe61   : > { %v3009_v34 = vmul.f32 %v3007_v36, %v3721_v10  ;;  %v3410_v36 = vld [vmem:[%s4627_s9 + $0x20] sm:$0xff] }
 0xe62   : > { %3161 = vmatpush.bf16.msrb.mxu3 %v3410_v36 }
 0xe63   : > { %v3603_v2 = vpop.eup %3602  ;;  %v3011_v39 = vadd.f32 1e-05, %v3009_v34 }
 0xe64   : > { %v3013_v42 = vmul.f32 %v3603_v2, %v3010_v60  ;;  %vm3019_vm9 = vweird.f32 %v3603_v2 }
 0xe65   : > { %3604 = vrsqrt.f32 %v3011_v39  ;;  %vm3020_vm11 = vmor %vm3018_vm10, %vm3019_vm9  ;;  %vm3028_vm15 = vweird.f32 %v3011_v39 }
 0xe66   : > { %v3014_v45 = vmul.f32 %v3603_v2, %v3013_v42 }
 0xe68   : > { %v3015_v40 = vmul.f32 0.5, %v3014_v45 }
 0xe6a   : > { %v3016_v46 = vsub.f32 1.5, %v3015_v40 }
 0xe6b   : > { %v3605_v44 = vpop.eup %3604 }
 0xe6c   : > { %v3017_v35 = vmul.f32 %v3603_v2, %v3016_v46  ;;  %v3023_v47 = vmul.f32 %v3605_v44, %v3011_v39  ;;  %vm3029_vm12 = vweird.f32 %v3605_v44 }
 0xe6d   : > { %vm3030_vm2 = vmor %vm3028_vm15, %vm3029_vm12 }
 0xe6e   : > { %v3024_v38 = vmul.f32 %v3605_v44, %v3023_v47  ;;  %v3021_v48 = vsel %vm3020_vm11, %v3603_v2, %v3017_v35 }
 0xe6f   : > { %v3032_v57 = vmul.f32 %v3021_v48, %v2998_v29 }
 0xe70   : > { %v3025_v56 = vmul.f32 0.5, %v3024_v38 }
 0xe71   : > { %v3035_v62 = vmul.f32 %v3034_v18, %v3032_v57 }
 0xe72   : > { %v3026_v52 = vsub.f32 1.5, %v3025_v56 }
 0xe73   : > { %v4578_v6 = vadd.f32 %v3037_v59, %v3035_v62 }
 0xe74   : > { %v3027_v53 = vmul.f32 %v3605_v44, %v3026_v52 }
 0xe76   : > { %v3031_v16 = vsel %vm3030_vm2, %v3605_v44, %v3027_v53 }
 0xe77   : > { %v3033_v63 = vmul.f32 %v3031_v16, %v2999_v43 }
 0xe79   : > { %v3036_v37 = vmul.f32 %v3034_v18, %v3033_v63 }
 0xe7b   : > { %v3039_v9 = vadd.f32 %v3037_v59, %v3036_v37 }
 0xe7d   : > { %v3040_v14 = vpack.c.bf16 %v3039_v9, %v4578_v6 }
 0xe7f   : > { %3372 = vmatmul.msk.bf16.vlgmr.msrb.gmra.mxu2 %vm381_vm0, %v3040_v14  ;;  %v3126_v14 = vperm.slane %v4557_v20, 3 }
 0xf02   : > { %v3068_v61 = vpop.f32.mrf.mxu2 }
 0xf03   : > { %v4585_v1 = vadd.f32 %v3515_v12, %v3068_v61 }
 0xf05   : > { %v3075_v54 = vmul.f32 0.70710677, %v4585_v1  ;;  %v3073_v16 = vmul.f32 0.5, %v4585_v1 }
 0xf07   : > { %v3077_v51 = vand.u32 2147483647, %v3075_v54  ;;  %vm3115_vm14 = vcmp.lt.f32.partialorder %v3075_v54, 0.0 }
 0xf09   : > { %v3079_v11 = vmul.f32 0.3275911, %v3077_v51  ;;  %v3103_v23 = vsub.f32 0.0, %v3077_v51 }
 0xf0a   : > { %v3070_v8 = vpop.f32.mrf.mxu2 }
 0xf0b   : > { %v3081_v3 = vadd.f32 1.0, %v3079_v11  ;;  %v3071_v19 = vadd.f32 %v3515_v12, %v3070_v8  ;;  %v3105_v27 = vmul.f32 %v3103_v23, %v3077_v51 }
 0xf0d   : > { %3606 = vrcp.f32 %v3081_v3  ;;  %v3076_v7 = vmul.f32 0.70710677, %v3071_v19  ;;  %v3107_v4 = vmul.f32 1.442695, %v3105_v27  ;;  %v3074_v59 = vmul.f32 0.5, %v3071_v19 }
 0xf0f   : > { %v3078_v24 = vand.u32 2147483647, %v3076_v7  ;;  %vm3116_vm4 = vcmp.lt.f32.partialorder %v3076_v7, 0.0 }
 0xf11   : > { %v3080_v13 = vmul.f32 0.3275911, %v3078_v24  ;;  %v3104_v29 = vsub.f32 0.0, %v3078_v24 }
 0xf13   : > { %v3607_v22 = vpop.eup %3606  ;;  %v3082_v25 = vadd.f32 1.0, %v3080_v13  ;;  %v3106_v30 = vmul.f32 %v3104_v29, %v3078_v24 }
 0xf14   : > { %v3085_v0 = vmul.f32 1.0614054, %v3607_v22 }
 0xf15   : > { %3608 = vrcp.f32 %v3082_v25  ;;  %v3109_v33 = vmul.f32 1.442695, %v3106_v30 }
 0xf16   : > { %v3087_v5 = vadd.f32 -1.4531521, %v3085_v0  ;;  %3610 = vpow2.f32 %v3107_v4 }
 0xf17   : > { %3612 = vpow2.f32 %v3109_v33 }
 0xf18   : > { %v3089_v28 = vmul.f32 %v3607_v22, %v3087_v5 }
 0xf1a   : > { %v3091_v31 = vadd.f32 1.4214138, %v3089_v28  ;;  %v3190_v28 = vperm.slane %v4557_v20, 4 }
 0xf1b   : > { %v3609_v17 = vpop.eup %3608 }
 0xf1c   : > { %v3093_v21 = vmul.f32 %v3607_v22, %v3091_v31  ;;  %v3086_v49 = vmul.f32 1.0614054, %v3609_v17  ;;  %v3611_v39 = vpop.eup %3610  ;;  %v3192_v31 = vperm.slane %v4557_v20, 5 }
 0xf1d   : > { %v3613_v38 = vpop.eup %3612 }
 0xf1e   : > { %v3095_v55 = vadd.f32 -0.28449672, %v3093_v21  ;;  %v3088_v43 = vadd.f32 -1.4531521, %v3086_v49 }
 0xf20   : > { %v3097_v58 = vmul.f32 %v3607_v22, %v3095_v55  ;;  %v3090_v32 = vmul.f32 %v3609_v17, %v3088_v43 }
 0xf22   : > { %v3099_v60 = vadd.f32 0.2548296, %v3097_v58  ;;  %v3092_v50 = vadd.f32 1.4214138, %v3090_v32 }
 0xf24   : > { %v3101_v34 = vmul.f32 %v3607_v22, %v3099_v60  ;;  %v3094_v2 = vmul.f32 %v3609_v17, %v3092_v50 }
 0xf26   : > { %v3111_v42 = vmul.f32 %v3611_v39, %v3101_v34  ;;  %v3096_v45 = vadd.f32 -0.28449672, %v3094_v2 }
 0xf28   : > { %v3113_v40 = vsub.f32 1.0, %v3111_v42  ;;  %v3098_v46 = vmul.f32 %v3609_v17, %v3096_v45 }
 0xf2a   : > { %v3100_v44 = vadd.f32 0.2548296, %v3098_v46  ;;  %v3117_v35 = vsub.f32 0.0, %v3113_v40 }
 0xf2c   : > { %v3102_v47 = vmul.f32 %v3609_v17, %v3100_v44  ;;  %v3119_v56 = vsel %vm3115_vm14, %v3117_v35, %v3113_v40 }
 0xf2d   : > { %v3121_v57 = vadd.f32 1.0, %v3119_v56 }
 0xf2e   : > { %v3112_v48 = vmul.f32 %v3613_v38, %v3102_v47 }
 0xf2f   : > { %v3123_v63 = vmul.f32 %v3121_v57, %v3073_v16 }
 0xf30   : > { %v3114_v52 = vsub.f32 1.0, %v3112_v48 }
 0xf32   : > { %v3118_v18 = vsub.f32 0.0, %v3114_v52 }
 0xf34   : > { %v3120_v53 = vsel %vm3116_vm4, %v3118_v18, %v3114_v52 }
 0xf35   : > { %v3122_v62 = vadd.f32 1.0, %v3120_v53 }
 0xf37   : > { %v3124_v37 = vmul.f32 %v3122_v62, %v3074_v59 }
 0xf39   : > { %v3125_v9 = vpack.c.bf16 %v3124_v37, %v3123_v63 }
 0xf3b   : > { %3389 = vmatmul.msk.bf16.vlgmr.msrb.gmra.mxu3 %vm1766_vm3, %v3125_v9 }
 0xfbe   : > { %v3163_v12 = vpop.f32.mrf.mxu3 }
 0xfbf   : > { %v3164_v61 = vadd.f32 %v3163_v12, %v3126_v14 }
 0xfc1   : > { %v3167_v54 = vadd.f32 %v3164_v61, %v4578_v6 }
 0xfc3   : > { %v3168_v51 = vsel %vm381_vm0, %v3167_v54, 0.0 }
 0xfc4   : > { %3169 = vadd.xlane.f32.xlu0 %v3168_v51 }
 0xfc6   : > { %v3165_v11 = vpop.f32.mrf.mxu3 }
0x1037   : > { %v3170_v8 = vpop.xlane.xlu0 %3169 }
0x1038   : > { %v3171_v1 = vmul.f32 %v3170_v8, %v3721_v10 }
0x103a   : > { %v3172_v3 = vsub.f32 %v3167_v54, %v3171_v1 }
0x103c   : > { %v3173_v19 = vmul.f32 %v3172_v3, %v3172_v3 }
0x103e   : > { %v3174_v7 = vsel %vm381_vm0, %v3173_v19, 0.0 }
0x103f   : > { %3175 = vadd.xlane.f32.xlu2 %v3174_v7 }
0x10b2   : > { %v3176_v24 = vpop.xlane.xlu2 %3175 }
0x10b3   : > { %v3177_v13 = vmul.f32 %v3176_v24, %v3721_v10 }
0x10b5   : > { %v3178_v22 = vadd.f32 1e-05, %v3177_v13 }
0x10b7   : > { %3614 = vrsqrt.f32 %v3178_v22  ;;  %vm3185_vm5 = vweird.f32 %v3178_v22 }
0x10bd   : > { %v3615_v23 = vpop.eup %3614 }
0x10be   : > { %v3180_v6 = vmul.f32 %v3615_v23, %v3178_v22  ;;  %vm3186_vm3 = vweird.f32 %v3615_v23 }
0x10bf   : > { %vm3187_vm6 = vmor %vm3185_vm5, %vm3186_vm3 }
0x10c0   : > { %v3181_v25 = vmul.f32 %v3615_v23, %v3180_v6 }
0x10c2   : > { %v3182_v0 = vmul.f32 0.5, %v3181_v25 }
0x10c4   : > { %v3183_v5 = vsub.f32 1.5, %v3182_v0 }
0x10c6   : > { %v3184_v27 = vmul.f32 %v3615_v23, %v3183_v5 }
0x10c8   : > { %v3188_v26 = vsel %vm3187_vm6, %v3615_v23, %v3184_v27 }
0x10c9   : > { %v3189_v17 = vmul.f32 %v3188_v26, %v3172_v3 }
0x10cb   : > { %v3191_v4 = vmul.f32 %v3190_v28, %v3189_v17 }
0x10cd   : > { %v3193_v10 = vadd.f32 %v3192_v31, %v3191_v4 }
0x10cf   : > { %3194 = vst.msk [vmem:[%s375_s18] sm:$0x1] %vm385_vm1, %v3193_v10 }
0x10d0 PF: > { %s20_s13 = sadd.s32 1, %s3630_s13  }
0x10d1   : > { %p17_p4 = scmp.ge.s32.totalorder %s20_s13, 4  }
0x10d3   :  { %19 = sbr.rel (!%p17_p4) target bundleno = 1 (0x1), region = 100 }

</bundles_post_ra>
